<compile_context>
chip_gen: v7x
topology: tpu7x:2x2x1
jax: 0.10.0
libtpu: 0.0.40
codegen_flags: <defaults>
</compile_context>

<pallas_src>
import functools

import jax
import jax.numpy as jnp
from jax.experimental import pallas as pl
from jax.experimental.pallas import tpu as pltpu


# ----------------------------------------------------------------------------
# Fused Pallas kernel (grid = (), single invocation, everything in VMEM)
# ----------------------------------------------------------------------------
def _fused_lstm_linear_kernel(num_layers, T, B, H, x_ref, *refs):
    """Whole forward in one kernel invocation.

    refs layout (inputs, outputs, scratch — positional):
      [wih_0, whh_0, b_0, ..., wih_{L-1}, whh_{L-1}, b_{L-1},
       w_lin, b_lin,                      # remaining inputs
       out_ref, hn_ref, cn_ref,           # outputs
       seq_ref]                           # VMEM scratch (T*B, H) f32

    wih_l : (D_in_l, 4H)   transposed PyTorch weight_ih_l
    whh_l : (H, 4H)        transposed PyTorch weight_hh_l
    b_l   : (1, 4H)        b_ih_l + b_hh_l
    w_lin : (H, O), b_lin : (1, O)
    out_ref: (B*T, O), hn_ref / cn_ref: (L, B, H)
    """
    w_refs = refs[:3 * num_layers]
    wlin_ref = refs[3 * num_layers]
    blin_ref = refs[3 * num_layers + 1]
    out_ref, hn_ref, cn_ref = refs[3 * num_layers + 2:3 * num_layers + 5]
    seq_ref = refs[3 * num_layers + 5]          # t-major hidden seq, (T*B, H)

    def sigmoid(v):
        # Single-EUP-push formulation (vs. exp + reciprocal).
        return 0.5 * jnp.tanh(0.5 * v) + 0.5

    for layer in range(num_layers):
        wih = w_refs[3 * layer][...]                          # (D_in, 4H)
        whh = w_refs[3 * layer + 1][...]                      # (H, 4H)
        bias = w_refs[3 * layer + 2][...]                     # (1, 4H)

        if layer == 0:
            x = x_ref[...]                                    # (B, T, D) f32
            # t-major: row t*B + b  <->  (timestep t, batch b)
            inp = jnp.transpose(x, (1, 0, 2)).reshape(T * B, x.shape[-1])
        else:
            inp = seq_ref[...]                                # (T*B, H)

        # Input projection for the whole sequence as ONE large matmul
        # (hoisted out of the recurrence).
        gates_x = jnp.dot(inp, wih,
                          preferred_element_type=jnp.float32) + bias  # (T*B, 4H)

        h = jnp.zeros((B, H), jnp.float32)
        c = jnp.zeros((B, H), jnp.float32)
        # TODO(synk): whh could be held weight-stationary in the MXU
        #             (pltpu.matmul_push_rhs / matmul_acc_lhs) to shave the
        #             per-step push latency; kept on jnp.dot for portability.
        for t in range(T):                                    # static unroll
            g = gates_x[t * B:(t + 1) * B, :] + jnp.dot(
                h, whh, preferred_element_type=jnp.float32)   # (B, 4H)
            i_g = sigmoid(g[:, 0 * H:1 * H])
            f_g = sigmoid(g[:, 1 * H:2 * H])
            g_g = jnp.tanh(g[:, 2 * H:3 * H])
            o_g = sigmoid(g[:, 3 * H:4 * H])
            c = f_g * c + i_g * g_g
            h = o_g * jnp.tanh(c)
            seq_ref[t * B:(t + 1) * B, :] = h                 # static slice

        hn_ref[layer] = h
        cn_ref[layer] = c

    # Fused Linear head on the t-major sequence (one big matmul). Only the
    # small (T, B, O) result is reordered to PyTorch's batch-major
    # lstm_out.reshape(-1, H) row order.
    out_tmaj = jnp.dot(seq_ref[...], wlin_ref[...],
                       preferred_element_type=jnp.float32) + blin_ref[...]
    out_bt = jnp.transpose(out_tmaj.reshape(T, B, -1),
                           (1, 0, 2)).reshape(B * T, -1)
    out_ref[...] = out_bt


# ----------------------------------------------------------------------------
# Wrapper
# ----------------------------------------------------------------------------
class PallasLSTMModel:
    """Mirror of the PyTorch Model: 3-layer LSTM (batch_first) + Linear."""

    def __init__(self, input_dim, hidden_dim, output_dim, num_layers, key):
        self.input_dim = input_dim
        self.hidden_dim = hidden_dim
        self.output_dim = output_dim
        self.num_layers = num_layers

        k = 1.0 / jnp.sqrt(hidden_dim)
        keys = jax.random.split(key, num_layers * 4 + 2)
        # Parameters stored pre-transposed / pre-summed so the per-call wrapper
        # issues zero extra XLA ops.
        self.layers = []   # (wih_t (D_in,4H), whh_t (H,4H), bias (1,4H))
        ki = 0
        for layer in range(num_layers):
            d_in = input_dim if layer == 0 else hidden_dim
            w_ih = jax.random.uniform(keys[ki], (4 * hidden_dim, d_in),
                                      minval=-k, maxval=k); ki += 1
            w_hh = jax.random.uniform(keys[ki], (4 * hidden_dim, hidden_dim),
                                      minval=-k, maxval=k); ki += 1
            b_ih = jax.random.uniform(keys[ki], (4 * hidden_dim,),
                                      minval=-k, maxval=k); ki += 1
            b_hh = jax.random.uniform(keys[ki], (4 * hidden_dim,),
                                      minval=-k, maxval=k); ki += 1
            self.layers.append((jnp.transpose(w_ih),
                                jnp.transpose(w_hh),
                                (b_ih + b_hh).reshape(1, 4 * hidden_dim)))
        w_lin = jax.random.uniform(keys[ki], (output_dim, hidden_dim),
                                   minval=-k, maxval=k); ki += 1
        b_lin = jax.random.uniform(keys[ki], (output_dim,),
                                   minval=-k, maxval=k)
        self.w_lin_t = jnp.transpose(w_lin)                   # (H, O)
        self.b_lin = b_lin.reshape(1, output_dim)             # (1, O)

        # Workload is launch/overhead-bound -> jit the whole forward so the
        # eager dispatch of pallas_call + param flattening is paid once.
        self._jit_forward = jax.jit(self._forward)

    def _forward(self, x):
        B, T, _ = x.shape
        H, L, O = self.hidden_dim, self.num_layers, self.output_dim

        flat_params = []
        for p in self.layers:
            flat_params.extend(p)
        flat_params += [self.w_lin_t, self.b_lin]

        kernel = functools.partial(_fused_lstm_linear_kernel, L, T, B, H)
        vmem_spec = pl.BlockSpec(memory_space=pltpu.MemorySpace.VMEM)
        out, h_n, c_n = pl.pallas_call(
            kernel,
            out_shape=(
                jax.ShapeDtypeStruct((B * T, O), jnp.float32),
                jax.ShapeDtypeStruct((L, B, H), jnp.float32),
                jax.ShapeDtypeStruct((L, B, H), jnp.float32),
            ),
            in_specs=[vmem_spec] * (1 + len(flat_params)),
            out_specs=(vmem_spec, vmem_spec, vmem_spec),
            scratch_shapes=[pltpu.VMEM((T * B, H), jnp.float32)],
        )(x, *flat_params)
        return out, (h_n, c_n)

    def __call__(self, x):
        """x: (B, T, input_dim) -> (out (B*T, O), (h_n, c_n) each (L, B, H))."""
        return self._jit_forward(x)

    # --- pure-JAX reference for correctness checking -----------------------
    def reference(self, x):
        B, T, _ = x.shape
        H = self.hidden_dim
        cur = x.astype(jnp.float32)
        for (wih_t, whh_t, bias) in self.layers:
            h = jnp.zeros((B, H), jnp.float32)
            c = jnp.zeros((B, H), jnp.float32)
            ys = []
            for t in range(T):
                g = cur[:, t, :] @ wih_t + h @ whh_t + bias
                i = jax.nn.sigmoid(g[:, 0 * H:1 * H])
                f = jax.nn.sigmoid(g[:, 1 * H:2 * H])
                gg = jnp.tanh(g[:, 2 * H:3 * H])
                o = jax.nn.sigmoid(g[:, 3 * H:4 * H])
                c = f * c + i * gg
                h = o * jnp.tanh(c)
                ys.append(h)
            cur = jnp.stack(ys, axis=1)                       # (B, T, H)
        flat = cur.reshape(-1, H)
        return flat @ self.w_lin_t + self.b_lin


if __name__ == "__main__":
    # Small shapes consistent with the module's forward (hidden shrunk from 256).
    B, T = 8, 8
    INPUT_DIM, HIDDEN_DIM, OUTPUT_DIM, NUM_LAYERS = 32, 128, 8, 3

    key = jax.random.PRNGKey(0)
    k_params, k_x = jax.random.split(key)
    model = PallasLSTMModel(INPUT_DIM, HIDDEN_DIM, OUTPUT_DIM, NUM_LAYERS,
                            k_params)

    x = jax.random.normal(k_x, (B, T, INPUT_DIM), dtype=jnp.float32)

    out, (h_n, c_n) = model(x)
    out = jax.block_until_ready(out)
    h_n = jax.block_until_ready(h_n)
    c_n = jax.block_until_ready(c_n)

    assert out.shape == (B * T, OUTPUT_DIM)
    assert h_n.shape == (NUM_LAYERS, B, HIDDEN_DIM)
    assert c_n.shape == (NUM_LAYERS, B, HIDDEN_DIM)

    ref = jax.block_until_ready(model.reference(x))
    import numpy as np
    np.testing.assert_allclose(np.asarray(out), np.asarray(ref),
                               rtol=2e-4, atol=2e-4)

    print("KERNEL_OK")
</pallas_src>

<mosaic_0001>
module attributes {stable_mosaic.version = 11 : i64} {
  func.func @_fused_lstm_linear_kernel(%arg0: memref<8x8x32xf32, #tpu.memory_space<vmem>>, %arg1: memref<32x512xf32, #tpu.memory_space<vmem>>, %arg2: memref<128x512xf32, #tpu.memory_space<vmem>>, %arg3: memref<1x512xf32, #tpu.memory_space<vmem>>, %arg4: memref<128x512xf32, #tpu.memory_space<vmem>>, %arg5: memref<128x512xf32, #tpu.memory_space<vmem>>, %arg6: memref<1x512xf32, #tpu.memory_space<vmem>>, %arg7: memref<128x512xf32, #tpu.memory_space<vmem>>, %arg8: memref<128x512xf32, #tpu.memory_space<vmem>>, %arg9: memref<1x512xf32, #tpu.memory_space<vmem>>, %arg10: memref<128x8xf32, #tpu.memory_space<vmem>>, %arg11: memref<1x8xf32, #tpu.memory_space<vmem>>, %arg12: memref<64x8xf32, #tpu.memory_space<vmem>>, %arg13: memref<3x8x128xf32, #tpu.memory_space<vmem>>, %arg14: memref<3x8x128xf32, #tpu.memory_space<vmem>>, %arg15: memref<64x128xf32, #tpu.memory_space<vmem>>) attributes {dimension_semantics = [], scalar_prefetch = 0 : i64, scratch_operands = 1 : i64, tpu.core_type = #tpu.core_type<tc>} {
    %c0 = arith.constant 0 : index
    %c0_0 = arith.constant 0 : index
    %0 = vector.load %arg1[%c0, %c0_0] : memref<32x512xf32, #tpu.memory_space<vmem>>, vector<32x512xf32>
    %c0_1 = arith.constant 0 : index
    %c0_2 = arith.constant 0 : index
    %1 = vector.load %arg2[%c0_1, %c0_2] : memref<128x512xf32, #tpu.memory_space<vmem>>, vector<128x512xf32>
    %c0_3 = arith.constant 0 : index
    %c0_4 = arith.constant 0 : index
    %2 = vector.load %arg3[%c0_3, %c0_4] : memref<1x512xf32, #tpu.memory_space<vmem>>, vector<1x512xf32>
    %c0_5 = arith.constant 0 : index
    %c0_6 = arith.constant 0 : index
    %c0_7 = arith.constant 0 : index
    %3 = vector.load %arg0[%c0_5, %c0_6, %c0_7] : memref<8x8x32xf32, #tpu.memory_space<vmem>>, vector<8x8x32xf32>
    %4 = tpu.transpose %3, [1, 0, 2] : vector<8x8x32xf32> -> vector<8x8x32xf32>
    %5 = vector.shape_cast %4 : vector<8x8x32xf32> to vector<64x32xf32>
    %cst = arith.constant dense<0.000000e+00> : vector<64x512xf32>
    %6 = tpu.matmul %5, %0, %cst {dimension_numbers = #tpu.dot_dimension_numbers<[1], [0], [0], [1], [0, 0, 1, 1], [], []>} : vector<64x32xf32>, vector<32x512xf32>, vector<64x512xf32> -> vector<64x512xf32>
    %7 = vector.broadcast %2 : vector<1x512xf32> to vector<64x512xf32>
    %8 = arith.addf %6, %7 : vector<64x512xf32>
    %cst_8 = arith.constant 0.000000e+00 : f32
    %9 = vector.broadcast %cst_8 : f32 to vector<8x128xf32>
    %cst_9 = arith.constant 0.000000e+00 : f32
    %10 = vector.broadcast %cst_9 : f32 to vector<8x128xf32>
    %11 = vector.extract_strided_slice %8 {offsets = [0, 0], sizes = [8, 512], strides = [1, 1]} : vector<64x512xf32> to vector<8x512xf32>
    %cst_10 = arith.constant dense<0.000000e+00> : vector<8x512xf32>
    %12 = tpu.matmul %9, %1, %cst_10 {dimension_numbers = #tpu.dot_dimension_numbers<[1], [0], [0], [1], [0, 0, 1, 1], [], []>} : vector<8x128xf32>, vector<128x512xf32>, vector<8x512xf32> -> vector<8x512xf32>
    %13 = arith.addf %11, %12 : vector<8x512xf32>
    %14 = vector.extract_strided_slice %13 {offsets = [0, 0], sizes = [8, 128], strides = [1, 1]} : vector<8x512xf32> to vector<8x128xf32>
    %cst_11 = arith.constant 5.000000e-01 : f32
    %15 = vector.broadcast %cst_11 : f32 to vector<8x128xf32>
    %16 = arith.mulf %15, %14 : vector<8x128xf32>
    %17 = math.tanh %16 : vector<8x128xf32>
    %cst_12 = arith.constant 5.000000e-01 : f32
    %18 = vector.broadcast %cst_12 : f32 to vector<8x128xf32>
    %19 = arith.mulf %18, %17 : vector<8x128xf32>
    %cst_13 = arith.constant 5.000000e-01 : f32
    %20 = vector.broadcast %cst_13 : f32 to vector<8x128xf32>
    %21 = arith.addf %19, %20 : vector<8x128xf32>
    %22 = vector.extract_strided_slice %13 {offsets = [0, 128], sizes = [8, 128], strides = [1, 1]} : vector<8x512xf32> to vector<8x128xf32>
    %cst_14 = arith.constant 5.000000e-01 : f32
    %23 = vector.broadcast %cst_14 : f32 to vector<8x128xf32>
    %24 = arith.mulf %23, %22 : vector<8x128xf32>
    %25 = math.tanh %24 : vector<8x128xf32>
    %cst_15 = arith.constant 5.000000e-01 : f32
    %26 = vector.broadcast %cst_15 : f32 to vector<8x128xf32>
    %27 = arith.mulf %26, %25 : vector<8x128xf32>
    %cst_16 = arith.constant 5.000000e-01 : f32
    %28 = vector.broadcast %cst_16 : f32 to vector<8x128xf32>
    %29 = arith.addf %27, %28 : vector<8x128xf32>
    %30 = vector.extract_strided_slice %13 {offsets = [0, 256], sizes = [8, 128], strides = [1, 1]} : vector<8x512xf32> to vector<8x128xf32>
    %31 = math.tanh %30 : vector<8x128xf32>
    %32 = vector.extract_strided_slice %13 {offsets = [0, 384], sizes = [8, 128], strides = [1, 1]} : vector<8x512xf32> to vector<8x128xf32>
    %cst_17 = arith.constant 5.000000e-01 : f32
    %33 = vector.broadcast %cst_17 : f32 to vector<8x128xf32>
    %34 = arith.mulf %33, %32 : vector<8x128xf32>
    %35 = math.tanh %34 : vector<8x128xf32>
    %cst_18 = arith.constant 5.000000e-01 : f32
    %36 = vector.broadcast %cst_18 : f32 to vector<8x128xf32>
    %37 = arith.mulf %36, %35 : vector<8x128xf32>
    %cst_19 = arith.constant 5.000000e-01 : f32
    %38 = vector.broadcast %cst_19 : f32 to vector<8x128xf32>
    %39 = arith.addf %37, %38 : vector<8x128xf32>
    %40 = arith.mulf %29, %10 : vector<8x128xf32>
    %41 = arith.mulf %21, %31 : vector<8x128xf32>
    %42 = arith.addf %40, %41 : vector<8x128xf32>
    %43 = math.tanh %42 : vector<8x128xf32>
    %44 = arith.mulf %39, %43 : vector<8x128xf32>
    %c0_20 = arith.constant 0 : index
    %c0_21 = arith.constant 0 : index
    %45 = vector.load %arg15[%c0_20, %c0_21] : memref<64x128xf32, #tpu.memory_space<vmem>>, vector<8x128xf32>
    tpu.vector_store %arg15[%c0_20, %c0_21], %44 {strides = array<i32>} : memref<64x128xf32, #tpu.memory_space<vmem>>, vector<8x128xf32>,
    %46 = vector.extract_strided_slice %8 {offsets = [8, 0], sizes = [8, 512], strides = [1, 1]} : vector<64x512xf32> to vector<8x512xf32>
    %cst_22 = arith.constant dense<0.000000e+00> : vector<8x512xf32>
    %47 = tpu.matmul %44, %1, %cst_22 {dimension_numbers = #tpu.dot_dimension_numbers<[1], [0], [0], [1], [0, 0, 1, 1], [], []>} : vector<8x128xf32>, vector<128x512xf32>, vector<8x512xf32> -> vector<8x512xf32>
    %48 = arith.addf %46, %47 : vector<8x512xf32>
    %49 = vector.extract_strided_slice %48 {offsets = [0, 0], sizes = [8, 128], strides = [1, 1]} : vector<8x512xf32> to vector<8x128xf32>
    %cst_23 = arith.constant 5.000000e-01 : f32
    %50 = vector.broadcast %cst_23 : f32 to vector<8x128xf32>
    %51 = arith.mulf %50, %49 : vector<8x128xf32>
    %52 = math.tanh %51 : vector<8x128xf32>
    %cst_24 = arith.constant 5.000000e-01 : f32
    %53 = vector.broadcast %cst_24 : f32 to vector<8x128xf32>
    %54 = arith.mulf %53, %52 : vector<8x128xf32>
    %cst_25 = arith.constant 5.000000e-01 : f32
    %55 = vector.broadcast %cst_25 : f32 to vector<8x128xf32>
    %56 = arith.addf %54, %55 : vector<8x128xf32>
    %57 = vector.extract_strided_slice %48 {offsets = [0, 128], sizes = [8, 128], strides = [1, 1]} : vector<8x512xf32> to vector<8x128xf32>
    %cst_26 = arith.constant 5.000000e-01 : f32
    %58 = vector.broadcast %cst_26 : f32 to vector<8x128xf32>
    %59 = arith.mulf %58, %57 : vector<8x128xf32>
    %60 = math.tanh %59 : vector<8x128xf32>
    %cst_27 = arith.constant 5.000000e-01 : f32
    %61 = vector.broadcast %cst_27 : f32 to vector<8x128xf32>
    %62 = arith.mulf %61, %60 : vector<8x128xf32>
    %cst_28 = arith.constant 5.000000e-01 : f32
    %63 = vector.broadcast %cst_28 : f32 to vector<8x128xf32>
    %64 = arith.addf %62, %63 : vector<8x128xf32>
    %65 = vector.extract_strided_slice %48 {offsets = [0, 256], sizes = [8, 128], strides = [1, 1]} : vector<8x512xf32> to vector<8x128xf32>
    %66 = math.tanh %65 : vector<8x128xf32>
    %67 = vector.extract_strided_slice %48 {offsets = [0, 384], sizes = [8, 128], strides = [1, 1]} : vector<8x512xf32> to vector<8x128xf32>
    %cst_29 = arith.constant 5.000000e-01 : f32
    %68 = vector.broadcast %cst_29 : f32 to vector<8x128xf32>
    %69 = arith.mulf %68, %67 : vector<8x128xf32>
    %70 = math.tanh %69 : vector<8x128xf32>
    %cst_30 = arith.constant 5.000000e-01 : f32
    %71 = vector.broadcast %cst_30 : f32 to vector<8x128xf32>
    %72 = arith.mulf %71, %70 : vector<8x128xf32>
    %cst_31 = arith.constant 5.000000e-01 : f32
    %73 = vector.broadcast %cst_31 : f32 to vector<8x128xf32>
    %74 = arith.addf %72, %73 : vector<8x128xf32>
    %75 = arith.mulf %64, %42 : vector<8x128xf32>
    %76 = arith.mulf %56, %66 : vector<8x128xf32>
    %77 = arith.addf %75, %76 : vector<8x128xf32>
    %78 = math.tanh %77 : vector<8x128xf32>
    %79 = arith.mulf %74, %78 : vector<8x128xf32>
    %c8 = arith.constant 8 : index
    %c0_32 = arith.constant 0 : index
    %80 = vector.load %arg15[%c8, %c0_32] : memref<64x128xf32, #tpu.memory_space<vmem>>, vector<8x128xf32>
    tpu.vector_store %arg15[%c8, %c0_32], %79 {strides = array<i32>} : memref<64x128xf32, #tpu.memory_space<vmem>>, vector<8x128xf32>,
    %81 = vector.extract_strided_slice %8 {offsets = [16, 0], sizes = [8, 512], strides = [1, 1]} : vector<64x512xf32> to vector<8x512xf32>
    %cst_33 = arith.constant dense<0.000000e+00> : vector<8x512xf32>
    %82 = tpu.matmul %79, %1, %cst_33 {dimension_numbers = #tpu.dot_dimension_numbers<[1], [0], [0], [1], [0, 0, 1, 1], [], []>} : vector<8x128xf32>, vector<128x512xf32>, vector<8x512xf32> -> vector<8x512xf32>
    %83 = arith.addf %81, %82 : vector<8x512xf32>
    %84 = vector.extract_strided_slice %83 {offsets = [0, 0], sizes = [8, 128], strides = [1, 1]} : vector<8x512xf32> to vector<8x128xf32>
    %cst_34 = arith.constant 5.000000e-01 : f32
    %85 = vector.broadcast %cst_34 : f32 to vector<8x128xf32>
    %86 = arith.mulf %85, %84 : vector<8x128xf32>
    %87 = math.tanh %86 : vector<8x128xf32>
    %cst_35 = arith.constant 5.000000e-01 : f32
    %88 = vector.broadcast %cst_35 : f32 to vector<8x128xf32>
    %89 = arith.mulf %88, %87 : vector<8x128xf32>
    %cst_36 = arith.constant 5.000000e-01 : f32
    %90 = vector.broadcast %cst_36 : f32 to vector<8x128xf32>
    %91 = arith.addf %89, %90 : vector<8x128xf32>
    %92 = vector.extract_strided_slice %83 {offsets = [0, 128], sizes = [8, 128], strides = [1, 1]} : vector<8x512xf32> to vector<8x128xf32>
    %cst_37 = arith.constant 5.000000e-01 : f32
    %93 = vector.broadcast %cst_37 : f32 to vector<8x128xf32>
    %94 = arith.mulf %93, %92 : vector<8x128xf32>
    %95 = math.tanh %94 : vector<8x128xf32>
    %cst_38 = arith.constant 5.000000e-01 : f32
    %96 = vector.broadcast %cst_38 : f32 to vector<8x128xf32>
    %97 = arith.mulf %96, %95 : vector<8x128xf32>
    %cst_39 = arith.constant 5.000000e-01 : f32
    %98 = vector.broadcast %cst_39 : f32 to vector<8x128xf32>
    %99 = arith.addf %97, %98 : vector<8x128xf32>
    %100 = vector.extract_strided_slice %83 {offsets = [0, 256], sizes = [8, 128], strides = [1, 1]} : vector<8x512xf32> to vector<8x128xf32>
    %101 = math.tanh %100 : vector<8x128xf32>
    %102 = vector.extract_strided_slice %83 {offsets = [0, 384], sizes = [8, 128], strides = [1, 1]} : vector<8x512xf32> to vector<8x128xf32>
    %cst_40 = arith.constant 5.000000e-01 : f32
    %103 = vector.broadcast %cst_40 : f32 to vector<8x128xf32>
    %104 = arith.mulf %103, %102 : vector<8x128xf32>
    %105 = math.tanh %104 : vector<8x128xf32>
    %cst_41 = arith.constant 5.000000e-01 : f32
    %106 = vector.broadcast %cst_41 : f32 to vector<8x128xf32>
    %107 = arith.mulf %106, %105 : vector<8x128xf32>
    %cst_42 = arith.constant 5.000000e-01 : f32
    %108 = vector.broadcast %cst_42 : f32 to vector<8x128xf32>
    %109 = arith.addf %107, %108 : vector<8x128xf32>
    %110 = arith.mulf %99, %77 : vector<8x128xf32>
    %111 = arith.mulf %91, %101 : vector<8x128xf32>
    %112 = arith.addf %110, %111 : vector<8x128xf32>
    %113 = math.tanh %112 : vector<8x128xf32>
    %114 = arith.mulf %109, %113 : vector<8x128xf32>
    %c16 = arith.constant 16 : index
    %c0_43 = arith.constant 0 : index
    %115 = vector.load %arg15[%c16, %c0_43] : memref<64x128xf32, #tpu.memory_space<vmem>>, vector<8x128xf32>
    tpu.vector_store %arg15[%c16, %c0_43], %114 {strides = array<i32>} : memref<64x128xf32, #tpu.memory_space<vmem>>, vector<8x128xf32>,
    %116 = vector.extract_strided_slice %8 {offsets = [24, 0], sizes = [8, 512], strides = [1, 1]} : vector<64x512xf32> to vector<8x512xf32>
    %cst_44 = arith.constant dense<0.000000e+00> : vector<8x512xf32>
    %117 = tpu.matmul %114, %1, %cst_44 {dimension_numbers = #tpu.dot_dimension_numbers<[1], [0], [0], [1], [0, 0, 1, 1], [], []>} : vector<8x128xf32>, vector<128x512xf32>, vector<8x512xf32> -> vector<8x512xf32>
    %118 = arith.addf %116, %117 : vector<8x512xf32>
    %119 = vector.extract_strided_slice %118 {offsets = [0, 0], sizes = [8, 128], strides = [1, 1]} : vector<8x512xf32> to vector<8x128xf32>
    %cst_45 = arith.constant 5.000000e-01 : f32
    %120 = vector.broadcast %cst_45 : f32 to vector<8x128xf32>
    %121 = arith.mulf %120, %119 : vector<8x128xf32>
    %122 = math.tanh %121 : vector<8x128xf32>
    %cst_46 = arith.constant 5.000000e-01 : f32
    %123 = vector.broadcast %cst_46 : f32 to vector<8x128xf32>
    %124 = arith.mulf %123, %122 : vector<8x128xf32>
    %cst_47 = arith.constant 5.000000e-01 : f32
    %125 = vector.broadcast %cst_47 : f32 to vector<8x128xf32>
    %126 = arith.addf %124, %125 : vector<8x128xf32>
    %127 = vector.extract_strided_slice %118 {offsets = [0, 128], sizes = [8, 128], strides = [1, 1]} : vector<8x512xf32> to vector<8x128xf32>
    %cst_48 = arith.constant 5.000000e-01 : f32
    %128 = vector.broadcast %cst_48 : f32 to vector<8x128xf32>
    %129 = arith.mulf %128, %127 : vector<8x128xf32>
    %130 = math.tanh %129 : vector<8x128xf32>
    %cst_49 = arith.constant 5.000000e-01 : f32
    %131 = vector.broadcast %cst_49 : f32 to vector<8x128xf32>
    %132 = arith.mulf %131, %130 : vector<8x128xf32>
    %cst_50 = arith.constant 5.000000e-01 : f32
    %133 = vector.broadcast %cst_50 : f32 to vector<8x128xf32>
    %134 = arith.addf %132, %133 : vector<8x128xf32>
    %135 = vector.extract_strided_slice %118 {offsets = [0, 256], sizes = [8, 128], strides = [1, 1]} : vector<8x512xf32> to vector<8x128xf32>
    %136 = math.tanh %135 : vector<8x128xf32>
    %137 = vector.extract_strided_slice %118 {offsets = [0, 384], sizes = [8, 128], strides = [1, 1]} : vector<8x512xf32> to vector<8x128xf32>
    %cst_51 = arith.constant 5.000000e-01 : f32
    %138 = vector.broadcast %cst_51 : f32 to vector<8x128xf32>
    %139 = arith.mulf %138, %137 : vector<8x128xf32>
    %140 = math.tanh %139 : vector<8x128xf32>
    %cst_52 = arith.constant 5.000000e-01 : f32
    %141 = vector.broadcast %cst_52 : f32 to vector<8x128xf32>
    %142 = arith.mulf %141, %140 : vector<8x128xf32>
    %cst_53 = arith.constant 5.000000e-01 : f32
    %143 = vector.broadcast %cst_53 : f32 to vector<8x128xf32>
    %144 = arith.addf %142, %143 : vector<8x128xf32>
    %145 = arith.mulf %134, %112 : vector<8x128xf32>
    %146 = arith.mulf %126, %136 : vector<8x128xf32>
    %147 = arith.addf %145, %146 : vector<8x128xf32>
    %148 = math.tanh %147 : vector<8x128xf32>
    %149 = arith.mulf %144, %148 : vector<8x128xf32>
    %c24 = arith.constant 24 : index
    %c0_54 = arith.constant 0 : index
    %150 = vector.load %arg15[%c24, %c0_54] : memref<64x128xf32, #tpu.memory_space<vmem>>, vector<8x128xf32>
    tpu.vector_store %arg15[%c24, %c0_54], %149 {strides = array<i32>} : memref<64x128xf32, #tpu.memory_space<vmem>>, vector<8x128xf32>,
    %151 = vector.extract_strided_slice %8 {offsets = [32, 0], sizes = [8, 512], strides = [1, 1]} : vector<64x512xf32> to vector<8x512xf32>
    %cst_55 = arith.constant dense<0.000000e+00> : vector<8x512xf32>
    %152 = tpu.matmul %149, %1, %cst_55 {dimension_numbers = #tpu.dot_dimension_numbers<[1], [0], [0], [1], [0, 0, 1, 1], [], []>} : vector<8x128xf32>, vector<128x512xf32>, vector<8x512xf32> -> vector<8x512xf32>
    %153 = arith.addf %151, %152 : vector<8x512xf32>
    %154 = vector.extract_strided_slice %153 {offsets = [0, 0], sizes = [8, 128], strides = [1, 1]} : vector<8x512xf32> to vector<8x128xf32>
    %cst_56 = arith.constant 5.000000e-01 : f32
    %155 = vector.broadcast %cst_56 : f32 to vector<8x128xf32>
    %156 = arith.mulf %155, %154 : vector<8x128xf32>
    %157 = math.tanh %156 : vector<8x128xf32>
    %cst_57 = arith.constant 5.000000e-01 : f32
    %158 = vector.broadcast %cst_57 : f32 to vector<8x128xf32>
    %159 = arith.mulf %158, %157 : vector<8x128xf32>
    %cst_58 = arith.constant 5.000000e-01 : f32
    %160 = vector.broadcast %cst_58 : f32 to vector<8x128xf32>
    %161 = arith.addf %159, %160 : vector<8x128xf32>
    %162 = vector.extract_strided_slice %153 {offsets = [0, 128], sizes = [8, 128], strides = [1, 1]} : vector<8x512xf32> to vector<8x128xf32>
    %cst_59 = arith.constant 5.000000e-01 : f32
    %163 = vector.broadcast %cst_59 : f32 to vector<8x128xf32>
    %164 = arith.mulf %163, %162 : vector<8x128xf32>
    %165 = math.tanh %164 : vector<8x128xf32>
    %cst_60 = arith.constant 5.000000e-01 : f32
    %166 = vector.broadcast %cst_60 : f32 to vector<8x128xf32>
    %167 = arith.mulf %166, %165 : vector<8x128xf32>
    %cst_61 = arith.constant 5.000000e-01 : f32
    %168 = vector.broadcast %cst_61 : f32 to vector<8x128xf32>
    %169 = arith.addf %167, %168 : vector<8x128xf32>
    %170 = vector.extract_strided_slice %153 {offsets = [0, 256], sizes = [8, 128], strides = [1, 1]} : vector<8x512xf32> to vector<8x128xf32>
    %171 = math.tanh %170 : vector<8x128xf32>
    %172 = vector.extract_strided_slice %153 {offsets = [0, 384], sizes = [8, 128], strides = [1, 1]} : vector<8x512xf32> to vector<8x128xf32>
    %cst_62 = arith.constant 5.000000e-01 : f32
    %173 = vector.broadcast %cst_62 : f32 to vector<8x128xf32>
    %174 = arith.mulf %173, %172 : vector<8x128xf32>
    %175 = math.tanh %174 : vector<8x128xf32>
    %cst_63 = arith.constant 5.000000e-01 : f32
    %176 = vector.broadcast %cst_63 : f32 to vector<8x128xf32>
    %177 = arith.mulf %176, %175 : vector<8x128xf32>
    %cst_64 = arith.constant 5.000000e-01 : f32
    %178 = vector.broadcast %cst_64 : f32 to vector<8x128xf32>
    %179 = arith.addf %177, %178 : vector<8x128xf32>
    %180 = arith.mulf %169, %147 : vector<8x128xf32>
    %181 = arith.mulf %161, %171 : vector<8x128xf32>
    %182 = arith.addf %180, %181 : vector<8x128xf32>
    %183 = math.tanh %182 : vector<8x128xf32>
    %184 = arith.mulf %179, %183 : vector<8x128xf32>
    %c32 = arith.constant 32 : index
    %c0_65 = arith.constant 0 : index
    %185 = vector.load %arg15[%c32, %c0_65] : memref<64x128xf32, #tpu.memory_space<vmem>>, vector<8x128xf32>
    tpu.vector_store %arg15[%c32, %c0_65], %184 {strides = array<i32>} : memref<64x128xf32, #tpu.memory_space<vmem>>, vector<8x128xf32>,
    %186 = vector.extract_strided_slice %8 {offsets = [40, 0], sizes = [8, 512], strides = [1, 1]} : vector<64x512xf32> to vector<8x512xf32>
    %cst_66 = arith.constant dense<0.000000e+00> : vector<8x512xf32>
    %187 = tpu.matmul %184, %1, %cst_66 {dimension_numbers = #tpu.dot_dimension_numbers<[1], [0], [0], [1], [0, 0, 1, 1], [], []>} : vector<8x128xf32>, vector<128x512xf32>, vector<8x512xf32> -> vector<8x512xf32>
    %188 = arith.addf %186, %187 : vector<8x512xf32>
    %189 = vector.extract_strided_slice %188 {offsets = [0, 0], sizes = [8, 128], strides = [1, 1]} : vector<8x512xf32> to vector<8x128xf32>
    %cst_67 = arith.constant 5.000000e-01 : f32
    %190 = vector.broadcast %cst_67 : f32 to vector<8x128xf32>
    %191 = arith.mulf %190, %189 : vector<8x128xf32>
    %192 = math.tanh %191 : vector<8x128xf32>
    %cst_68 = arith.constant 5.000000e-01 : f32
    %193 = vector.broadcast %cst_68 : f32 to vector<8x128xf32>
    %194 = arith.mulf %193, %192 : vector<8x128xf32>
    %cst_69 = arith.constant 5.000000e-01 : f32
    %195 = vector.broadcast %cst_69 : f32 to vector<8x128xf32>
    %196 = arith.addf %194, %195 : vector<8x128xf32>
    %197 = vector.extract_strided_slice %188 {offsets = [0, 128], sizes = [8, 128], strides = [1, 1]} : vector<8x512xf32> to vector<8x128xf32>
    %cst_70 = arith.constant 5.000000e-01 : f32
    %198 = vector.broadcast %cst_70 : f32 to vector<8x128xf32>
    %199 = arith.mulf %198, %197 : vector<8x128xf32>
    %200 = math.tanh %199 : vector<8x128xf32>
    %cst_71 = arith.constant 5.000000e-01 : f32
    %201 = vector.broadcast %cst_71 : f32 to vector<8x128xf32>
    %202 = arith.mulf %201, %200 : vector<8x128xf32>
    %cst_72 = arith.constant 5.000000e-01 : f32
    %203 = vector.broadcast %cst_72 : f32 to vector<8x128xf32>
    %204 = arith.addf %202, %203 : vector<8x128xf32>
    %205 = vector.extract_strided_slice %188 {offsets = [0, 256], sizes = [8, 128], strides = [1, 1]} : vector<8x512xf32> to vector<8x128xf32>
    %206 = math.tanh %205 : vector<8x128xf32>
    %207 = vector.extract_strided_slice %188 {offsets = [0, 384], sizes = [8, 128], strides = [1, 1]} : vector<8x512xf32> to vector<8x128xf32>
    %cst_73 = arith.constant 5.000000e-01 : f32
    %208 = vector.broadcast %cst_73 : f32 to vector<8x128xf32>
    %209 = arith.mulf %208, %207 : vector<8x128xf32>
    %210 = math.tanh %209 : vector<8x128xf32>
    %cst_74 = arith.constant 5.000000e-01 : f32
    %211 = vector.broadcast %cst_74 : f32 to vector<8x128xf32>
    %212 = arith.mulf %211, %210 : vector<8x128xf32>
    %cst_75 = arith.constant 5.000000e-01 : f32
    %213 = vector.broadcast %cst_75 : f32 to vector<8x128xf32>
    %214 = arith.addf %212, %213 : vector<8x128xf32>
    %215 = arith.mulf %204, %182 : vector<8x128xf32>
    %216 = arith.mulf %196, %206 : vector<8x128xf32>
    %217 = arith.addf %215, %216 : vector<8x128xf32>
    %218 = math.tanh %217 : vector<8x128xf32>
    %219 = arith.mulf %214, %218 : vector<8x128xf32>
    %c40 = arith.constant 40 : index
    %c0_76 = arith.constant 0 : index
    %220 = vector.load %arg15[%c40, %c0_76] : memref<64x128xf32, #tpu.memory_space<vmem>>, vector<8x128xf32>
    tpu.vector_store %arg15[%c40, %c0_76], %219 {strides = array<i32>} : memref<64x128xf32, #tpu.memory_space<vmem>>, vector<8x128xf32>,
    %221 = vector.extract_strided_slice %8 {offsets = [48, 0], sizes = [8, 512], strides = [1, 1]} : vector<64x512xf32> to vector<8x512xf32>
    %cst_77 = arith.constant dense<0.000000e+00> : vector<8x512xf32>
    %222 = tpu.matmul %219, %1, %cst_77 {dimension_numbers = #tpu.dot_dimension_numbers<[1], [0], [0], [1], [0, 0, 1, 1], [], []>} : vector<8x128xf32>, vector<128x512xf32>, vector<8x512xf32> -> vector<8x512xf32>
    %223 = arith.addf %221, %222 : vector<8x512xf32>
    %224 = vector.extract_strided_slice %223 {offsets = [0, 0], sizes = [8, 128], strides = [1, 1]} : vector<8x512xf32> to vector<8x128xf32>
    %cst_78 = arith.constant 5.000000e-01 : f32
    %225 = vector.broadcast %cst_78 : f32 to vector<8x128xf32>
    %226 = arith.mulf %225, %224 : vector<8x128xf32>
    %227 = math.tanh %226 : vector<8x128xf32>
    %cst_79 = arith.constant 5.000000e-01 : f32
    %228 = vector.broadcast %cst_79 : f32 to vector<8x128xf32>
    %229 = arith.mulf %228, %227 : vector<8x128xf32>
    %cst_80 = arith.constant 5.000000e-01 : f32
    %230 = vector.broadcast %cst_80 : f32 to vector<8x128xf32>
    %231 = arith.addf %229, %230 : vector<8x128xf32>
    %232 = vector.extract_strided_slice %223 {offsets = [0, 128], sizes = [8, 128], strides = [1, 1]} : vector<8x512xf32> to vector<8x128xf32>
    %cst_81 = arith.constant 5.000000e-01 : f32
    %233 = vector.broadcast %cst_81 : f32 to vector<8x128xf32>
    %234 = arith.mulf %233, %232 : vector<8x128xf32>
    %235 = math.tanh %234 : vector<8x128xf32>
    %cst_82 = arith.constant 5.000000e-01 : f32
    %236 = vector.broadcast %cst_82 : f32 to vector<8x128xf32>
    %237 = arith.mulf %236, %235 : vector<8x128xf32>
    %cst_83 = arith.constant 5.000000e-01 : f32
    %238 = vector.broadcast %cst_83 : f32 to vector<8x128xf32>
    %239 = arith.addf %237, %238 : vector<8x128xf32>
    %240 = vector.extract_strided_slice %223 {offsets = [0, 256], sizes = [8, 128], strides = [1, 1]} : vector<8x512xf32> to vector<8x128xf32>
    %241 = math.tanh %240 : vector<8x128xf32>
    %242 = vector.extract_strided_slice %223 {offsets = [0, 384], sizes = [8, 128], strides = [1, 1]} : vector<8x512xf32> to vector<8x128xf32>
    %cst_84 = arith.constant 5.000000e-01 : f32
    %243 = vector.broadcast %cst_84 : f32 to vector<8x128xf32>
    %244 = arith.mulf %243, %242 : vector<8x128xf32>
    %245 = math.tanh %244 : vector<8x128xf32>
    %cst_85 = arith.constant 5.000000e-01 : f32
    %246 = vector.broadcast %cst_85 : f32 to vector<8x128xf32>
    %247 = arith.mulf %246, %245 : vector<8x128xf32>
    %cst_86 = arith.constant 5.000000e-01 : f32
    %248 = vector.broadcast %cst_86 : f32 to vector<8x128xf32>
    %249 = arith.addf %247, %248 : vector<8x128xf32>
    %250 = arith.mulf %239, %217 : vector<8x128xf32>
    %251 = arith.mulf %231, %241 : vector<8x128xf32>
    %252 = arith.addf %250, %251 : vector<8x128xf32>
    %253 = math.tanh %252 : vector<8x128xf32>
    %254 = arith.mulf %249, %253 : vector<8x128xf32>
    %c48 = arith.constant 48 : index
    %c0_87 = arith.constant 0 : index
    %255 = vector.load %arg15[%c48, %c0_87] : memref<64x128xf32, #tpu.memory_space<vmem>>, vector<8x128xf32>
    tpu.vector_store %arg15[%c48, %c0_87], %254 {strides = array<i32>} : memref<64x128xf32, #tpu.memory_space<vmem>>, vector<8x128xf32>,
    %256 = vector.extract_strided_slice %8 {offsets = [56, 0], sizes = [8, 512], strides = [1, 1]} : vector<64x512xf32> to vector<8x512xf32>
    %cst_88 = arith.constant dense<0.000000e+00> : vector<8x512xf32>
    %257 = tpu.matmul %254, %1, %cst_88 {dimension_numbers = #tpu.dot_dimension_numbers<[1], [0], [0], [1], [0, 0, 1, 1], [], []>} : vector<8x128xf32>, vector<128x512xf32>, vector<8x512xf32> -> vector<8x512xf32>
    %258 = arith.addf %256, %257 : vector<8x512xf32>
    %259 = vector.extract_strided_slice %258 {offsets = [0, 0], sizes = [8, 128], strides = [1, 1]} : vector<8x512xf32> to vector<8x128xf32>
    %cst_89 = arith.constant 5.000000e-01 : f32
    %260 = vector.broadcast %cst_89 : f32 to vector<8x128xf32>
    %261 = arith.mulf %260, %259 : vector<8x128xf32>
    %262 = math.tanh %261 : vector<8x128xf32>
    %cst_90 = arith.constant 5.000000e-01 : f32
    %263 = vector.broadcast %cst_90 : f32 to vector<8x128xf32>
    %264 = arith.mulf %263, %262 : vector<8x128xf32>
    %cst_91 = arith.constant 5.000000e-01 : f32
    %265 = vector.broadcast %cst_91 : f32 to vector<8x128xf32>
    %266 = arith.addf %264, %265 : vector<8x128xf32>
    %267 = vector.extract_strided_slice %258 {offsets = [0, 128], sizes = [8, 128], strides = [1, 1]} : vector<8x512xf32> to vector<8x128xf32>
    %cst_92 = arith.constant 5.000000e-01 : f32
    %268 = vector.broadcast %cst_92 : f32 to vector<8x128xf32>
    %269 = arith.mulf %268, %267 : vector<8x128xf32>
    %270 = math.tanh %269 : vector<8x128xf32>
    %cst_93 = arith.constant 5.000000e-01 : f32
    %271 = vector.broadcast %cst_93 : f32 to vector<8x128xf32>
    %272 = arith.mulf %271, %270 : vector<8x128xf32>
    %cst_94 = arith.constant 5.000000e-01 : f32
    %273 = vector.broadcast %cst_94 : f32 to vector<8x128xf32>
    %274 = arith.addf %272, %273 : vector<8x128xf32>
    %275 = vector.extract_strided_slice %258 {offsets = [0, 256], sizes = [8, 128], strides = [1, 1]} : vector<8x512xf32> to vector<8x128xf32>
    %276 = math.tanh %275 : vector<8x128xf32>
    %277 = vector.extract_strided_slice %258 {offsets = [0, 384], sizes = [8, 128], strides = [1, 1]} : vector<8x512xf32> to vector<8x128xf32>
    %cst_95 = arith.constant 5.000000e-01 : f32
    %278 = vector.broadcast %cst_95 : f32 to vector<8x128xf32>
    %279 = arith.mulf %278, %277 : vector<8x128xf32>
    %280 = math.tanh %279 : vector<8x128xf32>
    %cst_96 = arith.constant 5.000000e-01 : f32
    %281 = vector.broadcast %cst_96 : f32 to vector<8x128xf32>
    %282 = arith.mulf %281, %280 : vector<8x128xf32>
    %cst_97 = arith.constant 5.000000e-01 : f32
    %283 = vector.broadcast %cst_97 : f32 to vector<8x128xf32>
    %284 = arith.addf %282, %283 : vector<8x128xf32>
    %285 = arith.mulf %274, %252 : vector<8x128xf32>
    %286 = arith.mulf %266, %276 : vector<8x128xf32>
    %287 = arith.addf %285, %286 : vector<8x128xf32>
    %288 = math.tanh %287 : vector<8x128xf32>
    %289 = arith.mulf %284, %288 : vector<8x128xf32>
    %c56 = arith.constant 56 : index
    %c0_98 = arith.constant 0 : index
    %290 = vector.load %arg15[%c56, %c0_98] : memref<64x128xf32, #tpu.memory_space<vmem>>, vector<8x128xf32>
    tpu.vector_store %arg15[%c56, %c0_98], %289 {strides = array<i32>} : memref<64x128xf32, #tpu.memory_space<vmem>>, vector<8x128xf32>,
    %c0_99 = arith.constant 0 : index
    %c0_100 = arith.constant 0 : index
    %c0_101 = arith.constant 0 : index
    %291 = vector.load %arg13[%c0_99, %c0_100, %c0_101] : memref<3x8x128xf32, #tpu.memory_space<vmem>>, vector<1x8x128xf32>
    %292 = vector.shape_cast %291 : vector<1x8x128xf32> to vector<8x128xf32>
    %293 = vector.shape_cast %289 : vector<8x128xf32> to vector<1x8x128xf32>
    tpu.vector_store %arg13[%c0_99, %c0_100, %c0_101], %293 {strides = array<i32>} : memref<3x8x128xf32, #tpu.memory_space<vmem>>, vector<1x8x128xf32>,
    %c0_102 = arith.constant 0 : index
    %c0_103 = arith.constant 0 : index
    %c0_104 = arith.constant 0 : index
    %294 = vector.load %arg14[%c0_102, %c0_103, %c0_104] : memref<3x8x128xf32, #tpu.memory_space<vmem>>, vector<1x8x128xf32>
    %295 = vector.shape_cast %294 : vector<1x8x128xf32> to vector<8x128xf32>
    %296 = vector.shape_cast %287 : vector<8x128xf32> to vector<1x8x128xf32>
    tpu.vector_store %arg14[%c0_102, %c0_103, %c0_104], %296 {strides = array<i32>} : memref<3x8x128xf32, #tpu.memory_space<vmem>>, vector<1x8x128xf32>,
    %c0_105 = arith.constant 0 : index
    %c0_106 = arith.constant 0 : index
    %297 = vector.load %arg4[%c0_105, %c0_106] : memref<128x512xf32, #tpu.memory_space<vmem>>, vector<128x512xf32>
    %c0_107 = arith.constant 0 : index
    %c0_108 = arith.constant 0 : index
    %298 = vector.load %arg5[%c0_107, %c0_108] : memref<128x512xf32, #tpu.memory_space<vmem>>, vector<128x512xf32>
    %c0_109 = arith.constant 0 : index
    %c0_110 = arith.constant 0 : index
    %299 = vector.load %arg6[%c0_109, %c0_110] : memref<1x512xf32, #tpu.memory_space<vmem>>, vector<1x512xf32>
    %c0_111 = arith.constant 0 : index
    %c0_112 = arith.constant 0 : index
    %300 = vector.load %arg15[%c0_111, %c0_112] : memref<64x128xf32, #tpu.memory_space<vmem>>, vector<64x128xf32>
    %cst_113 = arith.constant dense<0.000000e+00> : vector<64x512xf32>
    %301 = tpu.matmul %300, %297, %cst_113 {dimension_numbers = #tpu.dot_dimension_numbers<[1], [0], [0], [1], [0, 0, 1, 1], [], []>} : vector<64x128xf32>, vector<128x512xf32>, vector<64x512xf32> -> vector<64x512xf32>
    %302 = vector.broadcast %299 : vector<1x512xf32> to vector<64x512xf32>
    %303 = arith.addf %301, %302 : vector<64x512xf32>
    %cst_114 = arith.constant 0.000000e+00 : f32
    %304 = vector.broadcast %cst_114 : f32 to vector<8x128xf32>
    %cst_115 = arith.constant 0.000000e+00 : f32
    %305 = vector.broadcast %cst_115 : f32 to vector<8x128xf32>
    %306 = vector.extract_strided_slice %303 {offsets = [0, 0], sizes = [8, 512], strides = [1, 1]} : vector<64x512xf32> to vector<8x512xf32>
    %cst_116 = arith.constant dense<0.000000e+00> : vector<8x512xf32>
    %307 = tpu.matmul %304, %298, %cst_116 {dimension_numbers = #tpu.dot_dimension_numbers<[1], [0], [0], [1], [0, 0, 1, 1], [], []>} : vector<8x128xf32>, vector<128x512xf32>, vector<8x512xf32> -> vector<8x512xf32>
    %308 = arith.addf %306, %307 : vector<8x512xf32>
    %309 = vector.extract_strided_slice %308 {offsets = [0, 0], sizes = [8, 128], strides = [1, 1]} : vector<8x512xf32> to vector<8x128xf32>
    %cst_117 = arith.constant 5.000000e-01 : f32
    %310 = vector.broadcast %cst_117 : f32 to vector<8x128xf32>
    %311 = arith.mulf %310, %309 : vector<8x128xf32>
    %312 = math.tanh %311 : vector<8x128xf32>
    %cst_118 = arith.constant 5.000000e-01 : f32
    %313 = vector.broadcast %cst_118 : f32 to vector<8x128xf32>
    %314 = arith.mulf %313, %312 : vector<8x128xf32>
    %cst_119 = arith.constant 5.000000e-01 : f32
    %315 = vector.broadcast %cst_119 : f32 to vector<8x128xf32>
    %316 = arith.addf %314, %315 : vector<8x128xf32>
    %317 = vector.extract_strided_slice %308 {offsets = [0, 128], sizes = [8, 128], strides = [1, 1]} : vector<8x512xf32> to vector<8x128xf32>
    %cst_120 = arith.constant 5.000000e-01 : f32
    %318 = vector.broadcast %cst_120 : f32 to vector<8x128xf32>
    %319 = arith.mulf %318, %317 : vector<8x128xf32>
    %320 = math.tanh %319 : vector<8x128xf32>
    %cst_121 = arith.constant 5.000000e-01 : f32
    %321 = vector.broadcast %cst_121 : f32 to vector<8x128xf32>
    %322 = arith.mulf %321, %320 : vector<8x128xf32>
    %cst_122 = arith.constant 5.000000e-01 : f32
    %323 = vector.broadcast %cst_122 : f32 to vector<8x128xf32>
    %324 = arith.addf %322, %323 : vector<8x128xf32>
    %325 = vector.extract_strided_slice %308 {offsets = [0, 256], sizes = [8, 128], strides = [1, 1]} : vector<8x512xf32> to vector<8x128xf32>
    %326 = math.tanh %325 : vector<8x128xf32>
    %327 = vector.extract_strided_slice %308 {offsets = [0, 384], sizes = [8, 128], strides = [1, 1]} : vector<8x512xf32> to vector<8x128xf32>
    %cst_123 = arith.constant 5.000000e-01 : f32
    %328 = vector.broadcast %cst_123 : f32 to vector<8x128xf32>
    %329 = arith.mulf %328, %327 : vector<8x128xf32>
    %330 = math.tanh %329 : vector<8x128xf32>
    %cst_124 = arith.constant 5.000000e-01 : f32
    %331 = vector.broadcast %cst_124 : f32 to vector<8x128xf32>
    %332 = arith.mulf %331, %330 : vector<8x128xf32>
    %cst_125 = arith.constant 5.000000e-01 : f32
    %333 = vector.broadcast %cst_125 : f32 to vector<8x128xf32>
    %334 = arith.addf %332, %333 : vector<8x128xf32>
    %335 = arith.mulf %324, %305 : vector<8x128xf32>
    %336 = arith.mulf %316, %326 : vector<8x128xf32>
    %337 = arith.addf %335, %336 : vector<8x128xf32>
    %338 = math.tanh %337 : vector<8x128xf32>
    %339 = arith.mulf %334, %338 : vector<8x128xf32>
    %c0_126 = arith.constant 0 : index
    %c0_127 = arith.constant 0 : index
    %340 = vector.load %arg15[%c0_126, %c0_127] : memref<64x128xf32, #tpu.memory_space<vmem>>, vector<8x128xf32>
    tpu.vector_store %arg15[%c0_126, %c0_127], %339 {strides = array<i32>} : memref<64x128xf32, #tpu.memory_space<vmem>>, vector<8x128xf32>,
    %341 = vector.extract_strided_slice %303 {offsets = [8, 0], sizes = [8, 512], strides = [1, 1]} : vector<64x512xf32> to vector<8x512xf32>
    %cst_128 = arith.constant dense<0.000000e+00> : vector<8x512xf32>
    %342 = tpu.matmul %339, %298, %cst_128 {dimension_numbers = #tpu.dot_dimension_numbers<[1], [0], [0], [1], [0, 0, 1, 1], [], []>} : vector<8x128xf32>, vector<128x512xf32>, vector<8x512xf32> -> vector<8x512xf32>
    %343 = arith.addf %341, %342 : vector<8x512xf32>
    %344 = vector.extract_strided_slice %343 {offsets = [0, 0], sizes = [8, 128], strides = [1, 1]} : vector<8x512xf32> to vector<8x128xf32>
    %cst_129 = arith.constant 5.000000e-01 : f32
    %345 = vector.broadcast %cst_129 : f32 to vector<8x128xf32>
    %346 = arith.mulf %345, %344 : vector<8x128xf32>
    %347 = math.tanh %346 : vector<8x128xf32>
    %cst_130 = arith.constant 5.000000e-01 : f32
    %348 = vector.broadcast %cst_130 : f32 to vector<8x128xf32>
    %349 = arith.mulf %348, %347 : vector<8x128xf32>
    %cst_131 = arith.constant 5.000000e-01 : f32
    %350 = vector.broadcast %cst_131 : f32 to vector<8x128xf32>
    %351 = arith.addf %349, %350 : vector<8x128xf32>
    %352 = vector.extract_strided_slice %343 {offsets = [0, 128], sizes = [8, 128], strides = [1, 1]} : vector<8x512xf32> to vector<8x128xf32>
    %cst_132 = arith.constant 5.000000e-01 : f32
    %353 = vector.broadcast %cst_132 : f32 to vector<8x128xf32>
    %354 = arith.mulf %353, %352 : vector<8x128xf32>
    %355 = math.tanh %354 : vector<8x128xf32>
    %cst_133 = arith.constant 5.000000e-01 : f32
    %356 = vector.broadcast %cst_133 : f32 to vector<8x128xf32>
    %357 = arith.mulf %356, %355 : vector<8x128xf32>
    %cst_134 = arith.constant 5.000000e-01 : f32
    %358 = vector.broadcast %cst_134 : f32 to vector<8x128xf32>
    %359 = arith.addf %357, %358 : vector<8x128xf32>
    %360 = vector.extract_strided_slice %343 {offsets = [0, 256], sizes = [8, 128], strides = [1, 1]} : vector<8x512xf32> to vector<8x128xf32>
    %361 = math.tanh %360 : vector<8x128xf32>
    %362 = vector.extract_strided_slice %343 {offsets = [0, 384], sizes = [8, 128], strides = [1, 1]} : vector<8x512xf32> to vector<8x128xf32>
    %cst_135 = arith.constant 5.000000e-01 : f32
    %363 = vector.broadcast %cst_135 : f32 to vector<8x128xf32>
    %364 = arith.mulf %363, %362 : vector<8x128xf32>
    %365 = math.tanh %364 : vector<8x128xf32>
    %cst_136 = arith.constant 5.000000e-01 : f32
    %366 = vector.broadcast %cst_136 : f32 to vector<8x128xf32>
    %367 = arith.mulf %366, %365 : vector<8x128xf32>
    %cst_137 = arith.constant 5.000000e-01 : f32
    %368 = vector.broadcast %cst_137 : f32 to vector<8x128xf32>
    %369 = arith.addf %367, %368 : vector<8x128xf32>
    %370 = arith.mulf %359, %337 : vector<8x128xf32>
    %371 = arith.mulf %351, %361 : vector<8x128xf32>
    %372 = arith.addf %370, %371 : vector<8x128xf32>
    %373 = math.tanh %372 : vector<8x128xf32>
    %374 = arith.mulf %369, %373 : vector<8x128xf32>
    %c8_138 = arith.constant 8 : index
    %c0_139 = arith.constant 0 : index
    %375 = vector.load %arg15[%c8_138, %c0_139] : memref<64x128xf32, #tpu.memory_space<vmem>>, vector<8x128xf32>
    tpu.vector_store %arg15[%c8_138, %c0_139], %374 {strides = array<i32>} : memref<64x128xf32, #tpu.memory_space<vmem>>, vector<8x128xf32>,
    %376 = vector.extract_strided_slice %303 {offsets = [16, 0], sizes = [8, 512], strides = [1, 1]} : vector<64x512xf32> to vector<8x512xf32>
    %cst_140 = arith.constant dense<0.000000e+00> : vector<8x512xf32>
    %377 = tpu.matmul %374, %298, %cst_140 {dimension_numbers = #tpu.dot_dimension_numbers<[1], [0], [0], [1], [0, 0, 1, 1], [], []>} : vector<8x128xf32>, vector<128x512xf32>, vector<8x512xf32> -> vector<8x512xf32>
    %378 = arith.addf %376, %377 : vector<8x512xf32>
    %379 = vector.extract_strided_slice %378 {offsets = [0, 0], sizes = [8, 128], strides = [1, 1]} : vector<8x512xf32> to vector<8x128xf32>
    %cst_141 = arith.constant 5.000000e-01 : f32
    %380 = vector.broadcast %cst_141 : f32 to vector<8x128xf32>
    %381 = arith.mulf %380, %379 : vector<8x128xf32>
    %382 = math.tanh %381 : vector<8x128xf32>
    %cst_142 = arith.constant 5.000000e-01 : f32
    %383 = vector.broadcast %cst_142 : f32 to vector<8x128xf32>
    %384 = arith.mulf %383, %382 : vector<8x128xf32>
    %cst_143 = arith.constant 5.000000e-01 : f32
    %385 = vector.broadcast %cst_143 : f32 to vector<8x128xf32>
    %386 = arith.addf %384, %385 : vector<8x128xf32>
    %387 = vector.extract_strided_slice %378 {offsets = [0, 128], sizes = [8, 128], strides = [1, 1]} : vector<8x512xf32> to vector<8x128xf32>
    %cst_144 = arith.constant 5.000000e-01 : f32
    %388 = vector.broadcast %cst_144 : f32 to vector<8x128xf32>
    %389 = arith.mulf %388, %387 : vector<8x128xf32>
    %390 = math.tanh %389 : vector<8x128xf32>
    %cst_145 = arith.constant 5.000000e-01 : f32
    %391 = vector.broadcast %cst_145 : f32 to vector<8x128xf32>
    %392 = arith.mulf %391, %390 : vector<8x128xf32>
    %cst_146 = arith.constant 5.000000e-01 : f32
    %393 = vector.broadcast %cst_146 : f32 to vector<8x128xf32>
    %394 = arith.addf %392, %393 : vector<8x128xf32>
    %395 = vector.extract_strided_slice %378 {offsets = [0, 256], sizes = [8, 128], strides = [1, 1]} : vector<8x512xf32> to vector<8x128xf32>
    %396 = math.tanh %395 : vector<8x128xf32>
    %397 = vector.extract_strided_slice %378 {offsets = [0, 384], sizes = [8, 128], strides = [1, 1]} : vector<8x512xf32> to vector<8x128xf32>
    %cst_147 = arith.constant 5.000000e-01 : f32
    %398 = vector.broadcast %cst_147 : f32 to vector<8x128xf32>
    %399 = arith.mulf %398, %397 : vector<8x128xf32>
    %400 = math.tanh %399 : vector<8x128xf32>
    %cst_148 = arith.constant 5.000000e-01 : f32
    %401 = vector.broadcast %cst_148 : f32 to vector<8x128xf32>
    %402 = arith.mulf %401, %400 : vector<8x128xf32>
    %cst_149 = arith.constant 5.000000e-01 : f32
    %403 = vector.broadcast %cst_149 : f32 to vector<8x128xf32>
    %404 = arith.addf %402, %403 : vector<8x128xf32>
    %405 = arith.mulf %394, %372 : vector<8x128xf32>
    %406 = arith.mulf %386, %396 : vector<8x128xf32>
    %407 = arith.addf %405, %406 : vector<8x128xf32>
    %408 = math.tanh %407 : vector<8x128xf32>
    %409 = arith.mulf %404, %408 : vector<8x128xf32>
    %c16_150 = arith.constant 16 : index
    %c0_151 = arith.constant 0 : index
    %410 = vector.load %arg15[%c16_150, %c0_151] : memref<64x128xf32, #tpu.memory_space<vmem>>, vector<8x128xf32>
    tpu.vector_store %arg15[%c16_150, %c0_151], %409 {strides = array<i32>} : memref<64x128xf32, #tpu.memory_space<vmem>>, vector<8x128xf32>,
    %411 = vector.extract_strided_slice %303 {offsets = [24, 0], sizes = [8, 512], strides = [1, 1]} : vector<64x512xf32> to vector<8x512xf32>
    %cst_152 = arith.constant dense<0.000000e+00> : vector<8x512xf32>
    %412 = tpu.matmul %409, %298, %cst_152 {dimension_numbers = #tpu.dot_dimension_numbers<[1], [0], [0], [1], [0, 0, 1, 1], [], []>} : vector<8x128xf32>, vector<128x512xf32>, vector<8x512xf32> -> vector<8x512xf32>
    %413 = arith.addf %411, %412 : vector<8x512xf32>
    %414 = vector.extract_strided_slice %413 {offsets = [0, 0], sizes = [8, 128], strides = [1, 1]} : vector<8x512xf32> to vector<8x128xf32>
    %cst_153 = arith.constant 5.000000e-01 : f32
    %415 = vector.broadcast %cst_153 : f32 to vector<8x128xf32>
    %416 = arith.mulf %415, %414 : vector<8x128xf32>
    %417 = math.tanh %416 : vector<8x128xf32>
    %cst_154 = arith.constant 5.000000e-01 : f32
    %418 = vector.broadcast %cst_154 : f32 to vector<8x128xf32>
    %419 = arith.mulf %418, %417 : vector<8x128xf32>
    %cst_155 = arith.constant 5.000000e-01 : f32
    %420 = vector.broadcast %cst_155 : f32 to vector<8x128xf32>
    %421 = arith.addf %419, %420 : vector<8x128xf32>
    %422 = vector.extract_strided_slice %413 {offsets = [0, 128], sizes = [8, 128], strides = [1, 1]} : vector<8x512xf32> to vector<8x128xf32>
    %cst_156 = arith.constant 5.000000e-01 : f32
    %423 = vector.broadcast %cst_156 : f32 to vector<8x128xf32>
    %424 = arith.mulf %423, %422 : vector<8x128xf32>
    %425 = math.tanh %424 : vector<8x128xf32>
    %cst_157 = arith.constant 5.000000e-01 : f32
    %426 = vector.broadcast %cst_157 : f32 to vector<8x128xf32>
    %427 = arith.mulf %426, %425 : vector<8x128xf32>
    %cst_158 = arith.constant 5.000000e-01 : f32
    %428 = vector.broadcast %cst_158 : f32 to vector<8x128xf32>
    %429 = arith.addf %427, %428 : vector<8x128xf32>
    %430 = vector.extract_strided_slice %413 {offsets = [0, 256], sizes = [8, 128], strides = [1, 1]} : vector<8x512xf32> to vector<8x128xf32>
    %431 = math.tanh %430 : vector<8x128xf32>
    %432 = vector.extract_strided_slice %413 {offsets = [0, 384], sizes = [8, 128], strides = [1, 1]} : vector<8x512xf32> to vector<8x128xf32>
    %cst_159 = arith.constant 5.000000e-01 : f32
    %433 = vector.broadcast %cst_159 : f32 to vector<8x128xf32>
    %434 = arith.mulf %433, %432 : vector<8x128xf32>
    %435 = math.tanh %434 : vector<8x128xf32>
    %cst_160 = arith.constant 5.000000e-01 : f32
    %436 = vector.broadcast %cst_160 : f32 to vector<8x128xf32>
    %437 = arith.mulf %436, %435 : vector<8x128xf32>
    %cst_161 = arith.constant 5.000000e-01 : f32
    %438 = vector.broadcast %cst_161 : f32 to vector<8x128xf32>
    %439 = arith.addf %437, %438 : vector<8x128xf32>
    %440 = arith.mulf %429, %407 : vector<8x128xf32>
    %441 = arith.mulf %421, %431 : vector<8x128xf32>
    %442 = arith.addf %440, %441 : vector<8x128xf32>
    %443 = math.tanh %442 : vector<8x128xf32>
    %444 = arith.mulf %439, %443 : vector<8x128xf32>
    %c24_162 = arith.constant 24 : index
    %c0_163 = arith.constant 0 : index
    %445 = vector.load %arg15[%c24_162, %c0_163] : memref<64x128xf32, #tpu.memory_space<vmem>>, vector<8x128xf32>
    tpu.vector_store %arg15[%c24_162, %c0_163], %444 {strides = array<i32>} : memref<64x128xf32, #tpu.memory_space<vmem>>, vector<8x128xf32>,
    %446 = vector.extract_strided_slice %303 {offsets = [32, 0], sizes = [8, 512], strides = [1, 1]} : vector<64x512xf32> to vector<8x512xf32>
    %cst_164 = arith.constant dense<0.000000e+00> : vector<8x512xf32>
    %447 = tpu.matmul %444, %298, %cst_164 {dimension_numbers = #tpu.dot_dimension_numbers<[1], [0], [0], [1], [0, 0, 1, 1], [], []>} : vector<8x128xf32>, vector<128x512xf32>, vector<8x512xf32> -> vector<8x512xf32>
    %448 = arith.addf %446, %447 : vector<8x512xf32>
    %449 = vector.extract_strided_slice %448 {offsets = [0, 0], sizes = [8, 128], strides = [1, 1]} : vector<8x512xf32> to vector<8x128xf32>
    %cst_165 = arith.constant 5.000000e-01 : f32
    %450 = vector.broadcast %cst_165 : f32 to vector<8x128xf32>
    %451 = arith.mulf %450, %449 : vector<8x128xf32>
    %452 = math.tanh %451 : vector<8x128xf32>
    %cst_166 = arith.constant 5.000000e-01 : f32
    %453 = vector.broadcast %cst_166 : f32 to vector<8x128xf32>
    %454 = arith.mulf %453, %452 : vector<8x128xf32>
    %cst_167 = arith.constant 5.000000e-01 : f32
    %455 = vector.broadcast %cst_167 : f32 to vector<8x128xf32>
    %456 = arith.addf %454, %455 : vector<8x128xf32>
    %457 = vector.extract_strided_slice %448 {offsets = [0, 128], sizes = [8, 128], strides = [1, 1]} : vector<8x512xf32> to vector<8x128xf32>
    %cst_168 = arith.constant 5.000000e-01 : f32
    %458 = vector.broadcast %cst_168 : f32 to vector<8x128xf32>
    %459 = arith.mulf %458, %457 : vector<8x128xf32>
    %460 = math.tanh %459 : vector<8x128xf32>
    %cst_169 = arith.constant 5.000000e-01 : f32
    %461 = vector.broadcast %cst_169 : f32 to vector<8x128xf32>
    %462 = arith.mulf %461, %460 : vector<8x128xf32>
    %cst_170 = arith.constant 5.000000e-01 : f32
    %463 = vector.broadcast %cst_170 : f32 to vector<8x128xf32>
    %464 = arith.addf %462, %463 : vector<8x128xf32>
    %465 = vector.extract_strided_slice %448 {offsets = [0, 256], sizes = [8, 128], strides = [1, 1]} : vector<8x512xf32> to vector<8x128xf32>
    %466 = math.tanh %465 : vector<8x128xf32>
    %467 = vector.extract_strided_slice %448 {offsets = [0, 384], sizes = [8, 128], strides = [1, 1]} : vector<8x512xf32> to vector<8x128xf32>
    %cst_171 = arith.constant 5.000000e-01 : f32
    %468 = vector.broadcast %cst_171 : f32 to vector<8x128xf32>
    %469 = arith.mulf %468, %467 : vector<8x128xf32>
    %470 = math.tanh %469 : vector<8x128xf32>
    %cst_172 = arith.constant 5.000000e-01 : f32
    %471 = vector.broadcast %cst_172 : f32 to vector<8x128xf32>
    %472 = arith.mulf %471, %470 : vector<8x128xf32>
    %cst_173 = arith.constant 5.000000e-01 : f32
    %473 = vector.broadcast %cst_173 : f32 to vector<8x128xf32>
    %474 = arith.addf %472, %473 : vector<8x128xf32>
    %475 = arith.mulf %464, %442 : vector<8x128xf32>
    %476 = arith.mulf %456, %466 : vector<8x128xf32>
    %477 = arith.addf %475, %476 : vector<8x128xf32>
    %478 = math.tanh %477 : vector<8x128xf32>
    %479 = arith.mulf %474, %478 : vector<8x128xf32>
    %c32_174 = arith.constant 32 : index
    %c0_175 = arith.constant 0 : index
    %480 = vector.load %arg15[%c32_174, %c0_175] : memref<64x128xf32, #tpu.memory_space<vmem>>, vector<8x128xf32>
    tpu.vector_store %arg15[%c32_174, %c0_175], %479 {strides = array<i32>} : memref<64x128xf32, #tpu.memory_space<vmem>>, vector<8x128xf32>,
    %481 = vector.extract_strided_slice %303 {offsets = [40, 0], sizes = [8, 512], strides = [1, 1]} : vector<64x512xf32> to vector<8x512xf32>
    %cst_176 = arith.constant dense<0.000000e+00> : vector<8x512xf32>
    %482 = tpu.matmul %479, %298, %cst_176 {dimension_numbers = #tpu.dot_dimension_numbers<[1], [0], [0], [1], [0, 0, 1, 1], [], []>} : vector<8x128xf32>, vector<128x512xf32>, vector<8x512xf32> -> vector<8x512xf32>
    %483 = arith.addf %481, %482 : vector<8x512xf32>
    %484 = vector.extract_strided_slice %483 {offsets = [0, 0], sizes = [8, 128], strides = [1, 1]} : vector<8x512xf32> to vector<8x128xf32>
    %cst_177 = arith.constant 5.000000e-01 : f32
    %485 = vector.broadcast %cst_177 : f32 to vector<8x128xf32>
    %486 = arith.mulf %485, %484 : vector<8x128xf32>
    %487 = math.tanh %486 : vector<8x128xf32>
    %cst_178 = arith.constant 5.000000e-01 : f32
    %488 = vector.broadcast %cst_178 : f32 to vector<8x128xf32>
    %489 = arith.mulf %488, %487 : vector<8x128xf32>
    %cst_179 = arith.constant 5.000000e-01 : f32
    %490 = vector.broadcast %cst_179 : f32 to vector<8x128xf32>
    %491 = arith.addf %489, %490 : vector<8x128xf32>
    %492 = vector.extract_strided_slice %483 {offsets = [0, 128], sizes = [8, 128], strides = [1, 1]} : vector<8x512xf32> to vector<8x128xf32>
    %cst_180 = arith.constant 5.000000e-01 : f32
    %493 = vector.broadcast %cst_180 : f32 to vector<8x128xf32>
    %494 = arith.mulf %493, %492 : vector<8x128xf32>
    %495 = math.tanh %494 : vector<8x128xf32>
    %cst_181 = arith.constant 5.000000e-01 : f32
    %496 = vector.broadcast %cst_181 : f32 to vector<8x128xf32>
    %497 = arith.mulf %496, %495 : vector<8x128xf32>
    %cst_182 = arith.constant 5.000000e-01 : f32
    %498 = vector.broadcast %cst_182 : f32 to vector<8x128xf32>
    %499 = arith.addf %497, %498 : vector<8x128xf32>
    %500 = vector.extract_strided_slice %483 {offsets = [0, 256], sizes = [8, 128], strides = [1, 1]} : vector<8x512xf32> to vector<8x128xf32>
    %501 = math.tanh %500 : vector<8x128xf32>
    %502 = vector.extract_strided_slice %483 {offsets = [0, 384], sizes = [8, 128], strides = [1, 1]} : vector<8x512xf32> to vector<8x128xf32>
    %cst_183 = arith.constant 5.000000e-01 : f32
    %503 = vector.broadcast %cst_183 : f32 to vector<8x128xf32>
    %504 = arith.mulf %503, %502 : vector<8x128xf32>
    %505 = math.tanh %504 : vector<8x128xf32>
    %cst_184 = arith.constant 5.000000e-01 : f32
    %506 = vector.broadcast %cst_184 : f32 to vector<8x128xf32>
    %507 = arith.mulf %506, %505 : vector<8x128xf32>
    %cst_185 = arith.constant 5.000000e-01 : f32
    %508 = vector.broadcast %cst_185 : f32 to vector<8x128xf32>
    %509 = arith.addf %507, %508 : vector<8x128xf32>
    %510 = arith.mulf %499, %477 : vector<8x128xf32>
    %511 = arith.mulf %491, %501 : vector<8x128xf32>
    %512 = arith.addf %510, %511 : vector<8x128xf32>
    %513 = math.tanh %512 : vector<8x128xf32>
    %514 = arith.mulf %509, %513 : vector<8x128xf32>
    %c40_186 = arith.constant 40 : index
    %c0_187 = arith.constant 0 : index
    %515 = vector.load %arg15[%c40_186, %c0_187] : memref<64x128xf32, #tpu.memory_space<vmem>>, vector<8x128xf32>
    tpu.vector_store %arg15[%c40_186, %c0_187], %514 {strides = array<i32>} : memref<64x128xf32, #tpu.memory_space<vmem>>, vector<8x128xf32>,
    %516 = vector.extract_strided_slice %303 {offsets = [48, 0], sizes = [8, 512], strides = [1, 1]} : vector<64x512xf32> to vector<8x512xf32>
    %cst_188 = arith.constant dense<0.000000e+00> : vector<8x512xf32>
    %517 = tpu.matmul %514, %298, %cst_188 {dimension_numbers = #tpu.dot_dimension_numbers<[1], [0], [0], [1], [0, 0, 1, 1], [], []>} : vector<8x128xf32>, vector<128x512xf32>, vector<8x512xf32> -> vector<8x512xf32>
    %518 = arith.addf %516, %517 : vector<8x512xf32>
    %519 = vector.extract_strided_slice %518 {offsets = [0, 0], sizes = [8, 128], strides = [1, 1]} : vector<8x512xf32> to vector<8x128xf32>
    %cst_189 = arith.constant 5.000000e-01 : f32
    %520 = vector.broadcast %cst_189 : f32 to vector<8x128xf32>
    %521 = arith.mulf %520, %519 : vector<8x128xf32>
    %522 = math.tanh %521 : vector<8x128xf32>
    %cst_190 = arith.constant 5.000000e-01 : f32
    %523 = vector.broadcast %cst_190 : f32 to vector<8x128xf32>
    %524 = arith.mulf %523, %522 : vector<8x128xf32>
    %cst_191 = arith.constant 5.000000e-01 : f32
    %525 = vector.broadcast %cst_191 : f32 to vector<8x128xf32>
    %526 = arith.addf %524, %525 : vector<8x128xf32>
    %527 = vector.extract_strided_slice %518 {offsets = [0, 128], sizes = [8, 128], strides = [1, 1]} : vector<8x512xf32> to vector<8x128xf32>
    %cst_192 = arith.constant 5.000000e-01 : f32
    %528 = vector.broadcast %cst_192 : f32 to vector<8x128xf32>
    %529 = arith.mulf %528, %527 : vector<8x128xf32>
    %530 = math.tanh %529 : vector<8x128xf32>
    %cst_193 = arith.constant 5.000000e-01 : f32
    %531 = vector.broadcast %cst_193 : f32 to vector<8x128xf32>
    %532 = arith.mulf %531, %530 : vector<8x128xf32>
    %cst_194 = arith.constant 5.000000e-01 : f32
    %533 = vector.broadcast %cst_194 : f32 to vector<8x128xf32>
    %534 = arith.addf %532, %533 : vector<8x128xf32>
    %535 = vector.extract_strided_slice %518 {offsets = [0, 256], sizes = [8, 128], strides = [1, 1]} : vector<8x512xf32> to vector<8x128xf32>
    %536 = math.tanh %535 : vector<8x128xf32>
    %537 = vector.extract_strided_slice %518 {offsets = [0, 384], sizes = [8, 128], strides = [1, 1]} : vector<8x512xf32> to vector<8x128xf32>
    %cst_195 = arith.constant 5.000000e-01 : f32
    %538 = vector.broadcast %cst_195 : f32 to vector<8x128xf32>
    %539 = arith.mulf %538, %537 : vector<8x128xf32>
    %540 = math.tanh %539 : vector<8x128xf32>
    %cst_196 = arith.constant 5.000000e-01 : f32
    %541 = vector.broadcast %cst_196 : f32 to vector<8x128xf32>
    %542 = arith.mulf %541, %540 : vector<8x128xf32>
    %cst_197 = arith.constant 5.000000e-01 : f32
    %543 = vector.broadcast %cst_197 : f32 to vector<8x128xf32>
    %544 = arith.addf %542, %543 : vector<8x128xf32>
    %545 = arith.mulf %534, %512 : vector<8x128xf32>
    %546 = arith.mulf %526, %536 : vector<8x128xf32>
    %547 = arith.addf %545, %546 : vector<8x128xf32>
    %548 = math.tanh %547 : vector<8x128xf32>
    %549 = arith.mulf %544, %548 : vector<8x128xf32>
    %c48_198 = arith.constant 48 : index
    %c0_199 = arith.constant 0 : index
    %550 = vector.load %arg15[%c48_198, %c0_199] : memref<64x128xf32, #tpu.memory_space<vmem>>, vector<8x128xf32>
    tpu.vector_store %arg15[%c48_198, %c0_199], %549 {strides = array<i32>} : memref<64x128xf32, #tpu.memory_space<vmem>>, vector<8x128xf32>,
    %551 = vector.extract_strided_slice %303 {offsets = [56, 0], sizes = [8, 512], strides = [1, 1]} : vector<64x512xf32> to vector<8x512xf32>
    %cst_200 = arith.constant dense<0.000000e+00> : vector<8x512xf32>
    %552 = tpu.matmul %549, %298, %cst_200 {dimension_numbers = #tpu.dot_dimension_numbers<[1], [0], [0], [1], [0, 0, 1, 1], [], []>} : vector<8x128xf32>, vector<128x512xf32>, vector<8x512xf32> -> vector<8x512xf32>
    %553 = arith.addf %551, %552 : vector<8x512xf32>
    %554 = vector.extract_strided_slice %553 {offsets = [0, 0], sizes = [8, 128], strides = [1, 1]} : vector<8x512xf32> to vector<8x128xf32>
    %cst_201 = arith.constant 5.000000e-01 : f32
    %555 = vector.broadcast %cst_201 : f32 to vector<8x128xf32>
    %556 = arith.mulf %555, %554 : vector<8x128xf32>
    %557 = math.tanh %556 : vector<8x128xf32>
    %cst_202 = arith.constant 5.000000e-01 : f32
    %558 = vector.broadcast %cst_202 : f32 to vector<8x128xf32>
    %559 = arith.mulf %558, %557 : vector<8x128xf32>
    %cst_203 = arith.constant 5.000000e-01 : f32
    %560 = vector.broadcast %cst_203 : f32 to vector<8x128xf32>
    %561 = arith.addf %559, %560 : vector<8x128xf32>
    %562 = vector.extract_strided_slice %553 {offsets = [0, 128], sizes = [8, 128], strides = [1, 1]} : vector<8x512xf32> to vector<8x128xf32>
    %cst_204 = arith.constant 5.000000e-01 : f32
    %563 = vector.broadcast %cst_204 : f32 to vector<8x128xf32>
    %564 = arith.mulf %563, %562 : vector<8x128xf32>
    %565 = math.tanh %564 : vector<8x128xf32>
    %cst_205 = arith.constant 5.000000e-01 : f32
    %566 = vector.broadcast %cst_205 : f32 to vector<8x128xf32>
    %567 = arith.mulf %566, %565 : vector<8x128xf32>
    %cst_206 = arith.constant 5.000000e-01 : f32
    %568 = vector.broadcast %cst_206 : f32 to vector<8x128xf32>
    %569 = arith.addf %567, %568 : vector<8x128xf32>
    %570 = vector.extract_strided_slice %553 {offsets = [0, 256], sizes = [8, 128], strides = [1, 1]} : vector<8x512xf32> to vector<8x128xf32>
    %571 = math.tanh %570 : vector<8x128xf32>
    %572 = vector.extract_strided_slice %553 {offsets = [0, 384], sizes = [8, 128], strides = [1, 1]} : vector<8x512xf32> to vector<8x128xf32>
    %cst_207 = arith.constant 5.000000e-01 : f32
    %573 = vector.broadcast %cst_207 : f32 to vector<8x128xf32>
    %574 = arith.mulf %573, %572 : vector<8x128xf32>
    %575 = math.tanh %574 : vector<8x128xf32>
    %cst_208 = arith.constant 5.000000e-01 : f32
    %576 = vector.broadcast %cst_208 : f32 to vector<8x128xf32>
    %577 = arith.mulf %576, %575 : vector<8x128xf32>
    %cst_209 = arith.constant 5.000000e-01 : f32
    %578 = vector.broadcast %cst_209 : f32 to vector<8x128xf32>
    %579 = arith.addf %577, %578 : vector<8x128xf32>
    %580 = arith.mulf %569, %547 : vector<8x128xf32>
    %581 = arith.mulf %561, %571 : vector<8x128xf32>
    %582 = arith.addf %580, %581 : vector<8x128xf32>
    %583 = math.tanh %582 : vector<8x128xf32>
    %584 = arith.mulf %579, %583 : vector<8x128xf32>
    %c56_210 = arith.constant 56 : index
    %c0_211 = arith.constant 0 : index
    %585 = vector.load %arg15[%c56_210, %c0_211] : memref<64x128xf32, #tpu.memory_space<vmem>>, vector<8x128xf32>
    tpu.vector_store %arg15[%c56_210, %c0_211], %584 {strides = array<i32>} : memref<64x128xf32, #tpu.memory_space<vmem>>, vector<8x128xf32>,
    %c1 = arith.constant 1 : index
    %c0_212 = arith.constant 0 : index
    %c0_213 = arith.constant 0 : index
    %586 = vector.load %arg13[%c1, %c0_212, %c0_213] : memref<3x8x128xf32, #tpu.memory_space<vmem>>, vector<1x8x128xf32>
    %587 = vector.shape_cast %586 : vector<1x8x128xf32> to vector<8x128xf32>
    %588 = vector.shape_cast %584 : vector<8x128xf32> to vector<1x8x128xf32>
    tpu.vector_store %arg13[%c1, %c0_212, %c0_213], %588 {strides = array<i32>} : memref<3x8x128xf32, #tpu.memory_space<vmem>>, vector<1x8x128xf32>,
    %c1_214 = arith.constant 1 : index
    %c0_215 = arith.constant 0 : index
    %c0_216 = arith.constant 0 : index
    %589 = vector.load %arg14[%c1_214, %c0_215, %c0_216] : memref<3x8x128xf32, #tpu.memory_space<vmem>>, vector<1x8x128xf32>
    %590 = vector.shape_cast %589 : vector<1x8x128xf32> to vector<8x128xf32>
    %591 = vector.shape_cast %582 : vector<8x128xf32> to vector<1x8x128xf32>
    tpu.vector_store %arg14[%c1_214, %c0_215, %c0_216], %591 {strides = array<i32>} : memref<3x8x128xf32, #tpu.memory_space<vmem>>, vector<1x8x128xf32>,
    %c0_217 = arith.constant 0 : index
    %c0_218 = arith.constant 0 : index
    %592 = vector.load %arg7[%c0_217, %c0_218] : memref<128x512xf32, #tpu.memory_space<vmem>>, vector<128x512xf32>
    %c0_219 = arith.constant 0 : index
    %c0_220 = arith.constant 0 : index
    %593 = vector.load %arg8[%c0_219, %c0_220] : memref<128x512xf32, #tpu.memory_space<vmem>>, vector<128x512xf32>
    %c0_221 = arith.constant 0 : index
    %c0_222 = arith.constant 0 : index
    %594 = vector.load %arg9[%c0_221, %c0_222] : memref<1x512xf32, #tpu.memory_space<vmem>>, vector<1x512xf32>
    %c0_223 = arith.constant 0 : index
    %c0_224 = arith.constant 0 : index
    %595 = vector.load %arg15[%c0_223, %c0_224] : memref<64x128xf32, #tpu.memory_space<vmem>>, vector<64x128xf32>
    %cst_225 = arith.constant dense<0.000000e+00> : vector<64x512xf32>
    %596 = tpu.matmul %595, %592, %cst_225 {dimension_numbers = #tpu.dot_dimension_numbers<[1], [0], [0], [1], [0, 0, 1, 1], [], []>} : vector<64x128xf32>, vector<128x512xf32>, vector<64x512xf32> -> vector<64x512xf32>
    %597 = vector.broadcast %594 : vector<1x512xf32> to vector<64x512xf32>
    %598 = arith.addf %596, %597 : vector<64x512xf32>
    %cst_226 = arith.constant 0.000000e+00 : f32
    %599 = vector.broadcast %cst_226 : f32 to vector<8x128xf32>
    %cst_227 = arith.constant 0.000000e+00 : f32
    %600 = vector.broadcast %cst_227 : f32 to vector<8x128xf32>
    %601 = vector.extract_strided_slice %598 {offsets = [0, 0], sizes = [8, 512], strides = [1, 1]} : vector<64x512xf32> to vector<8x512xf32>
    %cst_228 = arith.constant dense<0.000000e+00> : vector<8x512xf32>
    %602 = tpu.matmul %599, %593, %cst_228 {dimension_numbers = #tpu.dot_dimension_numbers<[1], [0], [0], [1], [0, 0, 1, 1], [], []>} : vector<8x128xf32>, vector<128x512xf32>, vector<8x512xf32> -> vector<8x512xf32>
    %603 = arith.addf %601, %602 : vector<8x512xf32>
    %604 = vector.extract_strided_slice %603 {offsets = [0, 0], sizes = [8, 128], strides = [1, 1]} : vector<8x512xf32> to vector<8x128xf32>
    %cst_229 = arith.constant 5.000000e-01 : f32
    %605 = vector.broadcast %cst_229 : f32 to vector<8x128xf32>
    %606 = arith.mulf %605, %604 : vector<8x128xf32>
    %607 = math.tanh %606 : vector<8x128xf32>
    %cst_230 = arith.constant 5.000000e-01 : f32
    %608 = vector.broadcast %cst_230 : f32 to vector<8x128xf32>
    %609 = arith.mulf %608, %607 : vector<8x128xf32>
    %cst_231 = arith.constant 5.000000e-01 : f32
    %610 = vector.broadcast %cst_231 : f32 to vector<8x128xf32>
    %611 = arith.addf %609, %610 : vector<8x128xf32>
    %612 = vector.extract_strided_slice %603 {offsets = [0, 128], sizes = [8, 128], strides = [1, 1]} : vector<8x512xf32> to vector<8x128xf32>
    %cst_232 = arith.constant 5.000000e-01 : f32
    %613 = vector.broadcast %cst_232 : f32 to vector<8x128xf32>
    %614 = arith.mulf %613, %612 : vector<8x128xf32>
    %615 = math.tanh %614 : vector<8x128xf32>
    %cst_233 = arith.constant 5.000000e-01 : f32
    %616 = vector.broadcast %cst_233 : f32 to vector<8x128xf32>
    %617 = arith.mulf %616, %615 : vector<8x128xf32>
    %cst_234 = arith.constant 5.000000e-01 : f32
    %618 = vector.broadcast %cst_234 : f32 to vector<8x128xf32>
    %619 = arith.addf %617, %618 : vector<8x128xf32>
    %620 = vector.extract_strided_slice %603 {offsets = [0, 256], sizes = [8, 128], strides = [1, 1]} : vector<8x512xf32> to vector<8x128xf32>
    %621 = math.tanh %620 : vector<8x128xf32>
    %622 = vector.extract_strided_slice %603 {offsets = [0, 384], sizes = [8, 128], strides = [1, 1]} : vector<8x512xf32> to vector<8x128xf32>
    %cst_235 = arith.constant 5.000000e-01 : f32
    %623 = vector.broadcast %cst_235 : f32 to vector<8x128xf32>
    %624 = arith.mulf %623, %622 : vector<8x128xf32>
    %625 = math.tanh %624 : vector<8x128xf32>
    %cst_236 = arith.constant 5.000000e-01 : f32
    %626 = vector.broadcast %cst_236 : f32 to vector<8x128xf32>
    %627 = arith.mulf %626, %625 : vector<8x128xf32>
    %cst_237 = arith.constant 5.000000e-01 : f32
    %628 = vector.broadcast %cst_237 : f32 to vector<8x128xf32>
    %629 = arith.addf %627, %628 : vector<8x128xf32>
    %630 = arith.mulf %619, %600 : vector<8x128xf32>
    %631 = arith.mulf %611, %621 : vector<8x128xf32>
    %632 = arith.addf %630, %631 : vector<8x128xf32>
    %633 = math.tanh %632 : vector<8x128xf32>
    %634 = arith.mulf %629, %633 : vector<8x128xf32>
    %c0_238 = arith.constant 0 : index
    %c0_239 = arith.constant 0 : index
    %635 = vector.load %arg15[%c0_238, %c0_239] : memref<64x128xf32, #tpu.memory_space<vmem>>, vector<8x128xf32>
    tpu.vector_store %arg15[%c0_238, %c0_239], %634 {strides = array<i32>} : memref<64x128xf32, #tpu.memory_space<vmem>>, vector<8x128xf32>,
    %636 = vector.extract_strided_slice %598 {offsets = [8, 0], sizes = [8, 512], strides = [1, 1]} : vector<64x512xf32> to vector<8x512xf32>
    %cst_240 = arith.constant dense<0.000000e+00> : vector<8x512xf32>
    %637 = tpu.matmul %634, %593, %cst_240 {dimension_numbers = #tpu.dot_dimension_numbers<[1], [0], [0], [1], [0, 0, 1, 1], [], []>} : vector<8x128xf32>, vector<128x512xf32>, vector<8x512xf32> -> vector<8x512xf32>
    %638 = arith.addf %636, %637 : vector<8x512xf32>
    %639 = vector.extract_strided_slice %638 {offsets = [0, 0], sizes = [8, 128], strides = [1, 1]} : vector<8x512xf32> to vector<8x128xf32>
    %cst_241 = arith.constant 5.000000e-01 : f32
    %640 = vector.broadcast %cst_241 : f32 to vector<8x128xf32>
    %641 = arith.mulf %640, %639 : vector<8x128xf32>
    %642 = math.tanh %641 : vector<8x128xf32>
    %cst_242 = arith.constant 5.000000e-01 : f32
    %643 = vector.broadcast %cst_242 : f32 to vector<8x128xf32>
    %644 = arith.mulf %643, %642 : vector<8x128xf32>
    %cst_243 = arith.constant 5.000000e-01 : f32
    %645 = vector.broadcast %cst_243 : f32 to vector<8x128xf32>
    %646 = arith.addf %644, %645 : vector<8x128xf32>
    %647 = vector.extract_strided_slice %638 {offsets = [0, 128], sizes = [8, 128], strides = [1, 1]} : vector<8x512xf32> to vector<8x128xf32>
    %cst_244 = arith.constant 5.000000e-01 : f32
    %648 = vector.broadcast %cst_244 : f32 to vector<8x128xf32>
    %649 = arith.mulf %648, %647 : vector<8x128xf32>
    %650 = math.tanh %649 : vector<8x128xf32>
    %cst_245 = arith.constant 5.000000e-01 : f32
    %651 = vector.broadcast %cst_245 : f32 to vector<8x128xf32>
    %652 = arith.mulf %651, %650 : vector<8x128xf32>
    %cst_246 = arith.constant 5.000000e-01 : f32
    %653 = vector.broadcast %cst_246 : f32 to vector<8x128xf32>
    %654 = arith.addf %652, %653 : vector<8x128xf32>
    %655 = vector.extract_strided_slice %638 {offsets = [0, 256], sizes = [8, 128], strides = [1, 1]} : vector<8x512xf32> to vector<8x128xf32>
    %656 = math.tanh %655 : vector<8x128xf32>
    %657 = vector.extract_strided_slice %638 {offsets = [0, 384], sizes = [8, 128], strides = [1, 1]} : vector<8x512xf32> to vector<8x128xf32>
    %cst_247 = arith.constant 5.000000e-01 : f32
    %658 = vector.broadcast %cst_247 : f32 to vector<8x128xf32>
    %659 = arith.mulf %658, %657 : vector<8x128xf32>
    %660 = math.tanh %659 : vector<8x128xf32>
    %cst_248 = arith.constant 5.000000e-01 : f32
    %661 = vector.broadcast %cst_248 : f32 to vector<8x128xf32>
    %662 = arith.mulf %661, %660 : vector<8x128xf32>
    %cst_249 = arith.constant 5.000000e-01 : f32
    %663 = vector.broadcast %cst_249 : f32 to vector<8x128xf32>
    %664 = arith.addf %662, %663 : vector<8x128xf32>
    %665 = arith.mulf %654, %632 : vector<8x128xf32>
    %666 = arith.mulf %646, %656 : vector<8x128xf32>
    %667 = arith.addf %665, %666 : vector<8x128xf32>
    %668 = math.tanh %667 : vector<8x128xf32>
    %669 = arith.mulf %664, %668 : vector<8x128xf32>
    %c8_250 = arith.constant 8 : index
    %c0_251 = arith.constant 0 : index
    %670 = vector.load %arg15[%c8_250, %c0_251] : memref<64x128xf32, #tpu.memory_space<vmem>>, vector<8x128xf32>
    tpu.vector_store %arg15[%c8_250, %c0_251], %669 {strides = array<i32>} : memref<64x128xf32, #tpu.memory_space<vmem>>, vector<8x128xf32>,
    %671 = vector.extract_strided_slice %598 {offsets = [16, 0], sizes = [8, 512], strides = [1, 1]} : vector<64x512xf32> to vector<8x512xf32>
    %cst_252 = arith.constant dense<0.000000e+00> : vector<8x512xf32>
    %672 = tpu.matmul %669, %593, %cst_252 {dimension_numbers = #tpu.dot_dimension_numbers<[1], [0], [0], [1], [0, 0, 1, 1], [], []>} : vector<8x128xf32>, vector<128x512xf32>, vector<8x512xf32> -> vector<8x512xf32>
    %673 = arith.addf %671, %672 : vector<8x512xf32>
    %674 = vector.extract_strided_slice %673 {offsets = [0, 0], sizes = [8, 128], strides = [1, 1]} : vector<8x512xf32> to vector<8x128xf32>
    %cst_253 = arith.constant 5.000000e-01 : f32
    %675 = vector.broadcast %cst_253 : f32 to vector<8x128xf32>
    %676 = arith.mulf %675, %674 : vector<8x128xf32>
    %677 = math.tanh %676 : vector<8x128xf32>
    %cst_254 = arith.constant 5.000000e-01 : f32
    %678 = vector.broadcast %cst_254 : f32 to vector<8x128xf32>
    %679 = arith.mulf %678, %677 : vector<8x128xf32>
    %cst_255 = arith.constant 5.000000e-01 : f32
    %680 = vector.broadcast %cst_255 : f32 to vector<8x128xf32>
    %681 = arith.addf %679, %680 : vector<8x128xf32>
    %682 = vector.extract_strided_slice %673 {offsets = [0, 128], sizes = [8, 128], strides = [1, 1]} : vector<8x512xf32> to vector<8x128xf32>
    %cst_256 = arith.constant 5.000000e-01 : f32
    %683 = vector.broadcast %cst_256 : f32 to vector<8x128xf32>
    %684 = arith.mulf %683, %682 : vector<8x128xf32>
    %685 = math.tanh %684 : vector<8x128xf32>
    %cst_257 = arith.constant 5.000000e-01 : f32
    %686 = vector.broadcast %cst_257 : f32 to vector<8x128xf32>
    %687 = arith.mulf %686, %685 : vector<8x128xf32>
    %cst_258 = arith.constant 5.000000e-01 : f32
    %688 = vector.broadcast %cst_258 : f32 to vector<8x128xf32>
    %689 = arith.addf %687, %688 : vector<8x128xf32>
    %690 = vector.extract_strided_slice %673 {offsets = [0, 256], sizes = [8, 128], strides = [1, 1]} : vector<8x512xf32> to vector<8x128xf32>
    %691 = math.tanh %690 : vector<8x128xf32>
    %692 = vector.extract_strided_slice %673 {offsets = [0, 384], sizes = [8, 128], strides = [1, 1]} : vector<8x512xf32> to vector<8x128xf32>
    %cst_259 = arith.constant 5.000000e-01 : f32
    %693 = vector.broadcast %cst_259 : f32 to vector<8x128xf32>
    %694 = arith.mulf %693, %692 : vector<8x128xf32>
    %695 = math.tanh %694 : vector<8x128xf32>
    %cst_260 = arith.constant 5.000000e-01 : f32
    %696 = vector.broadcast %cst_260 : f32 to vector<8x128xf32>
    %697 = arith.mulf %696, %695 : vector<8x128xf32>
    %cst_261 = arith.constant 5.000000e-01 : f32
    %698 = vector.broadcast %cst_261 : f32 to vector<8x128xf32>
    %699 = arith.addf %697, %698 : vector<8x128xf32>
    %700 = arith.mulf %689, %667 : vector<8x128xf32>
    %701 = arith.mulf %681, %691 : vector<8x128xf32>
    %702 = arith.addf %700, %701 : vector<8x128xf32>
    %703 = math.tanh %702 : vector<8x128xf32>
    %704 = arith.mulf %699, %703 : vector<8x128xf32>
    %c16_262 = arith.constant 16 : index
    %c0_263 = arith.constant 0 : index
    %705 = vector.load %arg15[%c16_262, %c0_263] : memref<64x128xf32, #tpu.memory_space<vmem>>, vector<8x128xf32>
    tpu.vector_store %arg15[%c16_262, %c0_263], %704 {strides = array<i32>} : memref<64x128xf32, #tpu.memory_space<vmem>>, vector<8x128xf32>,
    %706 = vector.extract_strided_slice %598 {offsets = [24, 0], sizes = [8, 512], strides = [1, 1]} : vector<64x512xf32> to vector<8x512xf32>
    %cst_264 = arith.constant dense<0.000000e+00> : vector<8x512xf32>
    %707 = tpu.matmul %704, %593, %cst_264 {dimension_numbers = #tpu.dot_dimension_numbers<[1], [0], [0], [1], [0, 0, 1, 1], [], []>} : vector<8x128xf32>, vector<128x512xf32>, vector<8x512xf32> -> vector<8x512xf32>
    %708 = arith.addf %706, %707 : vector<8x512xf32>
    %709 = vector.extract_strided_slice %708 {offsets = [0, 0], sizes = [8, 128], strides = [1, 1]} : vector<8x512xf32> to vector<8x128xf32>
    %cst_265 = arith.constant 5.000000e-01 : f32
    %710 = vector.broadcast %cst_265 : f32 to vector<8x128xf32>
    %711 = arith.mulf %710, %709 : vector<8x128xf32>
    %712 = math.tanh %711 : vector<8x128xf32>
    %cst_266 = arith.constant 5.000000e-01 : f32
    %713 = vector.broadcast %cst_266 : f32 to vector<8x128xf32>
    %714 = arith.mulf %713, %712 : vector<8x128xf32>
    %cst_267 = arith.constant 5.000000e-01 : f32
    %715 = vector.broadcast %cst_267 : f32 to vector<8x128xf32>
    %716 = arith.addf %714, %715 : vector<8x128xf32>
    %717 = vector.extract_strided_slice %708 {offsets = [0, 128], sizes = [8, 128], strides = [1, 1]} : vector<8x512xf32> to vector<8x128xf32>
    %cst_268 = arith.constant 5.000000e-01 : f32
    %718 = vector.broadcast %cst_268 : f32 to vector<8x128xf32>
    %719 = arith.mulf %718, %717 : vector<8x128xf32>
    %720 = math.tanh %719 : vector<8x128xf32>
    %cst_269 = arith.constant 5.000000e-01 : f32
    %721 = vector.broadcast %cst_269 : f32 to vector<8x128xf32>
    %722 = arith.mulf %721, %720 : vector<8x128xf32>
    %cst_270 = arith.constant 5.000000e-01 : f32
    %723 = vector.broadcast %cst_270 : f32 to vector<8x128xf32>
    %724 = arith.addf %722, %723 : vector<8x128xf32>
    %725 = vector.extract_strided_slice %708 {offsets = [0, 256], sizes = [8, 128], strides = [1, 1]} : vector<8x512xf32> to vector<8x128xf32>
    %726 = math.tanh %725 : vector<8x128xf32>
    %727 = vector.extract_strided_slice %708 {offsets = [0, 384], sizes = [8, 128], strides = [1, 1]} : vector<8x512xf32> to vector<8x128xf32>
    %cst_271 = arith.constant 5.000000e-01 : f32
    %728 = vector.broadcast %cst_271 : f32 to vector<8x128xf32>
    %729 = arith.mulf %728, %727 : vector<8x128xf32>
    %730 = math.tanh %729 : vector<8x128xf32>
    %cst_272 = arith.constant 5.000000e-01 : f32
    %731 = vector.broadcast %cst_272 : f32 to vector<8x128xf32>
    %732 = arith.mulf %731, %730 : vector<8x128xf32>
    %cst_273 = arith.constant 5.000000e-01 : f32
    %733 = vector.broadcast %cst_273 : f32 to vector<8x128xf32>
    %734 = arith.addf %732, %733 : vector<8x128xf32>
    %735 = arith.mulf %724, %702 : vector<8x128xf32>
    %736 = arith.mulf %716, %726 : vector<8x128xf32>
    %737 = arith.addf %735, %736 : vector<8x128xf32>
    %738 = math.tanh %737 : vector<8x128xf32>
    %739 = arith.mulf %734, %738 : vector<8x128xf32>
    %c24_274 = arith.constant 24 : index
    %c0_275 = arith.constant 0 : index
    %740 = vector.load %arg15[%c24_274, %c0_275] : memref<64x128xf32, #tpu.memory_space<vmem>>, vector<8x128xf32>
    tpu.vector_store %arg15[%c24_274, %c0_275], %739 {strides = array<i32>} : memref<64x128xf32, #tpu.memory_space<vmem>>, vector<8x128xf32>,
    %741 = vector.extract_strided_slice %598 {offsets = [32, 0], sizes = [8, 512], strides = [1, 1]} : vector<64x512xf32> to vector<8x512xf32>
    %cst_276 = arith.constant dense<0.000000e+00> : vector<8x512xf32>
    %742 = tpu.matmul %739, %593, %cst_276 {dimension_numbers = #tpu.dot_dimension_numbers<[1], [0], [0], [1], [0, 0, 1, 1], [], []>} : vector<8x128xf32>, vector<128x512xf32>, vector<8x512xf32> -> vector<8x512xf32>
    %743 = arith.addf %741, %742 : vector<8x512xf32>
    %744 = vector.extract_strided_slice %743 {offsets = [0, 0], sizes = [8, 128], strides = [1, 1]} : vector<8x512xf32> to vector<8x128xf32>
    %cst_277 = arith.constant 5.000000e-01 : f32
    %745 = vector.broadcast %cst_277 : f32 to vector<8x128xf32>
    %746 = arith.mulf %745, %744 : vector<8x128xf32>
    %747 = math.tanh %746 : vector<8x128xf32>
    %cst_278 = arith.constant 5.000000e-01 : f32
    %748 = vector.broadcast %cst_278 : f32 to vector<8x128xf32>
    %749 = arith.mulf %748, %747 : vector<8x128xf32>
    %cst_279 = arith.constant 5.000000e-01 : f32
    %750 = vector.broadcast %cst_279 : f32 to vector<8x128xf32>
    %751 = arith.addf %749, %750 : vector<8x128xf32>
    %752 = vector.extract_strided_slice %743 {offsets = [0, 128], sizes = [8, 128], strides = [1, 1]} : vector<8x512xf32> to vector<8x128xf32>
    %cst_280 = arith.constant 5.000000e-01 : f32
    %753 = vector.broadcast %cst_280 : f32 to vector<8x128xf32>
    %754 = arith.mulf %753, %752 : vector<8x128xf32>
    %755 = math.tanh %754 : vector<8x128xf32>
    %cst_281 = arith.constant 5.000000e-01 : f32
    %756 = vector.broadcast %cst_281 : f32 to vector<8x128xf32>
    %757 = arith.mulf %756, %755 : vector<8x128xf32>
    %cst_282 = arith.constant 5.000000e-01 : f32
    %758 = vector.broadcast %cst_282 : f32 to vector<8x128xf32>
    %759 = arith.addf %757, %758 : vector<8x128xf32>
    %760 = vector.extract_strided_slice %743 {offsets = [0, 256], sizes = [8, 128], strides = [1, 1]} : vector<8x512xf32> to vector<8x128xf32>
    %761 = math.tanh %760 : vector<8x128xf32>
    %762 = vector.extract_strided_slice %743 {offsets = [0, 384], sizes = [8, 128], strides = [1, 1]} : vector<8x512xf32> to vector<8x128xf32>
    %cst_283 = arith.constant 5.000000e-01 : f32
    %763 = vector.broadcast %cst_283 : f32 to vector<8x128xf32>
    %764 = arith.mulf %763, %762 : vector<8x128xf32>
    %765 = math.tanh %764 : vector<8x128xf32>
    %cst_284 = arith.constant 5.000000e-01 : f32
    %766 = vector.broadcast %cst_284 : f32 to vector<8x128xf32>
    %767 = arith.mulf %766, %765 : vector<8x128xf32>
    %cst_285 = arith.constant 5.000000e-01 : f32
    %768 = vector.broadcast %cst_285 : f32 to vector<8x128xf32>
    %769 = arith.addf %767, %768 : vector<8x128xf32>
    %770 = arith.mulf %759, %737 : vector<8x128xf32>
    %771 = arith.mulf %751, %761 : vector<8x128xf32>
    %772 = arith.addf %770, %771 : vector<8x128xf32>
    %773 = math.tanh %772 : vector<8x128xf32>
    %774 = arith.mulf %769, %773 : vector<8x128xf32>
    %c32_286 = arith.constant 32 : index
    %c0_287 = arith.constant 0 : index
    %775 = vector.load %arg15[%c32_286, %c0_287] : memref<64x128xf32, #tpu.memory_space<vmem>>, vector<8x128xf32>
    tpu.vector_store %arg15[%c32_286, %c0_287], %774 {strides = array<i32>} : memref<64x128xf32, #tpu.memory_space<vmem>>, vector<8x128xf32>,
    %776 = vector.extract_strided_slice %598 {offsets = [40, 0], sizes = [8, 512], strides = [1, 1]} : vector<64x512xf32> to vector<8x512xf32>
    %cst_288 = arith.constant dense<0.000000e+00> : vector<8x512xf32>
    %777 = tpu.matmul %774, %593, %cst_288 {dimension_numbers = #tpu.dot_dimension_numbers<[1], [0], [0], [1], [0, 0, 1, 1], [], []>} : vector<8x128xf32>, vector<128x512xf32>, vector<8x512xf32> -> vector<8x512xf32>
    %778 = arith.addf %776, %777 : vector<8x512xf32>
    %779 = vector.extract_strided_slice %778 {offsets = [0, 0], sizes = [8, 128], strides = [1, 1]} : vector<8x512xf32> to vector<8x128xf32>
    %cst_289 = arith.constant 5.000000e-01 : f32
    %780 = vector.broadcast %cst_289 : f32 to vector<8x128xf32>
    %781 = arith.mulf %780, %779 : vector<8x128xf32>
    %782 = math.tanh %781 : vector<8x128xf32>
    %cst_290 = arith.constant 5.000000e-01 : f32
    %783 = vector.broadcast %cst_290 : f32 to vector<8x128xf32>
    %784 = arith.mulf %783, %782 : vector<8x128xf32>
    %cst_291 = arith.constant 5.000000e-01 : f32
    %785 = vector.broadcast %cst_291 : f32 to vector<8x128xf32>
    %786 = arith.addf %784, %785 : vector<8x128xf32>
    %787 = vector.extract_strided_slice %778 {offsets = [0, 128], sizes = [8, 128], strides = [1, 1]} : vector<8x512xf32> to vector<8x128xf32>
    %cst_292 = arith.constant 5.000000e-01 : f32
    %788 = vector.broadcast %cst_292 : f32 to vector<8x128xf32>
    %789 = arith.mulf %788, %787 : vector<8x128xf32>
    %790 = math.tanh %789 : vector<8x128xf32>
    %cst_293 = arith.constant 5.000000e-01 : f32
    %791 = vector.broadcast %cst_293 : f32 to vector<8x128xf32>
    %792 = arith.mulf %791, %790 : vector<8x128xf32>
    %cst_294 = arith.constant 5.000000e-01 : f32
    %793 = vector.broadcast %cst_294 : f32 to vector<8x128xf32>
    %794 = arith.addf %792, %793 : vector<8x128xf32>
    %795 = vector.extract_strided_slice %778 {offsets = [0, 256], sizes = [8, 128], strides = [1, 1]} : vector<8x512xf32> to vector<8x128xf32>
    %796 = math.tanh %795 : vector<8x128xf32>
    %797 = vector.extract_strided_slice %778 {offsets = [0, 384], sizes = [8, 128], strides = [1, 1]} : vector<8x512xf32> to vector<8x128xf32>
    %cst_295 = arith.constant 5.000000e-01 : f32
    %798 = vector.broadcast %cst_295 : f32 to vector<8x128xf32>
    %799 = arith.mulf %798, %797 : vector<8x128xf32>
    %800 = math.tanh %799 : vector<8x128xf32>
    %cst_296 = arith.constant 5.000000e-01 : f32
    %801 = vector.broadcast %cst_296 : f32 to vector<8x128xf32>
    %802 = arith.mulf %801, %800 : vector<8x128xf32>
    %cst_297 = arith.constant 5.000000e-01 : f32
    %803 = vector.broadcast %cst_297 : f32 to vector<8x128xf32>
    %804 = arith.addf %802, %803 : vector<8x128xf32>
    %805 = arith.mulf %794, %772 : vector<8x128xf32>
    %806 = arith.mulf %786, %796 : vector<8x128xf32>
    %807 = arith.addf %805, %806 : vector<8x128xf32>
    %808 = math.tanh %807 : vector<8x128xf32>
    %809 = arith.mulf %804, %808 : vector<8x128xf32>
    %c40_298 = arith.constant 40 : index
    %c0_299 = arith.constant 0 : index
    %810 = vector.load %arg15[%c40_298, %c0_299] : memref<64x128xf32, #tpu.memory_space<vmem>>, vector<8x128xf32>
    tpu.vector_store %arg15[%c40_298, %c0_299], %809 {strides = array<i32>} : memref<64x128xf32, #tpu.memory_space<vmem>>, vector<8x128xf32>,
    %811 = vector.extract_strided_slice %598 {offsets = [48, 0], sizes = [8, 512], strides = [1, 1]} : vector<64x512xf32> to vector<8x512xf32>
    %cst_300 = arith.constant dense<0.000000e+00> : vector<8x512xf32>
    %812 = tpu.matmul %809, %593, %cst_300 {dimension_numbers = #tpu.dot_dimension_numbers<[1], [0], [0], [1], [0, 0, 1, 1], [], []>} : vector<8x128xf32>, vector<128x512xf32>, vector<8x512xf32> -> vector<8x512xf32>
    %813 = arith.addf %811, %812 : vector<8x512xf32>
    %814 = vector.extract_strided_slice %813 {offsets = [0, 0], sizes = [8, 128], strides = [1, 1]} : vector<8x512xf32> to vector<8x128xf32>
    %cst_301 = arith.constant 5.000000e-01 : f32
    %815 = vector.broadcast %cst_301 : f32 to vector<8x128xf32>
    %816 = arith.mulf %815, %814 : vector<8x128xf32>
    %817 = math.tanh %816 : vector<8x128xf32>
    %cst_302 = arith.constant 5.000000e-01 : f32
    %818 = vector.broadcast %cst_302 : f32 to vector<8x128xf32>
    %819 = arith.mulf %818, %817 : vector<8x128xf32>
    %cst_303 = arith.constant 5.000000e-01 : f32
    %820 = vector.broadcast %cst_303 : f32 to vector<8x128xf32>
    %821 = arith.addf %819, %820 : vector<8x128xf32>
    %822 = vector.extract_strided_slice %813 {offsets = [0, 128], sizes = [8, 128], strides = [1, 1]} : vector<8x512xf32> to vector<8x128xf32>
    %cst_304 = arith.constant 5.000000e-01 : f32
    %823 = vector.broadcast %cst_304 : f32 to vector<8x128xf32>
    %824 = arith.mulf %823, %822 : vector<8x128xf32>
    %825 = math.tanh %824 : vector<8x128xf32>
    %cst_305 = arith.constant 5.000000e-01 : f32
    %826 = vector.broadcast %cst_305 : f32 to vector<8x128xf32>
    %827 = arith.mulf %826, %825 : vector<8x128xf32>
    %cst_306 = arith.constant 5.000000e-01 : f32
    %828 = vector.broadcast %cst_306 : f32 to vector<8x128xf32>
    %829 = arith.addf %827, %828 : vector<8x128xf32>
    %830 = vector.extract_strided_slice %813 {offsets = [0, 256], sizes = [8, 128], strides = [1, 1]} : vector<8x512xf32> to vector<8x128xf32>
    %831 = math.tanh %830 : vector<8x128xf32>
    %832 = vector.extract_strided_slice %813 {offsets = [0, 384], sizes = [8, 128], strides = [1, 1]} : vector<8x512xf32> to vector<8x128xf32>
    %cst_307 = arith.constant 5.000000e-01 : f32
    %833 = vector.broadcast %cst_307 : f32 to vector<8x128xf32>
    %834 = arith.mulf %833, %832 : vector<8x128xf32>
    %835 = math.tanh %834 : vector<8x128xf32>
    %cst_308 = arith.constant 5.000000e-01 : f32
    %836 = vector.broadcast %cst_308 : f32 to vector<8x128xf32>
    %837 = arith.mulf %836, %835 : vector<8x128xf32>
    %cst_309 = arith.constant 5.000000e-01 : f32
    %838 = vector.broadcast %cst_309 : f32 to vector<8x128xf32>
    %839 = arith.addf %837, %838 : vector<8x128xf32>
    %840 = arith.mulf %829, %807 : vector<8x128xf32>
    %841 = arith.mulf %821, %831 : vector<8x128xf32>
    %842 = arith.addf %840, %841 : vector<8x128xf32>
    %843 = math.tanh %842 : vector<8x128xf32>
    %844 = arith.mulf %839, %843 : vector<8x128xf32>
    %c48_310 = arith.constant 48 : index
    %c0_311 = arith.constant 0 : index
    %845 = vector.load %arg15[%c48_310, %c0_311] : memref<64x128xf32, #tpu.memory_space<vmem>>, vector<8x128xf32>
    tpu.vector_store %arg15[%c48_310, %c0_311], %844 {strides = array<i32>} : memref<64x128xf32, #tpu.memory_space<vmem>>, vector<8x128xf32>,
    %846 = vector.extract_strided_slice %598 {offsets = [56, 0], sizes = [8, 512], strides = [1, 1]} : vector<64x512xf32> to vector<8x512xf32>
    %cst_312 = arith.constant dense<0.000000e+00> : vector<8x512xf32>
    %847 = tpu.matmul %844, %593, %cst_312 {dimension_numbers = #tpu.dot_dimension_numbers<[1], [0], [0], [1], [0, 0, 1, 1], [], []>} : vector<8x128xf32>, vector<128x512xf32>, vector<8x512xf32> -> vector<8x512xf32>
    %848 = arith.addf %846, %847 : vector<8x512xf32>
    %849 = vector.extract_strided_slice %848 {offsets = [0, 0], sizes = [8, 128], strides = [1, 1]} : vector<8x512xf32> to vector<8x128xf32>
    %cst_313 = arith.constant 5.000000e-01 : f32
    %850 = vector.broadcast %cst_313 : f32 to vector<8x128xf32>
    %851 = arith.mulf %850, %849 : vector<8x128xf32>
    %852 = math.tanh %851 : vector<8x128xf32>
    %cst_314 = arith.constant 5.000000e-01 : f32
    %853 = vector.broadcast %cst_314 : f32 to vector<8x128xf32>
    %854 = arith.mulf %853, %852 : vector<8x128xf32>
    %cst_315 = arith.constant 5.000000e-01 : f32
    %855 = vector.broadcast %cst_315 : f32 to vector<8x128xf32>
    %856 = arith.addf %854, %855 : vector<8x128xf32>
    %857 = vector.extract_strided_slice %848 {offsets = [0, 128], sizes = [8, 128], strides = [1, 1]} : vector<8x512xf32> to vector<8x128xf32>
    %cst_316 = arith.constant 5.000000e-01 : f32
    %858 = vector.broadcast %cst_316 : f32 to vector<8x128xf32>
    %859 = arith.mulf %858, %857 : vector<8x128xf32>
    %860 = math.tanh %859 : vector<8x128xf32>
    %cst_317 = arith.constant 5.000000e-01 : f32
    %861 = vector.broadcast %cst_317 : f32 to vector<8x128xf32>
    %862 = arith.mulf %861, %860 : vector<8x128xf32>
    %cst_318 = arith.constant 5.000000e-01 : f32
    %863 = vector.broadcast %cst_318 : f32 to vector<8x128xf32>
    %864 = arith.addf %862, %863 : vector<8x128xf32>
    %865 = vector.extract_strided_slice %848 {offsets = [0, 256], sizes = [8, 128], strides = [1, 1]} : vector<8x512xf32> to vector<8x128xf32>
    %866 = math.tanh %865 : vector<8x128xf32>
    %867 = vector.extract_strided_slice %848 {offsets = [0, 384], sizes = [8, 128], strides = [1, 1]} : vector<8x512xf32> to vector<8x128xf32>
    %cst_319 = arith.constant 5.000000e-01 : f32
    %868 = vector.broadcast %cst_319 : f32 to vector<8x128xf32>
    %869 = arith.mulf %868, %867 : vector<8x128xf32>
    %870 = math.tanh %869 : vector<8x128xf32>
    %cst_320 = arith.constant 5.000000e-01 : f32
    %871 = vector.broadcast %cst_320 : f32 to vector<8x128xf32>
    %872 = arith.mulf %871, %870 : vector<8x128xf32>
    %cst_321 = arith.constant 5.000000e-01 : f32
    %873 = vector.broadcast %cst_321 : f32 to vector<8x128xf32>
    %874 = arith.addf %872, %873 : vector<8x128xf32>
    %875 = arith.mulf %864, %842 : vector<8x128xf32>
    %876 = arith.mulf %856, %866 : vector<8x128xf32>
    %877 = arith.addf %875, %876 : vector<8x128xf32>
    %878 = math.tanh %877 : vector<8x128xf32>
    %879 = arith.mulf %874, %878 : vector<8x128xf32>
    %c56_322 = arith.constant 56 : index
    %c0_323 = arith.constant 0 : index
    %880 = vector.load %arg15[%c56_322, %c0_323] : memref<64x128xf32, #tpu.memory_space<vmem>>, vector<8x128xf32>
    tpu.vector_store %arg15[%c56_322, %c0_323], %879 {strides = array<i32>} : memref<64x128xf32, #tpu.memory_space<vmem>>, vector<8x128xf32>,
    %c2 = arith.constant 2 : index
    %c0_324 = arith.constant 0 : index
    %c0_325 = arith.constant 0 : index
    %881 = vector.load %arg13[%c2, %c0_324, %c0_325] : memref<3x8x128xf32, #tpu.memory_space<vmem>>, vector<1x8x128xf32>
    %882 = vector.shape_cast %881 : vector<1x8x128xf32> to vector<8x128xf32>
    %883 = vector.shape_cast %879 : vector<8x128xf32> to vector<1x8x128xf32>
    tpu.vector_store %arg13[%c2, %c0_324, %c0_325], %883 {strides = array<i32>} : memref<3x8x128xf32, #tpu.memory_space<vmem>>, vector<1x8x128xf32>,
    %c2_326 = arith.constant 2 : index
    %c0_327 = arith.constant 0 : index
    %c0_328 = arith.constant 0 : index
    %884 = vector.load %arg14[%c2_326, %c0_327, %c0_328] : memref<3x8x128xf32, #tpu.memory_space<vmem>>, vector<1x8x128xf32>
    %885 = vector.shape_cast %884 : vector<1x8x128xf32> to vector<8x128xf32>
    %886 = vector.shape_cast %877 : vector<8x128xf32> to vector<1x8x128xf32>
    tpu.vector_store %arg14[%c2_326, %c0_327, %c0_328], %886 {strides = array<i32>} : memref<3x8x128xf32, #tpu.memory_space<vmem>>, vector<1x8x128xf32>,
    %c0_329 = arith.constant 0 : index
    %c0_330 = arith.constant 0 : index
    %887 = vector.load %arg15[%c0_329, %c0_330] : memref<64x128xf32, #tpu.memory_space<vmem>>, vector<64x128xf32>
    %c0_331 = arith.constant 0 : index
    %c0_332 = arith.constant 0 : index
    %888 = vector.load %arg10[%c0_331, %c0_332] : memref<128x8xf32, #tpu.memory_space<vmem>>, vector<128x8xf32>
    %cst_333 = arith.constant dense<0.000000e+00> : vector<64x8xf32>
    %889 = tpu.matmul %887, %888, %cst_333 {dimension_numbers = #tpu.dot_dimension_numbers<[1], [0], [0], [1], [0, 0, 1, 1], [], []>} : vector<64x128xf32>, vector<128x8xf32>, vector<64x8xf32> -> vector<64x8xf32>
    %c0_334 = arith.constant 0 : index
    %c0_335 = arith.constant 0 : index
    %890 = vector.load %arg11[%c0_334, %c0_335] : memref<1x8xf32, #tpu.memory_space<vmem>>, vector<1x8xf32>
    %891 = vector.broadcast %890 : vector<1x8xf32> to vector<64x8xf32>
    %892 = arith.addf %889, %891 : vector<64x8xf32>
    %893 = vector.shape_cast %892 : vector<64x8xf32> to vector<8x8x8xf32>
    %894 = tpu.transpose %893, [1, 0, 2] : vector<8x8x8xf32> -> vector<8x8x8xf32>
    %895 = vector.shape_cast %894 : vector<8x8x8xf32> to vector<64x8xf32>
    %c0_336 = arith.constant 0 : index
    %c0_337 = arith.constant 0 : index
    %896 = vector.load %arg12[%c0_336, %c0_337] : memref<64x8xf32, #tpu.memory_space<vmem>>, vector<64x8xf32>
    tpu.vector_store %arg12[%c0_336, %c0_337], %895 {strides = array<i32>} : memref<64x8xf32, #tpu.memory_space<vmem>>, vector<64x8xf32>,
    return
  }
}

</mosaic_0001>

<bundles_post_ra>
// kernel: _forward.1
= control target key start
LH: loop header
LB: loop body
LE: loop exit
PB: predicated region body
PF: predicated region fallthrough
CT: control target
= control target key end

     0   :  { %20 = vsyncpa [#allocation4], 0  ;;  %s10041_s0 = inlined_call_operand.hbm [shape: f32[8,8,32], index: 0, kind: input, shape index: {}]   ;;  %s10042_s1 = inlined_call_operand.hbm [shape: f32[32,512], index: 1, kind: input, shape index: {}]   ;;  %s10043_s2 = inlined_call_operand.hbm [shape: f32[128,512], index: 2, kind: input, shape index: {}]   ;;  %s10044_s3 = inlined_call_operand.hbm [shape: f32[1,512], index: 3, kind: input, shape index: {}]   ;;  %s10045_s4 = inlined_call_operand.hbm [shape: f32[128,512], index: 4, kind: input, shape index: {}]   ;;  %s10046_s5 = inlined_call_operand.hbm [shape: f32[128,512], index: 5, kind: input, shape index: {}]   ;;  %s10047_s6 = inlined_call_operand.vmem [shape: f32[1,512], index: 6, kind: input, shape index: {}]   ;;  %s10048_s7 = inlined_call_operand.hbm [shape: f32[128,512], index: 7, kind: input, shape index: {}]   ;;  %s10049_s8 = inlined_call_operand.hbm [shape: f32[128,512], index: 8, kind: input, shape index: {}]   ;;  %s10050_s9 = inlined_call_operand.vmem [shape: f32[1,512], index: 9, kind: input, shape index: {}]   ;;  %s10051_s10 = inlined_call_operand.hbm [shape: f32[128,8], index: 10, kind: input, shape index: {}]   ;;  %s10052_s11 = inlined_call_operand.vmem [shape: f32[1,8], index: 11, kind: input, shape index: {}]   ;;  %s10053_s12 = inlined_call_operand.vmem [shape: f32[64,8], index: 12, kind: output, shape index: {0}]   ;;  %s10054_s13 = inlined_call_operand.hbm [shape: f32[3,8,128], index: 13, kind: output, shape index: {1}]   ;;  %s10055_s14 = inlined_call_operand.hbm [shape: f32[3,8,128], index: 14, kind: output, shape index: {2}]  }
   0x1   :  { %21 = vsyncpa [#allocation7], 0 }
   0x2   :  { %22 = vsyncpa [#allocation10], 0 }
   0x3   :  { %23 = vsyncpa [#allocation13], 0 }
   0x4   :  { %24 = vsyncpa [#allocation16], 0 }
   0x5   :  { %25 = vsyncpa [#allocation5], 0 }
   0x6   :  { %26 = vsyncpa [#allocation20], 0  ;;  %s8238_s29 = smov [#allocation6]   ;;  %s7982_s17 = scalar_lea.hbm %s10042_s1, 2048 }
   0x7   :  { %s44_s30 = sshll.u32 %s8238_s29, 4  ;;  %p7983_p0 = scmp.ne.s32.totalorder %s10042_s1, %s7982_s17  ;;  %s45_s30 = int_to_ptr.vmem [resolvable:$true] %s44_s30 }
   0x8   :  { %p7986_p1 = scmp.lt.u32.totalorder %s7982_s17, %s10042_s1 }
   0xa   :  { %p7988_p2 = pnand %p7986_p1, %p7983_p0 }
   0xc   :  { %7991 = shalt.err (!%p7988_p2)
}
   0xd   :  { %s7992_s22 = scalar_lea.vmem %s45_s30, 2048  ;;  %p7997_p4 = scmp.lt.s32.totalorder %s45_s30, %s45_s30 }
   0xe   :  { %p7993_p3 = scmp.ne.s32.totalorder %s45_s30, %s7992_s22  ;;  %p7998_p5 = scmp.lt.s32.totalorder %s7992_s22, %s7992_s22 }
  0x10   :  { %p7999_p6 = por %p7998_p5, %p7997_p4 }
  0x12   :  { %p8000_p7 = pnand %p7999_p6, %p7993_p3 }
  0x14   :  { %8003 = shalt.err (!%p8000_p7)
}
  0x15   :  { %s8239_s23 = smov 512   ;;  %s8240_s24 = smov 32  }
  0x16   :  { %50 = dma.hbm_to_vmem [thread:$0]  %s10042_s1, 2048, %s45_s30, [#allocation7], %s8239_s23, %s8239_s23, %s8240_s24  }
  0x17   :  { %s8241_s27 = smov [#allocation9]   ;;  %s8242_s29 = smov [#allocation12]  }
  0x18   :  { %s69_s28 = sshll.u32 %s8241_s27, 4  ;;  %s90_s15 = sshll.u32 %s8242_s29, 4  ;;  %s70_s28 = int_to_ptr.vmem [resolvable:$true] %s69_s28  ;;  %s91_s15 = int_to_ptr.vmem [resolvable:$true] %s90_s15 }
  0x19   :  { %s8004_s18 = scalar_lea.hbm %s10044_s3, 64 }
  0x1a   :  { %p8005_p8 = scmp.ne.s32.totalorder %s10044_s3, %s8004_s18  ;;  %p8008_p9 = scmp.lt.u32.totalorder %s8004_s18, %s10044_s3 }
  0x1c   :  { %p8010_p10 = pnand %p8008_p9, %p8005_p8 }
  0x1e   :  { %8013 = shalt.err (!%p8010_p10)
}
  0x1f   :  { %s8014_s1 = scalar_lea.vmem %s70_s28, 64  ;;  %p8019_p12 = scmp.lt.s32.totalorder %s70_s28, %s70_s28 }
  0x20   :  { %p8015_p11 = scmp.ne.s32.totalorder %s70_s28, %s8014_s1  ;;  %p8020_p13 = scmp.lt.s32.totalorder %s8014_s1, %s8014_s1 }
  0x22   :  { %p8021_p0 = por %p8020_p13, %p8019_p12 }
  0x24   :  { %p8022_p1 = pnand %p8021_p0, %p8015_p11 }
  0x26   :  { %8025 = shalt.err (!%p8022_p1)
}
  0x27   :  { %72 = dma.hbm_to_vmem [thread:$0]  %s10044_s3, 64, %s70_s28, [#allocation10]  }
  0x28   :  { %s8026_s29 = scalar_lea.hbm %s10046_s5, 8192 }
  0x29   :  { %p8027_p2 = scmp.ne.s32.totalorder %s10046_s5, %s8026_s29  ;;  %p8030_p3 = scmp.lt.u32.totalorder %s8026_s29, %s10046_s5 }
  0x2b   :  { %p8032_p4 = pnand %p8030_p3, %p8027_p2 }
  0x2d   :  { %8035 = shalt.err (!%p8032_p4)
}
  0x2e   :  { %s8036_s20 = scalar_lea.vmem %s91_s15, 8192  ;;  %p8041_p6 = scmp.lt.s32.totalorder %s91_s15, %s91_s15 }
  0x2f   :  { %p8037_p5 = scmp.ne.s32.totalorder %s91_s15, %s8036_s20  ;;  %p8042_p7 = scmp.lt.s32.totalorder %s8036_s20, %s8036_s20 }
  0x31   :  { %p8043_p8 = por %p8042_p7, %p8041_p6 }
  0x33   :  { %p8044_p9 = pnand %p8043_p8, %p8037_p5 }
  0x35   :  { %8047 = shalt.err (!%p8044_p9)
}
  0x36   :  { %96 = dma.hbm_to_vmem [thread:$0]  %s10046_s5, 8192, %s91_s15, [#allocation13], %s8239_s23, %s8239_s23, %s8240_s24  }
  0x37   :  { %s8243_s21 = smov [#allocation15]   ;;  %s8244_s1 = smov [#allocation3]  }
  0x38   :  { %s116_s22 = sshll.u32 %s8243_s21, 4  ;;  %s32_s30 = sshll.u32 %s8244_s1, 4  ;;  %s117_s22 = int_to_ptr.vmem [resolvable:$true] %s116_s22  ;;  %s33_s30 = int_to_ptr.vmem [resolvable:$true] %s32_s30 }
  0x39   :  { %s8048_s27 = scalar_lea.hbm %s10049_s8, 8192 }
  0x3a   :  { %p8049_p10 = scmp.ne.s32.totalorder %s10049_s8, %s8048_s27  ;;  %p8052_p11 = scmp.lt.u32.totalorder %s8048_s27, %s10049_s8 }
  0x3c   :  { %p8054_p12 = pnand %p8052_p11, %p8049_p10 }
  0x3e   :  { %8057 = shalt.err (!%p8054_p12)
}
  0x3f   :  { %s8058_s5 = scalar_lea.vmem %s117_s22, 8192  ;;  %p8063_p0 = scmp.lt.s32.totalorder %s117_s22, %s117_s22 }
  0x40   :  { %p8059_p13 = scmp.ne.s32.totalorder %s117_s22, %s8058_s5  ;;  %p8064_p1 = scmp.lt.s32.totalorder %s8058_s5, %s8058_s5 }
  0x42   :  { %p8065_p2 = por %p8064_p1, %p8063_p0 }
  0x44   :  { %p8066_p3 = pnand %p8065_p2, %p8059_p13 }
  0x46   :  { %8069 = shalt.err (!%p8066_p3)
}
  0x47   :  { %122 = dma.hbm_to_vmem [thread:$0]  %s10049_s8, 8192, %s117_s22, [#allocation16], %s8239_s23, %s8239_s23, %s8240_s24  }
  0x48   :  { %s8070_s28 = scalar_lea.hbm %s10041_s0, 1024 }
  0x49   :  { %p8071_p4 = scmp.ne.s32.totalorder %s10041_s0, %s8070_s28  ;;  %p8074_p5 = scmp.lt.u32.totalorder %s8070_s28, %s10041_s0 }
  0x4b   :  { %p8076_p6 = pnand %p8074_p5, %p8071_p4 }
  0x4d   :  { %8079 = shalt.err (!%p8076_p6)
}
  0x4e   :  { %s8080_s27 = scalar_lea.vmem %s33_s30, 1024  ;;  %p8085_p8 = scmp.lt.s32.totalorder %s33_s30, %s33_s30 }
  0x4f   :  { %p8081_p7 = scmp.ne.s32.totalorder %s33_s30, %s8080_s27  ;;  %p8086_p9 = scmp.lt.s32.totalorder %s8080_s27, %s8080_s27 }
  0x51   :  { %p8087_p10 = por %p8086_p9, %p8085_p8 }
  0x53   :  { %p8088_p11 = pnand %p8087_p10, %p8081_p7 }
  0x55   :  { %8091 = shalt.err (!%p8088_p11)
}
  0x56   :  { %s8245_s8 = smov 128   ;;  %s8246_s22 = smov 8  }
  0x57   :  { %38 = dma.hbm_to_vmem [thread:$0]  %s10041_s0, 1024, %s33_s30, [#allocation4], %s8245_s8, %s8245_s8, %s8246_s22  }
  0x58   :  { %s8247_s17 = smov [#allocation8]   ;;  %s8248_s5 = smov [#allocation11]  }
  0x59   :  { %s56_s18 = sshll.u32 %s8247_s17, 4  ;;  %s78_s15 = sshll.u32 %s8248_s5, 4  ;;  %s57_s18 = int_to_ptr.vmem [resolvable:$true] %s56_s18  ;;  %s79_s15 = int_to_ptr.vmem [resolvable:$true] %s78_s15 }
  0x5a   :  { %s8092_s3 = scalar_lea.hbm %s10043_s2, 8192 }
  0x5b   :  { %p8093_p12 = scmp.ne.s32.totalorder %s10043_s2, %s8092_s3  ;;  %p8096_p13 = scmp.lt.u32.totalorder %s8092_s3, %s10043_s2 }
  0x5d   :  { %p8098_p0 = pnand %p8096_p13, %p8093_p12 }
  0x5f   :  { %8101 = shalt.err (!%p8098_p0)
}
  0x60   :  { %s8102_s0 = scalar_lea.vmem %s57_s18, 8192  ;;  %p8107_p2 = scmp.lt.s32.totalorder %s57_s18, %s57_s18 }
  0x61   :  { %p8103_p1 = scmp.ne.s32.totalorder %s57_s18, %s8102_s0  ;;  %p8108_p3 = scmp.lt.s32.totalorder %s8102_s0, %s8102_s0 }
  0x63   :  { %p8109_p4 = por %p8108_p3, %p8107_p2 }
  0x65   :  { %p8110_p5 = pnand %p8109_p4, %p8103_p1 }
  0x67   :  { %8113 = shalt.err (!%p8110_p5)
}
  0x68   :  { %62 = dma.hbm_to_vmem [thread:$0]  %s10043_s2, 8192, %s57_s18, [#allocation7], %s8239_s23, %s8239_s23, %s8240_s24  }
  0x69   :  { %s8114_s16 = scalar_lea.hbm %s10045_s4, 8192 }
  0x6a   :  { %p8115_p6 = scmp.ne.s32.totalorder %s10045_s4, %s8114_s16  ;;  %p8118_p7 = scmp.lt.u32.totalorder %s8114_s16, %s10045_s4 }
  0x6c   :  { %p8120_p8 = pnand %p8118_p7, %p8115_p6 }
  0x6e   :  { %8123 = shalt.err (!%p8120_p8)
}
  0x6f   :  { %s8124_s3 = scalar_lea.vmem %s79_s15, 8192  ;;  %p8129_p10 = scmp.lt.s32.totalorder %s79_s15, %s79_s15 }
  0x70   :  { %p8125_p9 = scmp.ne.s32.totalorder %s79_s15, %s8124_s3  ;;  %p8130_p11 = scmp.lt.s32.totalorder %s8124_s3, %s8124_s3 }
  0x72   :  { %p8131_p12 = por %p8130_p11, %p8129_p10 }
  0x74   :  { %p8132_p13 = pnand %p8131_p12, %p8125_p9 }
  0x76   :  { %8135 = shalt.err (!%p8132_p13)
}
  0x77   :  { %84 = dma.hbm_to_vmem [thread:$0]  %s10045_s4, 8192, %s79_s15, [#allocation10], %s8239_s23, %s8239_s23, %s8240_s24  }
  0x78   :  { %s8249_s28 = smov [#allocation14]   ;;  %s8250_s1 = smov [#allocation17]  }
  0x79   :  { %s104_s21 = sshll.u32 %s8249_s28, 4  ;;  %s130_s25 = sshll.u32 %s8250_s1, 4  ;;  %s105_s21 = int_to_ptr.vmem [resolvable:$true] %s104_s21  ;;  %s131_s25 = int_to_ptr.vmem [resolvable:$true] %s130_s25 }
  0x7a   :  { %s8136_s26 = scalar_lea.hbm %s10048_s7, 8192 }
  0x7b   :  { %p8137_p0 = scmp.ne.s32.totalorder %s10048_s7, %s8136_s26  ;;  %p8140_p1 = scmp.lt.u32.totalorder %s8136_s26, %s10048_s7 }
  0x7d   :  { %p8142_p2 = pnand %p8140_p1, %p8137_p0 }
  0x7f   :  { %8145 = shalt.err (!%p8142_p2)
}
  0x80   :  { %s8146_s4 = scalar_lea.vmem %s105_s21, 8192  ;;  %p8151_p4 = scmp.lt.s32.totalorder %s105_s21, %s105_s21 }
  0x81   :  { %p8147_p3 = scmp.ne.s32.totalorder %s105_s21, %s8146_s4  ;;  %p8152_p5 = scmp.lt.s32.totalorder %s8146_s4, %s8146_s4 }
  0x83   :  { %p8153_p6 = por %p8152_p5, %p8151_p4 }
  0x85   :  { %p8154_p7 = pnand %p8153_p6, %p8147_p3 }
  0x87   :  { %8157 = shalt.err (!%p8154_p7)
}
  0x88   :  { %110 = dma.hbm_to_vmem [thread:$0]  %s10048_s7, 8192, %s105_s21, [#allocation13], %s8239_s23, %s8239_s23, %s8240_s24  }
  0x89   :  { %s8158_s3 = scalar_lea.hbm %s10051_s10, 2048 }
  0x8a   :  { %p8159_p8 = scmp.ne.s32.totalorder %s10051_s10, %s8158_s3  ;;  %p8162_p9 = scmp.lt.u32.totalorder %s8158_s3, %s10051_s10 }
  0x8c   :  { %p8164_p10 = pnand %p8162_p9, %p8159_p8 }
  0x8e   :  { %8167 = shalt.err (!%p8164_p10)
}
  0x8f   :  { %s8168_s0 = scalar_lea.vmem %s131_s25, 2048  ;;  %p8173_p12 = scmp.lt.s32.totalorder %s131_s25, %s131_s25 }
  0x90   :  { %p8169_p11 = scmp.ne.s32.totalorder %s131_s25, %s8168_s0  ;;  %p8174_p13 = scmp.lt.s32.totalorder %s8168_s0, %s8168_s0 }
  0x92   :  { %p8175_p0 = por %p8174_p13, %p8173_p12 }
  0x94   :  { %p8176_p1 = pnand %p8175_p0, %p8169_p11 }
  0x96   :  { %8179 = shalt.err (!%p8176_p1)
}
  0x97   :  { %136 = dma.hbm_to_vmem [thread:$0]  %s10051_s10, 2048, %s131_s25, [#allocation16], %s8245_s8, %s8245_s8, %s8246_s22  }
  0x98   :  { %8224 = dma.done.wait [#allocation4], 1024  }
  0x99   :  { %8225 = vsyncadd [#allocation4], 4294966272 }
  0x9a   :  { %8226 = dma.done.wait [#allocation7], 10240  }
  0x9b   :  { %8227 = vsyncadd [#allocation7], 4294957056 }
  0x9c   :  { %8228 = dma.done.wait [#allocation10], 8256  }
  0x9d   :  { %8229 = vsyncadd [#allocation10], 4294959040 }
  0x9e   :  { %8230 = dma.done.wait [#allocation13], 16384  }
  0x9f   :  { %8231 = vsyncadd [#allocation13], 4294950912 }
  0xa0   :  { %8232 = dma.done.wait [#allocation16], 10240  }
  0xa1   :  { %8233 = vsyncadd [#allocation16], 4294957056  ;;  %v10056_v0 = vmov 0.0   ;;  %v8252_v1 = vmov 1983009808   ;;  %v260_v3 = vlaneseq  ;;  %v169_v8 = vld [vmem:[#allocation6 + $0x18] sm:$0xff] }
  0xa2   :  { %614 = vmatprep.mubr.f32.mxu1 %v10056_v0  ;;  %501 = vmatprep.mubr.f32.mxu0 %v10056_v0  ;;  %v258_v2 = vunpack.c.l.s4 %v8252_v1  ;;  %v8253_v6 = vmov 1934713408   ;;  %v173_v9 = vld [vmem:[#allocation6 + $0x38] sm:$0xff]  ;;  %v168_v10 = vld [vmem:[#allocation6 + $0x10] sm:$0xff]  ;;  %v183_v26 = vld [vmem:[#allocation8 + $0x8] sm:$0xff]  ;;  %vm412_vm0 = vcmask 261120  }
  0xa3   :  { %v8465_v5 = vshrl.u32 %v260_v3, 7  ;;  %v322_v7 = vunpack.c.l.s4 %v8253_v6  ;;  %v5816_v11 = vpack.c.bf16 %v173_v9, %v169_v8  ;;  %v172_v12 = vld [vmem:[#allocation6 + $0x30] sm:$0xff]  ;;  %v177_v13 = vld [vmem:[#allocation6 + $0x58] sm:$0xff]  ;;  %v187_v30 = vld [vmem:[#allocation8 + $0x28] sm:$0xff]  ;;  %s8255_s26 = smov [#allocation19]  }
  0xa4   :  { %v259_v4 = vunpack.c.0.s8 %v258_v2  ;;  %v181_v14 = vld [vmem:[#allocation6 + $0x78] sm:$0xff]  ;;  %v5818_v15 = vpack.c.bf16 %v172_v12, %v168_v10  ;;  %v176_v17 = vld [vmem:[#allocation6 + $0x50] sm:$0xff]  ;;  %v8477_v33 = vpack.c.bf16 %v187_v30, %v183_v26  ;;  %v182_v36 = vld [vmem:[#allocation8] sm:$0xff]  ;;  %s5701_s27 = sshll.u32 %s8255_s26, 4  ;;  %s9960_s27 = int_to_ptr.vmem [resolvable:$true] %s5701_s27 }
  0xa5   :  { %v5820_v16 = vpack.c.bf16 %v181_v14, %v177_v13  ;;  %v180_v18 = vld [vmem:[#allocation6 + $0x70] sm:$0xff]  ;;  %5817 = vmatprep.subr.bf16.mxu1 %v5816_v11  ;;  %v323_v20 = vunpack.c.0.s8 %v322_v7  ;;  %v7732_v23 = vld [vmem:[#allocation3 + $0x8] ss:$16 sps:$4 sm:$0xff]   ;;  %v186_v37 = vld [vmem:[#allocation8 + $0x20] sm:$0xff] }
  0xa6   :  { %v8468_v19 = vsub.s32 %v259_v4, %v8465_v5  ;;  %5819 = vmatpush1.bf16.msra.mxu1 %v5818_v15  ;;  %v5822_v21 = vpack.c.bf16 %v180_v18, %v176_v17  ;;  %v7730_v22 = vld [vmem:[#allocation3] ss:$16 sps:$4 sm:$0xff]   ;;  %v7736_v25 = vld [vmem:[#allocation3 + $0x28] ss:$16 sps:$4 sm:$0xff]   ;;  %v7738_v44 = vld [vmem:[#allocation3 + $0x4] ss:$16 sps:$4 sm:$0xff]   ;;  %v8482_v47 = vpack.c.bf16 %v186_v37, %v182_v36 }
  0xa7   :  { %5821 = vmatprep.subr.bf16.mxu1 %v5820_v16  ;;  %v7734_v24 = vld [vmem:[#allocation3 + $0x20] ss:$16 sps:$4 sm:$0xff]   ;;  %v8473_v29 = vsub.s32 %v323_v20, %v8465_v5  ;;  %v191_v39 = vld [vmem:[#allocation8 + $0x48] sm:$0xff]  ;;  %v7740_v46 = vld [vmem:[#allocation3 + $0x24] ss:$16 sps:$4 sm:$0xff]  }
  0xa8   :  { %10062 = vst [vmem:[#allocation28_spill] sm:$0xff] %v8468_v19  ;;  %v263_v27 = vrot.slane %v7730_v22, %v8468_v19  ;;  %v279_v28 = vrot.slane %v7732_v23, %v8468_v19  ;;  %v295_v31 = vrot.slane %v7734_v24, %v8468_v19  ;;  %v311_v32 = vrot.slane %v7736_v25, %v8468_v19  ;;  %v195_v40 = vld [vmem:[#allocation8 + $0x68] sm:$0xff]  ;;  %v190_v51 = vld [vmem:[#allocation8 + $0x40] sm:$0xff] }
  0xa9   :  { %10063 = vst [vmem:[#allocation29_spill] sm:$0xff] %v8473_v29  ;;  %v7739_v45 = vld [vmem:[#allocation3 + $0xc] ss:$16 sps:$4 sm:$0xff]   ;;  %v8486_v50 = vpack.c.bf16 %v195_v40, %v191_v39  ;;  %v194_v52 = vld [vmem:[#allocation8 + $0x60] sm:$0xff]  ;;  %v8495_v58 = vrot.slane %v7738_v44, %v8468_v19  ;;  %v8501_v60 = vrot.slane %v7740_v46, %v8468_v19 }
  0xaa   :  { %5823 = vmatpush1.bf16.msra.mxu1 %v5822_v21  ;;  %v319_v34 = vcombine.low %v263_v27, %v279_v28  ;;  %v351_v35 = vcombine.low %v295_v31, %v311_v32  ;;  %v320_v41 = vcombine.high %v263_v27, %v279_v28  ;;  %v352_v42 = vcombine.high %v295_v31, %v311_v32  ;;  %v7741_v48 = vld [vmem:[#allocation3 + $0x2c] ss:$16 sps:$4 sm:$0xff]   ;;  %v166_v1 = vld [vmem:[#allocation6] sm:$0xff] }
  0xab   :  { %5825 = vmatprep.subr.bf16.mxu1 %v8477_v33  ;;  %v199_v56 = vld [vmem:[#allocation8 + $0x88] sm:$0xff]  ;;  %v8498_v59 = vrot.slane %v7739_v45, %v8468_v19  ;;  %v8504_v61 = vrot.slane %v7741_v48, %v8468_v19  ;;  %v8508_v2 = vpack.c.bf16 %v194_v52, %v190_v51  ;;  %v198_v3 = vld [vmem:[#allocation8 + $0x80] sm:$0xff] }
  0xac   :  { %v327_v38 = vrot.slane %v319_v34, %v8473_v29  ;;  %v359_v43 = vrot.slane %v351_v35, %v8473_v29  ;;  %v334_v54 = vrot.slane %v320_v41, %v8473_v29  ;;  %v366_v55 = vrot.slane %v352_v42, %v8473_v29  ;;  %v203_v57 = vld [vmem:[#allocation8 + $0xa8] sm:$0xff]  ;;  %v202_v4 = vld [vmem:[#allocation8 + $0xa0] sm:$0xff] }
  0xad   :  { %v167_v62 = vld [vmem:[#allocation6 + $0x8] sm:$0xff]  ;;  %v170_v7 = vld [vmem:[#allocation6 + $0x20] sm:$0xff]  ;;  %v8511_v8 = vpack.c.bf16 %v203_v57, %v199_v56  ;;  %v335_v17 = vcombine.low %v8495_v58, %v8498_v59  ;;  %v367_v18 = vcombine.low %v8501_v60, %v8504_v61  ;;  %v8523_v21 = vpack.c.bf16 %v202_v4, %v198_v3  ;;  %v189_v3 = vld [vmem:[#allocation8 + $0x38] sm:$0xff] }
  0xae   :  { %v8484_v49 = vcombine.low %v327_v38, %v359_v43  ;;  %v8488_v53 = vcombine.high %v327_v38, %v359_v43  ;;  %v171_v63 = vld [vmem:[#allocation6 + $0x28] sm:$0xff]  ;;  %v5810_v11 = vpack.c.bf16 %v170_v7, %v166_v1  ;;  %v8513_v13 = vcombine.low %v334_v54, %v366_v55  ;;  %v174_v15 = vld [vmem:[#allocation6 + $0x40] sm:$0xff]  ;;  %v185_v1 = vld [vmem:[#allocation8 + $0x18] sm:$0xff] }
  0xaf   :  { %v5808_v6 = vpack.c.bf16 %v171_v63, %v167_v62  ;;  %v207_v9 = vld [vmem:[#allocation8 + $0xc8] sm:$0xff]  ;;  %v178_v16 = vld [vmem:[#allocation6 + $0x60] sm:$0xff]  ;;  %v8530_v28 = vcombine.high %v334_v54, %v366_v55  ;;  %v343_v30 = vrot.slane %v335_v17, %v8473_v29  ;;  %v375_v31 = vrot.slane %v367_v18, %v8473_v29  ;;  %v201_v17 = vld [vmem:[#allocation8 + $0x98] sm:$0xff] }
  0xb0   :  { %5731 = vmatmul.mubr.msk.f32.vlgmr.msra.gmra.mrb[0].mxu1 %vm412_vm0, %v8484_v49  ;;  %v211_v10 = vld [vmem:[#allocation8 + $0xe8] sm:$0xff]  ;;  %v5814_v22 = vpack.c.bf16 %v178_v16, %v174_v15  ;;  %v206_v24 = vld [vmem:[#allocation8 + $0xc0] sm:$0xff]  ;;  %v336_v40 = vcombine.high %v8495_v58, %v8498_v59  ;;  %v368_v41 = vcombine.high %v8501_v60, %v8504_v61  ;;  %v8597_v7 = vpack.c.bf16 %v189_v3, %v185_v1  ;;  %v192_v15 = vld [vmem:[#allocation8 + $0x50] sm:$0xff] }
  0xb1   :  { %5827 = vmatpush1.bf16.msra.mxu1 %v8482_v47  ;;  %620 = vmatprep.mubr.f32.mxu1 %v10056_v0  ;;  %v175_v12 = vld [vmem:[#allocation6 + $0x48] sm:$0xff]  ;;  %v8526_v23 = vpack.c.bf16 %v211_v10, %v207_v9  ;;  %v210_v25 = vld [vmem:[#allocation8 + $0xe0] sm:$0xff]  ;;  %v387_v39 = vcombine.low %v343_v30, %v375_v31  ;;  %v184_v9 = vld [vmem:[#allocation8 + $0x10] sm:$0xff] }
  0xb2   :  { %5829 = vmatprep.subr.bf16.mxu1 %v8486_v50  ;;  %5809 = vmatprep.subr.bf16.mxu0 %v5808_v6  ;;  %v179_v14 = vld [vmem:[#allocation6 + $0x68] sm:$0xff]  ;;  %v8536_v32 = vpack.c.bf16 %v210_v25, %v206_v24  ;;  %v214_v35 = vld [vmem:[#allocation8 + $0x100] sm:$0xff]  ;;  %v350_v51 = vrot.slane %v336_v40, %v8473_v29  ;;  %v382_v52 = vrot.slane %v368_v41, %v8473_v29  ;;  %v188_v10 = vld [vmem:[#allocation8 + $0x30] sm:$0xff] }
  0xb3   :  { %5811 = vmatpush1.bf16.msra.mxu0 %v5810_v11  ;;  %v5812_v20 = vpack.c.bf16 %v179_v14, %v175_v12  ;;  %v215_v26 = vld [vmem:[#allocation8 + $0x108] sm:$0xff]  ;;  %v218_v36 = vld [vmem:[#allocation8 + $0x120] sm:$0xff]  ;;  %v193_v11 = vld [vmem:[#allocation8 + $0x58] sm:$0xff] }
  0xb4   :  { %5732 = vmatmul.mubr.msk.f32.gmra.mrb[2].mxu1 %vm412_vm0, %v8488_v53  ;;  %v219_v27 = vld [vmem:[#allocation8 + $0x128] sm:$0xff]  ;;  %v8553_v42 = vpack.c.bf16 %v218_v36, %v214_v35  ;;  %v222_v44 = vld [vmem:[#allocation8 + $0x140] sm:$0xff]  ;;  %v389_v59 = vcombine.low %v350_v51, %v382_v52  ;;  %v390_v4 = vcombine.high %v350_v51, %v382_v52  ;;  %v197_v12 = vld [vmem:[#allocation8 + $0x78] sm:$0xff] }
  0xb5   :  { %5831 = vmatpush1.bf16.msra.mxu1 %v8508_v2  ;;  %626 = vmatprep.mubr.f32.mxu1 %v10056_v0  ;;  %v8539_v34 = vpack.c.bf16 %v219_v27, %v215_v26  ;;  %v223_v37 = vld [vmem:[#allocation8 + $0x148] sm:$0xff]  ;;  %v226_v45 = vld [vmem:[#allocation8 + $0x160] sm:$0xff]  ;;  %v8609_v14 = vpack.c.bf16 %v197_v12, %v193_v11  ;;  %v196_v16 = vld [vmem:[#allocation8 + $0x70] sm:$0xff] }
  0xb6   :  { %5833 = vmatprep.subr.bf16.mxu1 %v8511_v8  ;;  %5813 = vmatprep.subr.bf16.mxu0 %v5812_v20  ;;  %v227_v38 = vld [vmem:[#allocation8 + $0x168] sm:$0xff]  ;;  %v8568_v54 = vpack.c.bf16 %v226_v45, %v222_v44  ;;  %v234_v56 = vld [vmem:[#allocation8 + $0x1a0] sm:$0xff]  ;;  %v205_v18 = vld [vmem:[#allocation8 + $0xb8] sm:$0xff]  ;;  %v8617_v20 = vpack.c.bf16 %v196_v16, %v192_v15  ;;  %v8688_v15 = vsub.s32 0, %v8465_v5 }
  0xb7   :  { %5815 = vmatpush1.bf16.msra.mxu0 %v5814_v22  ;;  %v8556_v43 = vpack.c.bf16 %v227_v38, %v223_v37  ;;  %v231_v46 = vld [vmem:[#allocation8 + $0x188] sm:$0xff]  ;;  %v238_v62 = vld [vmem:[#allocation8 + $0x1c0] sm:$0xff]  ;;  %v8621_v22 = vpack.c.bf16 %v205_v18, %v201_v17  ;;  %v200_v24 = vld [vmem:[#allocation8 + $0x90] sm:$0xff]  ;;  %v8691_v17 = vsub.s32 1, %v8465_v5 }
  0xb8   :  { %5733 = vmatmul.mubr.msk.f32.gmra.mrb[4].mxu1 %vm412_vm0, %v8513_v13  ;;  %5889 = vmatprep.subr.bf16.mxu0 %v8477_v33  ;;  %v235_v48 = vld [vmem:[#allocation8 + $0x1a8] sm:$0xff]  ;;  %v242_v63 = vld [vmem:[#allocation8 + $0x1e0] sm:$0xff]  ;;  %v204_v25 = vld [vmem:[#allocation8 + $0xb0] sm:$0xff] }
  0xb9   :  { %5835 = vmatpush1.bf16.msra.mxu1 %v8523_v21  ;;  %632 = vmatprep.mubr.f32.mxu1 %v10056_v0  ;;  %v8571_v55 = vpack.c.bf16 %v235_v48, %v231_v46  ;;  %v239_v57 = vld [vmem:[#allocation8 + $0x1c8] sm:$0xff]  ;;  %v8594_v6 = vpack.c.bf16 %v242_v63, %v238_v62  ;;  %v209_v26 = vld [vmem:[#allocation8 + $0xd8] sm:$0xff]  ;;  %v212_v35 = vld [vmem:[#allocation8 + $0xf0] sm:$0xff] }
  0xba   :  { %5837 = vmatprep.subr.bf16.mxu1 %v8526_v23  ;;  %5723 = vmatmul.mubr.msk.f32.vlgmr.msra.gmra.mrb[0].mxu0 %vm412_vm0, %v8484_v49  ;;  %v388_v49 = vcombine.high %v343_v30, %v375_v31  ;;  %v243_v58 = vld [vmem:[#allocation8 + $0x1e8] sm:$0xff]  ;;  %v213_v27 = vld [vmem:[#allocation8 + $0xf8] sm:$0xff]  ;;  %v208_v31 = vld [vmem:[#allocation8 + $0xd0] sm:$0xff] }
  0xbb   :  { %5891 = vmatpush1.bf16.msra.mxu0 %v8482_v47  ;;  %507 = vmatprep.mubr.f32.mxu0 %v10056_v0  ;;  %v8584_v61 = vpack.c.bf16 %v243_v58, %v239_v57  ;;  %v8633_v30 = vpack.c.bf16 %v213_v27, %v209_v26  ;;  %v217_v36 = vld [vmem:[#allocation8 + $0x118] sm:$0xff]  ;;  %v8639_v38 = vpack.c.bf16 %v212_v35, %v208_v31  ;;  %v216_v40 = vld [vmem:[#allocation8 + $0x110] sm:$0xff]  ;;  %v246_v16 = vld [vmem:[#allocation9] sm:$0xf] }
  0xbc   :  { %5734 = vmatmul.mubr.msk.f32.gmra.mrb[6].mxu1 %vm412_vm0, %v8530_v28  ;;  %5893 = vmatprep.subr.bf16.mxu0 %v8486_v50  ;;  %v221_v37 = vld [vmem:[#allocation8 + $0x138] sm:$0xff]  ;;  %v220_v41 = vld [vmem:[#allocation8 + $0x130] sm:$0xff]  ;;  %v8694_v18 = vrot.slane %v246_v16, %v8688_v15 }
  0xbd   :  { %5839 = vmatpush1.bf16.msra.mxu1 %v8536_v32  ;;  %638 = vmatprep.mubr.f32.mxu1 %v10056_v0  ;;  %v225_v44 = vld [vmem:[#allocation8 + $0x158] sm:$0xff]  ;;  %v8646_v46 = vpack.c.bf16 %v220_v41, %v216_v40  ;;  %v228_v51 = vld [vmem:[#allocation8 + $0x170] sm:$0xff]  ;;  %v8702_v41 = vsub.s32 2, %v8465_v5 }
  0xbe   :  { %5841 = vmatprep.subr.bf16.mxu1 %v8539_v34  ;;  %5724 = vmatmul.mubr.msk.f32.gmra.mrb[2].mxu0 %vm412_vm0, %v8488_v53  ;;  %v230_v53 = vld [vmem:[#allocation8 + $0x180] sm:$0xff]  ;;  %v229_v45 = vld [vmem:[#allocation8 + $0x178] sm:$0xff]  ;;  %v232_v58 = vld [vmem:[#allocation8 + $0x190] sm:$0xff] }
  0xbf   :  { %5895 = vmatpush1.bf16.msra.mxu0 %v8508_v2  ;;  %513 = vmatprep.mubr.f32.mxu0 %v10056_v0  ;;  %v8581_v60 = vpack.c.bf16 %v234_v56, %v230_v53  ;;  %v8649_v48 = vpack.c.bf16 %v229_v45, %v225_v44  ;;  %v233_v52 = vld [vmem:[#allocation8 + $0x198] sm:$0xff]  ;;  %v8705_v44 = vsub.s32 3, %v8465_v5  ;;  %v8708_v45 = vrot.slane %v246_v16, %v8702_v41 }
  0xc0   :  { %5735 = vmatmul.mubr.msk.f32.gmra.mrb[8].mxu1 %vm412_vm0, %v387_v39  ;;  %5897 = vmatprep.subr.bf16.mxu0 %v8511_v8  ;;  %v237_v53 = vld [vmem:[#allocation8 + $0x1b8] sm:$0xff] }
  0xc1   :  { %5843 = vmatpush1.bf16.msra.mxu1 %v8553_v42  ;;  %644 = vmatprep.mubr.f32.mxu1 %v10056_v0  ;;  %v8655_v57 = vpack.c.bf16 %v237_v53, %v233_v52  ;;  %v241_v62 = vld [vmem:[#allocation8 + $0x1d8] sm:$0xff] }
  0xc2   :  { %5845 = vmatprep.subr.bf16.mxu1 %v8556_v43  ;;  %5725 = vmatmul.mubr.msk.f32.gmra.mrb[4].mxu0 %vm412_vm0, %v8513_v13  ;;  %v8606_v13 = vpack.c.bf16 %v188_v10, %v184_v9  ;;  %v245_v63 = vld [vmem:[#allocation8 + $0x1f8] sm:$0xff]  ;;  %v244_v9 = vld [vmem:[#allocation8 + $0x1f0] sm:$0xff] }
  0xc3   :  { %5899 = vmatpush1.bf16.msra.mxu0 %v8523_v21  ;;  %519 = vmatprep.mubr.f32.mxu0 %v10056_v0  ;;  %v8661_v3 = vpack.c.bf16 %v245_v63, %v241_v62 }
  0xc4   :  { %5736 = vmatmul.mubr.msk.f32.gmra.mrb[10].mxu1 %vm412_vm0, %v388_v49  ;;  %5901 = vmatprep.subr.bf16.mxu0 %v8526_v23 }
  0xc5   :  { %5847 = vmatpush1.bf16.msra.mxu1 %v8568_v54  ;;  %650 = vmatprep.mubr.f32.mxu1 %v10056_v0 }
  0xc6   :  { %5849 = vmatprep.subr.bf16.mxu1 %v8571_v55  ;;  %5726 = vmatmul.mubr.msk.f32.gmra.mrb[6].mxu0 %vm412_vm0, %v8530_v28  ;;  %v8629_v28 = vpack.c.bf16 %v204_v25, %v200_v24  ;;  %v8697_v24 = vrot.slane %v246_v16, %v8691_v17 }
  0xc7   :  { %5903 = vmatpush1.bf16.msra.mxu0 %v8536_v32  ;;  %525 = vmatprep.mubr.f32.mxu0 %v10056_v0 }
  0xc8   :  { %5737 = vmatmul.mubr.msk.f32.gmra.mrb[12].mxu1 %vm412_vm0, %v389_v59  ;;  %5905 = vmatprep.subr.bf16.mxu0 %v8539_v34 }
  0xc9   :  { %5851 = vmatpush1.bf16.msra.mxu1 %v8581_v60  ;;  %656 = vmatprep.mubr.f32.mxu1 %v10056_v0 }
  0xca   :  { %5853 = vmatprep.subr.bf16.mxu1 %v8584_v61  ;;  %5727 = vmatmul.mubr.msk.f32.gmra.mrb[8].mxu0 %vm412_vm0, %v387_v39  ;;  %v8643_v39 = vpack.c.bf16 %v221_v37, %v217_v36 }
  0xcb   :  { %5907 = vmatpush1.bf16.msra.mxu0 %v8553_v42  ;;  %531 = vmatprep.mubr.f32.mxu0 %v10056_v0 }
  0xcc   :  { %5738 = vmatmul.mubr.msk.f32.gmra.mrb[14].mxu1 %vm412_vm0, %v390_v4  ;;  %5909 = vmatprep.subr.bf16.mxu0 %v8556_v43 }
  0xcd   :  { %5855 = vmatpush1.bf16.msra.mxu1 %v8594_v6  ;;  %727 = vmatprep.mubr.f32.mxu1 %v10056_v0 }
  0xce   :  { %5857 = vmatprep.subr.bf16.mxu1 %v8597_v7  ;;  %5728 = vmatmul.mubr.msk.f32.gmra.mrb[10].mxu0 %vm412_vm0, %v388_v49  ;;  %v224_v49 = vld [vmem:[#allocation8 + $0x150] sm:$0xff] }
  0xcf   :  { %5911 = vmatpush1.bf16.msra.mxu0 %v8568_v54  ;;  %537 = vmatprep.mubr.f32.mxu0 %v10056_v0  ;;  %v8652_v56 = vpack.c.bf16 %v228_v51, %v224_v49  ;;  %v8711_v49 = vrot.slane %v246_v16, %v8705_v44 }
  0xd0   :  { %728 = vmatmul.mubr.f32.vlgmr.msra.gmra.mrb[16].mxu1 %v10056_v0  ;;  %5913 = vmatprep.subr.bf16.mxu0 %v8571_v55 }
  0xd1   :  { %5859 = vmatpush1.bf16.msra.mxu1 %v8606_v13  ;;  %798 = vmatprep.mubr.f32.mxu1 %v10056_v0 }
  0xd2   :  { %5861 = vmatprep.subr.bf16.mxu1 %v8609_v14  ;;  %5729 = vmatmul.mubr.msk.f32.gmra.mrb[12].mxu0 %vm412_vm0, %v389_v59  ;;  %v236_v59 = vld [vmem:[#allocation8 + $0x1b0] sm:$0xff] }
  0xd3   :  { %5915 = vmatpush1.bf16.msra.mxu0 %v8581_v60  ;;  %543 = vmatprep.mubr.f32.mxu0 %v10056_v0  ;;  %v8658_v1 = vpack.c.bf16 %v236_v59, %v232_v58 }
  0xd4   :  { %5917 = vmatprep.subr.bf16.mxu0 %v8584_v61 }
  0xd5   :  { %5863 = vmatpush1.bf16.msra.mxu1 %v8617_v20 }
  0xd6   :  { %5865 = vmatprep.subr.bf16.mxu1 %v8621_v22  ;;  %5730 = vmatmul.mubr.msk.f32.gmra.mrb[14].mxu0 %vm412_vm0, %v390_v4  ;;  %v240_v4 = vld [vmem:[#allocation8 + $0x1d0] sm:$0xff] }
  0xd7   :  { %5919 = vmatpush1.bf16.msra.mxu0 %v8594_v6  ;;  %892 = vmatprep.mubr.f32.mxu0 %v10056_v0  ;;  %v8664_v10 = vpack.c.bf16 %v244_v9, %v240_v4 }
  0xd8   :  { %5953 = vmatprep.subr.bf16.mxu0 %v8477_v33 }
  0xd9   :  { %5867 = vmatpush1.bf16.msra.mxu1 %v8629_v28 }
  0xda   :  { %5869 = vmatprep.subr.bf16.mxu1 %v8633_v30 }
  0xdd   :  { %5871 = vmatpush1.bf16.msra.mxu1 %v8639_v38 }
  0xde   :  { %5873 = vmatprep.subr.bf16.mxu1 %v8643_v39 }
  0xe1   :  { %5875 = vmatpush1.bf16.msra.mxu1 %v8646_v46 }
  0xe2   :  { %5877 = vmatprep.subr.bf16.mxu1 %v8649_v48 }
  0xe5   :  { %5879 = vmatpush1.bf16.msra.mxu1 %v8652_v56 }
  0xe6   :  { %5881 = vmatprep.subr.bf16.mxu1 %v8655_v57 }
  0xe9   :  { %5883 = vmatpush1.bf16.msra.mxu1 %v8658_v1 }
  0xea   :  { %5885 = vmatprep.subr.bf16.mxu1 %v8661_v3 }
  0xed   :  { %5887 = vmatpush1.bf16.msra.mxu1 %v8664_v10 }
  0xee   :  { %5921 = vmatprep.subr.bf16.mxu1 %v8597_v7 }
  0xf0   :  { %799 = vmatmul.mubr.f32.vlgmr.msra.gmra.mrb[0].mxu1 %v10056_v0 }
  0xf1   :  { %5923 = vmatpush1.bf16.msra.mxu1 %v8606_v13  ;;  %963 = vmatprep.mubr.f32.mxu1 %v10056_v0 }
  0xf2   :  { %5925 = vmatprep.subr.bf16.mxu1 %v8609_v14 }
  0xf5   :  { %5927 = vmatpush1.bf16.msra.mxu1 %v8617_v20 }
  0xf6   :  { %5929 = vmatprep.subr.bf16.mxu1 %v8621_v22 }
  0xf9   :  { %5931 = vmatpush1.bf16.msra.mxu1 %v8629_v28 }
  0xfa   :  { %5933 = vmatprep.subr.bf16.mxu1 %v8633_v30 }
  0xfd   :  { %5935 = vmatpush1.bf16.msra.mxu1 %v8639_v38 }
  0xfe   :  { %5937 = vmatprep.subr.bf16.mxu1 %v8643_v39 }
 0x101   :  { %5939 = vmatpush1.bf16.msra.mxu1 %v8646_v46 }
 0x102   :  { %5941 = vmatprep.subr.bf16.mxu1 %v8649_v48 }
 0x105   :  { %5943 = vmatpush1.bf16.msra.mxu1 %v8652_v56 }
 0x106   :  { %5945 = vmatprep.subr.bf16.mxu1 %v8655_v57 }
 0x109   :  { %5947 = vmatpush1.bf16.msra.mxu1 %v8658_v1 }
 0x10a   :  { %5949 = vmatprep.subr.bf16.mxu1 %v8661_v3 }
 0x10d   :  { %5951 = vmatpush1.bf16.msra.mxu1 %v8664_v10 }
 0x10e   :  { %5985 = vmatprep.subr.bf16.mxu1 %v8597_v7 }
 0x18d   :  { %v503_v11 = vpop.f32.mrb[0].mxu0 }
 0x18e   :  { %v505_v12 = vpop.f32.mrb[1].mxu0  ;;  %v504_v25 = vadd.f32 %v503_v11, %v8694_v18 }
 0x18f   :  { %v506_v26 = vadd.f32 %v505_v12, %v8697_v24 }
 0x1a3   :  { %v729_v27 = vpop.f32.mrb[16].mxu1 }
 0x1a4   :  { %v805_v31 = vadd.f32 %v729_v27, %v504_v25  ;;  %v731_v35 = vpop.f32.mrb[17].mxu1 }
 0x1a5   :  { %v806_v36 = vadd.f32 %v731_v35, %v506_v26 }
 0x1a6   :  { %v809_v40 = vmul.f32 0.5, %v805_v31 }
 0x1a7   :  { %v813_v37 = vmul.f32 0.5, %v806_v36 }
 0x1a9   :  { %7742 = vtanh.f32 %v813_v37 }
 0x1aa   :  { %7744 = vtanh.f32 %v809_v40 }
 0x1b3   :  { %v7743_v59 = vpop.eup %7742 }
 0x1b4   :  { %v7745_v62 = vpop.eup %7744  ;;  %v815_v63 = vmul.f32 0.5, %v7743_v59 }
 0x1b5   :  { %v811_v5 = vmul.f32 0.5, %v7745_v62 }
 0x1b6   :  { %v816_v9 = vadd.f32 0.5, %v815_v63 }
 0x1b7   :  { %v812_v11 = vadd.f32 0.5, %v811_v5 }
 0x1b8   :  { %v822_v25 = vmul.f32 0.0, %v816_v9 }
 0x1c3   :  { %v800_v51 = vpop.f32.mrb[0].mxu1 }
 0x1c4   :  { %v7538_v52 = vadd.f32 %v800_v51, %v8708_v45  ;;  %v802_v53 = vpop.f32.mrb[1].mxu1 }
 0x1c5   :  { %v7539_v58 = vadd.f32 %v802_v53, %v8711_v49 }
 0x1c6   :  { %7746 = vtanh.f32 %v7538_v52 }
 0x1c7   :  { %v818_v4 = vmul.f32 0.5, %v7539_v58 }
 0x1c9   :  { %7748 = vtanh.f32 %v818_v4 }
 0x1d0   :  { %v7747_v12 = vpop.eup %7746 }
 0x1d1   :  { %v823_v26 = vmul.f32 %v7747_v12, %v812_v11 }
 0x1d3   :  { %v8715_v16 = vadd.f32 %v823_v26, %v822_v25  ;;  %v7749_v27 = vpop.eup %7748 }
 0x1d4   :  { %v820_v31 = vmul.f32 0.5, %v7749_v27 }
 0x1d5   :  { %7750 = vtanh.f32 %v8715_v16 }
 0x1d6   :  { %v821_v35 = vadd.f32 0.5, %v820_v31 }
 0x1df   :  { %v7751_v36 = vpop.eup %7750 }
 0x1e0   :  { %v8718_v37 = vmul.f32 %v7751_v36, %v821_v35 }
 0x1e2   :  { %893 = vmatmul.mubr.f32.vlgmr.msra.gmra.mrb[2].mxu0 %v8718_v37  ;;  %964 = vmatmul.mubr.f32.vlgmr.msra.gmra.mrb[2].mxu1 %v8718_v37 }
 0x1e3   :  { %5955 = vmatpush1.bf16.msra.mxu0 %v8482_v47  ;;  %5987 = vmatpush1.bf16.msra.mxu1 %v8606_v13 }
 0x1e4   :  { %5957 = vmatprep.subr.bf16.mxu0 %v8486_v50  ;;  %5989 = vmatprep.subr.bf16.mxu1 %v8609_v14 }
 0x1e5   :  { %1057 = vmatprep.mubr.f32.mxu0 %v10056_v0  ;;  %1128 = vmatprep.mubr.f32.mxu1 %v10056_v0 }
 0x1e7   :  { %5959 = vmatpush1.bf16.msra.mxu0 %v8508_v2  ;;  %5991 = vmatpush1.bf16.msra.mxu1 %v8617_v20 }
 0x1e8   :  { %5961 = vmatprep.subr.bf16.mxu0 %v8511_v8  ;;  %5993 = vmatprep.subr.bf16.mxu1 %v8621_v22 }
 0x1eb   :  { %5963 = vmatpush1.bf16.msra.mxu0 %v8523_v21  ;;  %5995 = vmatpush1.bf16.msra.mxu1 %v8629_v28 }
 0x1ec   :  { %5965 = vmatprep.subr.bf16.mxu0 %v8526_v23  ;;  %5997 = vmatprep.subr.bf16.mxu1 %v8633_v30 }
 0x1ef   :  { %5967 = vmatpush1.bf16.msra.mxu0 %v8536_v32  ;;  %5999 = vmatpush1.bf16.msra.mxu1 %v8639_v38 }
 0x1f0   :  { %5969 = vmatprep.subr.bf16.mxu0 %v8539_v34  ;;  %6001 = vmatprep.subr.bf16.mxu1 %v8643_v39 }
 0x1f3   :  { %5971 = vmatpush1.bf16.msra.mxu0 %v8553_v42  ;;  %6003 = vmatpush1.bf16.msra.mxu1 %v8646_v46 }
 0x1f4   :  { %5973 = vmatprep.subr.bf16.mxu0 %v8556_v43  ;;  %6005 = vmatprep.subr.bf16.mxu1 %v8649_v48 }
 0x1f7   :  { %5975 = vmatpush1.bf16.msra.mxu0 %v8568_v54  ;;  %6007 = vmatpush1.bf16.msra.mxu1 %v8652_v56 }
 0x1f8   :  { %5977 = vmatprep.subr.bf16.mxu0 %v8571_v55  ;;  %6009 = vmatprep.subr.bf16.mxu1 %v8655_v57 }
 0x1fb   :  { %5979 = vmatpush1.bf16.msra.mxu0 %v8581_v60  ;;  %6011 = vmatpush1.bf16.msra.mxu1 %v8658_v1 }
 0x1fc   :  { %5981 = vmatprep.subr.bf16.mxu0 %v8584_v61  ;;  %6013 = vmatprep.subr.bf16.mxu1 %v8661_v3 }
 0x1ff   :  { %5983 = vmatpush1.bf16.msra.mxu0 %v8594_v6  ;;  %6015 = vmatpush1.bf16.msra.mxu1 %v8664_v10 }
 0x200   :  { %6017 = vmatprep.subr.bf16.mxu0 %v8477_v33  ;;  %6049 = vmatprep.subr.bf16.mxu1 %v8597_v7 }
 0x2b5   :  { %v894_v40 = vpop.f32.mrb[2].mxu0  ;;  %v965_v51 = vpop.f32.mrb[2].mxu1 }
 0x2b6   :  { %v7524_v52 = vadd.f32 %v894_v40, %v8694_v18  ;;  %v896_v53 = vpop.f32.mrb[3].mxu0  ;;  %v967_v58 = vpop.f32.mrb[3].mxu1  ;;  %v7540_v4 = vadd.f32 %v965_v51, %v8708_v45 }
 0x2b7   :  { %v7525_v59 = vadd.f32 %v896_v53, %v8697_v24  ;;  %v7541_v5 = vadd.f32 %v967_v58, %v8711_v49 }
 0x2b8   :  { %v974_v62 = vmul.f32 0.5, %v7524_v52 }
 0x2b9   :  { %v978_v63 = vmul.f32 0.5, %v7525_v59  ;;  %v983_v9 = vmul.f32 0.5, %v7541_v5 }
 0x2ba   :  { %7752 = vtanh.f32 %v974_v62 }
 0x2bb   :  { %7754 = vtanh.f32 %v978_v63 }
 0x2bc   :  { %7756 = vtanh.f32 %v7540_v4 }
 0x2bd   :  { %7758 = vtanh.f32 %v983_v9 }
 0x2c4   :  { %v7753_v11 = vpop.eup %7752 }
 0x2c5   :  { %v7755_v12 = vpop.eup %7754  ;;  %v976_v25 = vmul.f32 0.5, %v7753_v11 }
 0x2c6   :  { %v980_v26 = vmul.f32 0.5, %v7755_v12  ;;  %v7757_v31 = vpop.eup %7756 }
 0x2c7   :  { %v977_v27 = vadd.f32 0.5, %v976_v25  ;;  %v7759_v51 = vpop.eup %7758 }
 0x2c8   :  { %v981_v35 = vadd.f32 0.5, %v980_v26  ;;  %v985_v53 = vmul.f32 0.5, %v7759_v51 }
 0x2c9   :  { %v988_v36 = vmul.f32 %v7757_v31, %v977_v27 }
 0x2ca   :  { %v987_v40 = vmul.f32 %v981_v35, %v8715_v16  ;;  %v986_v59 = vadd.f32 0.5, %v985_v53 }
 0x2cc   :  { %v8761_v52 = vadd.f32 %v988_v36, %v987_v40 }
 0x2ce   :  { %7760 = vtanh.f32 %v8761_v52 }
 0x2d8   :  { %v7761_v58 = vpop.eup %7760 }
 0x2d9   :  { %v8764_v62 = vmul.f32 %v7761_v58, %v986_v59 }
 0x2db   :  { %1058 = vmatmul.mubr.f32.vlgmr.msra.gmra.mrb[4].mxu0 %v8764_v62  ;;  %1129 = vmatmul.mubr.f32.vlgmr.msra.gmra.mrb[4].mxu1 %v8764_v62 }
 0x2dc   :  { %6019 = vmatpush1.bf16.msra.mxu0 %v8482_v47  ;;  %6051 = vmatpush1.bf16.msra.mxu1 %v8606_v13 }
 0x2dd   :  { %6021 = vmatprep.subr.bf16.mxu0 %v8486_v50  ;;  %6053 = vmatprep.subr.bf16.mxu1 %v8609_v14 }
 0x2de   :  { %1222 = vmatprep.mubr.f32.mxu0 %v10056_v0  ;;  %1293 = vmatprep.mubr.f32.mxu1 %v10056_v0 }
 0x2e0   :  { %6023 = vmatpush1.bf16.msra.mxu0 %v8508_v2  ;;  %6055 = vmatpush1.bf16.msra.mxu1 %v8617_v20 }
 0x2e1   :  { %6025 = vmatprep.subr.bf16.mxu0 %v8511_v8  ;;  %6057 = vmatprep.subr.bf16.mxu1 %v8621_v22 }
 0x2e4   :  { %6027 = vmatpush1.bf16.msra.mxu0 %v8523_v21  ;;  %6059 = vmatpush1.bf16.msra.mxu1 %v8629_v28 }
 0x2e5   :  { %6029 = vmatprep.subr.bf16.mxu0 %v8526_v23  ;;  %6061 = vmatprep.subr.bf16.mxu1 %v8633_v30 }
 0x2e8   :  { %6031 = vmatpush1.bf16.msra.mxu0 %v8536_v32  ;;  %6063 = vmatpush1.bf16.msra.mxu1 %v8639_v38 }
 0x2e9   :  { %6033 = vmatprep.subr.bf16.mxu0 %v8539_v34  ;;  %6065 = vmatprep.subr.bf16.mxu1 %v8643_v39 }
 0x2ec   :  { %6035 = vmatpush1.bf16.msra.mxu0 %v8553_v42  ;;  %6067 = vmatpush1.bf16.msra.mxu1 %v8646_v46 }
 0x2ed   :  { %6037 = vmatprep.subr.bf16.mxu0 %v8556_v43  ;;  %6069 = vmatprep.subr.bf16.mxu1 %v8649_v48 }
 0x2f0   :  { %6039 = vmatpush1.bf16.msra.mxu0 %v8568_v54  ;;  %6071 = vmatpush1.bf16.msra.mxu1 %v8652_v56 }
 0x2f1   :  { %6041 = vmatprep.subr.bf16.mxu0 %v8571_v55  ;;  %6073 = vmatprep.subr.bf16.mxu1 %v8655_v57 }
 0x2f4   :  { %6043 = vmatpush1.bf16.msra.mxu0 %v8581_v60  ;;  %6075 = vmatpush1.bf16.msra.mxu1 %v8658_v1 }
 0x2f5   :  { %6045 = vmatprep.subr.bf16.mxu0 %v8584_v61  ;;  %6077 = vmatprep.subr.bf16.mxu1 %v8661_v3 }
 0x2f8   :  { %6047 = vmatpush1.bf16.msra.mxu0 %v8594_v6  ;;  %6079 = vmatpush1.bf16.msra.mxu1 %v8664_v10 }
 0x2f9   :  { %6081 = vmatprep.subr.bf16.mxu0 %v8477_v33  ;;  %6113 = vmatprep.subr.bf16.mxu1 %v8597_v7 }
 0x3ae   :  { %v1059_v16 = vpop.f32.mrb[4].mxu0  ;;  %v1130_v63 = vpop.f32.mrb[4].mxu1 }
 0x3af   :  { %v7526_v4 = vadd.f32 %v1059_v16, %v8694_v18  ;;  %v1061_v5 = vpop.f32.mrb[5].mxu0  ;;  %v1132_v9 = vpop.f32.mrb[5].mxu1  ;;  %v7542_v26 = vadd.f32 %v1130_v63, %v8708_v45 }
 0x3b0   :  { %v7527_v11 = vadd.f32 %v1061_v5, %v8697_v24  ;;  %v7543_v27 = vadd.f32 %v1132_v9, %v8711_v49 }
 0x3b1   :  { %v1139_v12 = vmul.f32 0.5, %v7526_v4 }
 0x3b2   :  { %v1143_v25 = vmul.f32 0.5, %v7527_v11  ;;  %v1148_v31 = vmul.f32 0.5, %v7543_v27 }
 0x3b3   :  { %7762 = vtanh.f32 %v1139_v12 }
 0x3b4   :  { %7764 = vtanh.f32 %v1143_v25 }
 0x3b5   :  { %7766 = vtanh.f32 %v7542_v26 }
 0x3b6   :  { %7768 = vtanh.f32 %v1148_v31 }
 0x3bd   :  { %v7763_v35 = vpop.eup %7762 }
 0x3be   :  { %v7765_v36 = vpop.eup %7764  ;;  %v1141_v40 = vmul.f32 0.5, %v7763_v35 }
 0x3bf   :  { %v1145_v51 = vmul.f32 0.5, %v7765_v36  ;;  %v7767_v59 = vpop.eup %7766 }
 0x3c0   :  { %v1142_v53 = vadd.f32 0.5, %v1141_v40  ;;  %v7769_v63 = vpop.eup %7768 }
 0x3c1   :  { %v1146_v58 = vadd.f32 0.5, %v1145_v51  ;;  %v1150_v11 = vmul.f32 0.5, %v7769_v63 }
 0x3c2   :  { %v1153_v16 = vmul.f32 %v7767_v59, %v1142_v53 }
 0x3c3   :  { %v1152_v4 = vmul.f32 %v1146_v58, %v8761_v52  ;;  %v1151_v12 = vadd.f32 0.5, %v1150_v11 }
 0x3c5   :  { %v8807_v5 = vadd.f32 %v1153_v16, %v1152_v4 }
 0x3c7   :  { %7770 = vtanh.f32 %v8807_v5 }
 0x3d1   :  { %v7771_v9 = vpop.eup %7770 }
 0x3d2   :  { %v8810_v25 = vmul.f32 %v7771_v9, %v1151_v12 }
 0x3d4   :  { %1223 = vmatmul.mubr.f32.vlgmr.msra.gmra.mrb[6].mxu0 %v8810_v25  ;;  %1294 = vmatmul.mubr.f32.vlgmr.msra.gmra.mrb[6].mxu1 %v8810_v25 }
 0x3d5   :  { %6083 = vmatpush1.bf16.msra.mxu0 %v8482_v47  ;;  %6115 = vmatpush1.bf16.msra.mxu1 %v8606_v13 }
 0x3d6   :  { %6085 = vmatprep.subr.bf16.mxu0 %v8486_v50  ;;  %6117 = vmatprep.subr.bf16.mxu1 %v8609_v14 }
 0x3d7   :  { %1387 = vmatprep.mubr.f32.mxu0 %v10056_v0  ;;  %1458 = vmatprep.mubr.f32.mxu1 %v10056_v0 }
 0x3d9   :  { %6087 = vmatpush1.bf16.msra.mxu0 %v8508_v2  ;;  %6119 = vmatpush1.bf16.msra.mxu1 %v8617_v20 }
 0x3da   :  { %6089 = vmatprep.subr.bf16.mxu0 %v8511_v8  ;;  %6121 = vmatprep.subr.bf16.mxu1 %v8621_v22 }
 0x3dd   :  { %6091 = vmatpush1.bf16.msra.mxu0 %v8523_v21  ;;  %6123 = vmatpush1.bf16.msra.mxu1 %v8629_v28 }
 0x3de   :  { %6093 = vmatprep.subr.bf16.mxu0 %v8526_v23  ;;  %6125 = vmatprep.subr.bf16.mxu1 %v8633_v30 }
 0x3e1   :  { %6095 = vmatpush1.bf16.msra.mxu0 %v8536_v32  ;;  %6127 = vmatpush1.bf16.msra.mxu1 %v8639_v38 }
 0x3e2   :  { %6097 = vmatprep.subr.bf16.mxu0 %v8539_v34  ;;  %6129 = vmatprep.subr.bf16.mxu1 %v8643_v39 }
 0x3e5   :  { %6099 = vmatpush1.bf16.msra.mxu0 %v8553_v42  ;;  %6131 = vmatpush1.bf16.msra.mxu1 %v8646_v46 }
 0x3e6   :  { %6101 = vmatprep.subr.bf16.mxu0 %v8556_v43  ;;  %6133 = vmatprep.subr.bf16.mxu1 %v8649_v48 }
 0x3e9   :  { %6103 = vmatpush1.bf16.msra.mxu0 %v8568_v54  ;;  %6135 = vmatpush1.bf16.msra.mxu1 %v8652_v56 }
 0x3ea   :  { %6105 = vmatprep.subr.bf16.mxu0 %v8571_v55  ;;  %6137 = vmatprep.subr.bf16.mxu1 %v8655_v57 }
 0x3ed   :  { %6107 = vmatpush1.bf16.msra.mxu0 %v8581_v60  ;;  %6139 = vmatpush1.bf16.msra.mxu1 %v8658_v1 }
 0x3ee   :  { %6109 = vmatprep.subr.bf16.mxu0 %v8584_v61  ;;  %6141 = vmatprep.subr.bf16.mxu1 %v8661_v3 }
 0x3f1   :  { %6111 = vmatpush1.bf16.msra.mxu0 %v8594_v6  ;;  %6143 = vmatpush1.bf16.msra.mxu1 %v8664_v10 }
 0x3f2   :  { %6145 = vmatprep.subr.bf16.mxu0 %v8477_v33  ;;  %6177 = vmatprep.subr.bf16.mxu1 %v8597_v7 }
 0x4a7   :  { %v1224_v52 = vpop.f32.mrb[6].mxu0  ;;  %v1295_v26 = vpop.f32.mrb[6].mxu1 }
 0x4a8   :  { %v7528_v27 = vadd.f32 %v1224_v52, %v8694_v18  ;;  %v1226_v31 = vpop.f32.mrb[7].mxu0  ;;  %v1297_v35 = vpop.f32.mrb[7].mxu1  ;;  %v7544_v53 = vadd.f32 %v1295_v26, %v8708_v45 }
 0x4a9   :  { %v7529_v36 = vadd.f32 %v1226_v31, %v8697_v24  ;;  %v7545_v59 = vadd.f32 %v1297_v35, %v8711_v49 }
 0x4aa   :  { %v1304_v40 = vmul.f32 0.5, %v7528_v27 }
 0x4ab   :  { %v1308_v51 = vmul.f32 0.5, %v7529_v36  ;;  %v1313_v58 = vmul.f32 0.5, %v7545_v59 }
 0x4ac   :  { %7772 = vtanh.f32 %v1304_v40 }
 0x4ad   :  { %7774 = vtanh.f32 %v1308_v51 }
 0x4ae   :  { %7776 = vtanh.f32 %v7544_v53 }
 0x4af   :  { %7778 = vtanh.f32 %v1313_v58 }
 0x4b6   :  { %v7773_v16 = vpop.eup %7772 }
 0x4b7   :  { %v7775_v4 = vpop.eup %7774  ;;  %v1306_v63 = vmul.f32 0.5, %v7773_v16 }
 0x4b8   :  { %v1310_v11 = vmul.f32 0.5, %v7775_v4  ;;  %v7777_v9 = vpop.eup %7776 }
 0x4b9   :  { %v1307_v12 = vadd.f32 0.5, %v1306_v63  ;;  %v7779_v26 = vpop.eup %7778 }
 0x4ba   :  { %v1311_v52 = vadd.f32 0.5, %v1310_v11  ;;  %v1315_v36 = vmul.f32 0.5, %v7779_v26 }
 0x4bb   :  { %v1318_v0 = vmul.f32 %v7777_v9, %v1307_v12 }
 0x4bc   :  { %v1317_v27 = vmul.f32 %v1311_v52, %v8807_v5  ;;  %v1316_v40 = vadd.f32 0.5, %v1315_v36 }
 0x4be   :  { %v8853_v31 = vadd.f32 %v1318_v0, %v1317_v27  ;;  %v10064_v0 = vmov 0.0  }
 0x4c0   :  { %7780 = vtanh.f32 %v8853_v31 }
 0x4ca   :  { %v7781_v35 = vpop.eup %7780 }
 0x4cb   :  { %v8856_v51 = vmul.f32 %v7781_v35, %v1316_v40 }
 0x4cd   :  { %1388 = vmatmul.mubr.f32.vlgmr.msra.gmra.mrb[8].mxu0 %v8856_v51  ;;  %1459 = vmatmul.mubr.f32.vlgmr.msra.gmra.mrb[8].mxu1 %v8856_v51 }
 0x4ce   :  { %6147 = vmatpush1.bf16.msra.mxu0 %v8482_v47  ;;  %6179 = vmatpush1.bf16.msra.mxu1 %v8606_v13 }
 0x4cf   :  { %6149 = vmatprep.subr.bf16.mxu0 %v8486_v50  ;;  %6181 = vmatprep.subr.bf16.mxu1 %v8609_v14 }
 0x4d0   :  { %1552 = vmatprep.mubr.f32.mxu0 %v10064_v0  ;;  %1623 = vmatprep.mubr.f32.mxu1 %v10064_v0 }
 0x4d2   :  { %6151 = vmatpush1.bf16.msra.mxu0 %v8508_v2  ;;  %6183 = vmatpush1.bf16.msra.mxu1 %v8617_v20 }
 0x4d3   :  { %6153 = vmatprep.subr.bf16.mxu0 %v8511_v8  ;;  %6185 = vmatprep.subr.bf16.mxu1 %v8621_v22 }
 0x4d6   :  { %6155 = vmatpush1.bf16.msra.mxu0 %v8523_v21  ;;  %6187 = vmatpush1.bf16.msra.mxu1 %v8629_v28 }
 0x4d7   :  { %6157 = vmatprep.subr.bf16.mxu0 %v8526_v23  ;;  %6189 = vmatprep.subr.bf16.mxu1 %v8633_v30 }
 0x4da   :  { %6159 = vmatpush1.bf16.msra.mxu0 %v8536_v32  ;;  %6191 = vmatpush1.bf16.msra.mxu1 %v8639_v38 }
 0x4db   :  { %6161 = vmatprep.subr.bf16.mxu0 %v8539_v34  ;;  %6193 = vmatprep.subr.bf16.mxu1 %v8643_v39 }
 0x4de   :  { %6163 = vmatpush1.bf16.msra.mxu0 %v8553_v42  ;;  %6195 = vmatpush1.bf16.msra.mxu1 %v8646_v46 }
 0x4df   :  { %6165 = vmatprep.subr.bf16.mxu0 %v8556_v43  ;;  %6197 = vmatprep.subr.bf16.mxu1 %v8649_v48 }
 0x4e2   :  { %6167 = vmatpush1.bf16.msra.mxu0 %v8568_v54  ;;  %6199 = vmatpush1.bf16.msra.mxu1 %v8652_v56 }
 0x4e3   :  { %6169 = vmatprep.subr.bf16.mxu0 %v8571_v55  ;;  %6201 = vmatprep.subr.bf16.mxu1 %v8655_v57 }
 0x4e6   :  { %6171 = vmatpush1.bf16.msra.mxu0 %v8581_v60  ;;  %6203 = vmatpush1.bf16.msra.mxu1 %v8658_v1 }
 0x4e7   :  { %6173 = vmatprep.subr.bf16.mxu0 %v8584_v61  ;;  %6205 = vmatprep.subr.bf16.mxu1 %v8661_v3 }
 0x4ea   :  { %6175 = vmatpush1.bf16.msra.mxu0 %v8594_v6  ;;  %6207 = vmatpush1.bf16.msra.mxu1 %v8664_v10 }
 0x4eb   :  { %6209 = vmatprep.subr.bf16.mxu0 %v8477_v33  ;;  %6241 = vmatprep.subr.bf16.mxu1 %v8597_v7 }
 0x5a0   :  { %v1389_v5 = vpop.f32.mrb[8].mxu0  ;;  %v1460_v53 = vpop.f32.mrb[8].mxu1 }
 0x5a1   :  { %v7530_v59 = vadd.f32 %v1389_v5, %v8694_v18  ;;  %v1391_v58 = vpop.f32.mrb[9].mxu0  ;;  %v1462_v16 = vpop.f32.mrb[9].mxu1  ;;  %v7546_v12 = vadd.f32 %v1460_v53, %v8708_v45 }
 0x5a2   :  { %v7531_v4 = vadd.f32 %v1391_v58, %v8697_v24  ;;  %v7547_v9 = vadd.f32 %v1462_v16, %v8711_v49 }
 0x5a3   :  { %v1469_v63 = vmul.f32 0.5, %v7530_v59 }
 0x5a4   :  { %v1473_v11 = vmul.f32 0.5, %v7531_v4  ;;  %v1478_v52 = vmul.f32 0.5, %v7547_v9 }
 0x5a5   :  { %7782 = vtanh.f32 %v1469_v63 }
 0x5a6   :  { %7784 = vtanh.f32 %v1473_v11 }
 0x5a7   :  { %7786 = vtanh.f32 %v7546_v12 }
 0x5a8   :  { %7788 = vtanh.f32 %v1478_v52 }
 0x5af   :  { %v7783_v27 = vpop.eup %7782 }
 0x5b0   :  { %v7785_v26 = vpop.eup %7784  ;;  %v1471_v36 = vmul.f32 0.5, %v7783_v27 }
 0x5b1   :  { %v1475_v40 = vmul.f32 0.5, %v7785_v26  ;;  %v7787_v5 = vpop.eup %7786 }
 0x5b2   :  { %v1472_v35 = vadd.f32 0.5, %v1471_v36  ;;  %v7789_v53 = vpop.eup %7788 }
 0x5b3   :  { %v1476_v29 = vadd.f32 0.5, %v1475_v40  ;;  %v1480_v4 = vmul.f32 0.5, %v7789_v53 }
 0x5b4   :  { %v1483_v19 = vmul.f32 %v7787_v5, %v1472_v35 }
 0x5b5   :  { %v1482_v59 = vmul.f32 %v1476_v29, %v8853_v31  ;;  %v1481_v63 = vadd.f32 0.5, %v1480_v4 }
 0x5b7   :  { %v8899_v58 = vadd.f32 %v1483_v19, %v1482_v59 }
 0x5b9   :  { %7790 = vtanh.f32 %v8899_v58 }
 0x5c3   :  { %v7791_v16 = vpop.eup %7790 }
 0x5c4   :  { %v8902_v11 = vmul.f32 %v7791_v16, %v1481_v63 }
 0x5c6   :  { %1553 = vmatmul.mubr.f32.vlgmr.msra.gmra.mrb[10].mxu0 %v8902_v11  ;;  %1624 = vmatmul.mubr.f32.vlgmr.msra.gmra.mrb[10].mxu1 %v8902_v11 }
 0x5c7   :  { %6211 = vmatpush1.bf16.msra.mxu0 %v8482_v47  ;;  %6243 = vmatpush1.bf16.msra.mxu1 %v8606_v13 }
 0x5c8   :  { %6213 = vmatprep.subr.bf16.mxu0 %v8486_v50  ;;  %6245 = vmatprep.subr.bf16.mxu1 %v8609_v14 }
 0x5c9   :  { %1717 = vmatprep.mubr.f32.mxu0 %v10064_v0  ;;  %1788 = vmatprep.mubr.f32.mxu1 %v10064_v0 }
 0x5cb   :  { %6215 = vmatpush1.bf16.msra.mxu0 %v8508_v2  ;;  %6247 = vmatpush1.bf16.msra.mxu1 %v8617_v20 }
 0x5cc   :  { %6217 = vmatprep.subr.bf16.mxu0 %v8511_v8  ;;  %6249 = vmatprep.subr.bf16.mxu1 %v8621_v22 }
 0x5cf   :  { %6219 = vmatpush1.bf16.msra.mxu0 %v8523_v21  ;;  %6251 = vmatpush1.bf16.msra.mxu1 %v8629_v28 }
 0x5d0   :  { %6221 = vmatprep.subr.bf16.mxu0 %v8526_v23  ;;  %6253 = vmatprep.subr.bf16.mxu1 %v8633_v30 }
 0x5d3   :  { %6223 = vmatpush1.bf16.msra.mxu0 %v8536_v32  ;;  %6255 = vmatpush1.bf16.msra.mxu1 %v8639_v38 }
 0x5d4   :  { %6225 = vmatprep.subr.bf16.mxu0 %v8539_v34  ;;  %6257 = vmatprep.subr.bf16.mxu1 %v8643_v39 }
 0x5d7   :  { %6227 = vmatpush1.bf16.msra.mxu0 %v8553_v42  ;;  %6259 = vmatpush1.bf16.msra.mxu1 %v8646_v46 }
 0x5d8   :  { %6229 = vmatprep.subr.bf16.mxu0 %v8556_v43  ;;  %6261 = vmatprep.subr.bf16.mxu1 %v8649_v48 }
 0x5db   :  { %6231 = vmatpush1.bf16.msra.mxu0 %v8568_v54  ;;  %6263 = vmatpush1.bf16.msra.mxu1 %v8652_v56 }
 0x5dc   :  { %6233 = vmatprep.subr.bf16.mxu0 %v8571_v55  ;;  %6265 = vmatprep.subr.bf16.mxu1 %v8655_v57 }
 0x5df   :  { %6235 = vmatpush1.bf16.msra.mxu0 %v8581_v60  ;;  %6267 = vmatpush1.bf16.msra.mxu1 %v8658_v1 }
 0x5e0   :  { %6237 = vmatprep.subr.bf16.mxu0 %v8584_v61  ;;  %6269 = vmatprep.subr.bf16.mxu1 %v8661_v3 }
 0x5e3   :  { %6239 = vmatpush1.bf16.msra.mxu0 %v8594_v6  ;;  %6271 = vmatpush1.bf16.msra.mxu1 %v8664_v10 }
 0x5e4   :  { %6273 = vmatprep.subr.bf16.mxu0 %v8477_v33  ;;  %6305 = vmatprep.subr.bf16.mxu1 %v8597_v7 }
 0x699   :  { %v1554_v19 = vpop.f32.mrb[10].mxu0  ;;  %v1625_v29 = vpop.f32.mrb[10].mxu1 }
 0x69a   :  { %v7532_v31 = vadd.f32 %v1554_v19, %v8694_v18  ;;  %v1556_v12 = vpop.f32.mrb[11].mxu0  ;;  %v1627_v9 = vpop.f32.mrb[11].mxu1  ;;  %v7548_v36 = vadd.f32 %v1625_v29, %v8708_v45 }
 0x69b   :  { %v7533_v52 = vadd.f32 %v1556_v12, %v8697_v24  ;;  %v7549_v40 = vadd.f32 %v1627_v9, %v8711_v49 }
 0x69c   :  { %v1634_v27 = vmul.f32 0.5, %v7532_v31 }
 0x69d   :  { %v1638_v26 = vmul.f32 0.5, %v7533_v52  ;;  %v1643_v33 = vmul.f32 0.5, %v7549_v40  ;;  %v1994_v40 = vld [vmem:[#allocation11 + $0x48] sm:$0xff] }
 0x69e   :  { %7792 = vtanh.f32 %v1634_v27 }
 0x69f   :  { %7794 = vtanh.f32 %v1638_v26  ;;  %v1987_v26 = vld [vmem:[#allocation11 + $0x10] sm:$0xff] }
 0x6a0   :  { %7796 = vtanh.f32 %v7548_v36  ;;  %v1991_v36 = vld [vmem:[#allocation11 + $0x30] sm:$0xff] }
 0x6a1   :  { %7798 = vtanh.f32 %v1643_v33  ;;  %v1998_v33 = vld [vmem:[#allocation11 + $0x68] sm:$0xff] }
 0x6a8   :  { %v7793_v35 = vpop.eup %7792 }
 0x6a9   :  { %v7795_v7 = vpop.eup %7794  ;;  %v1636_v5 = vmul.f32 0.5, %v7793_v35  ;;  %v1996_v35 = vld [vmem:[#allocation11 + $0x58] sm:$0xff] }
 0x6aa   :  { %v1640_v59 = vmul.f32 0.5, %v7795_v7  ;;  %v7797_v4 = vpop.eup %7796  ;;  %v2000_v7 = vld [vmem:[#allocation11 + $0x78] sm:$0xff] }
 0x6ab   :  { %v1637_v53 = vadd.f32 0.5, %v1636_v5  ;;  %v7799_v29 = vpop.eup %7798 }
 0x6ac   :  { %v1641_v63 = vadd.f32 0.5, %v1640_v59  ;;  %v1645_v12 = vmul.f32 0.5, %v7799_v29  ;;  %v6372_v29 = vpack.c.bf16 %v2000_v7, %v1996_v35  ;;  %v2023_v35 = vld [vmem:[#allocation11 + $0x130] sm:$0xff]  ;;  %v2026_v7 = vld [vmem:[#allocation11 + $0x148] sm:$0xff] }
 0x6ad   :  { %v1648_v16 = vmul.f32 %v7797_v4, %v1637_v53  ;;  %v6370_v4 = vpack.c.bf16 %v1991_v36, %v1987_v26  ;;  %v2021_v26 = vld [vmem:[#allocation11 + $0x120] sm:$0xff] }
 0x6ae   :  { %v1647_v19 = vmul.f32 %v1641_v63, %v8899_v58  ;;  %v1646_v52 = vadd.f32 0.5, %v1645_v12  ;;  %v1989_v58 = vld [vmem:[#allocation11 + $0x20] sm:$0xff]  ;;  %v1995_v12 = vld [vmem:[#allocation11 + $0x50] sm:$0xff] }
 0x6af   :  { %v1993_v63 = vld [vmem:[#allocation11 + $0x40] sm:$0xff] }
 0x6b0   :  { %v8945_v31 = vadd.f32 %v1648_v16, %v1647_v19  ;;  %v1997_v16 = vld [vmem:[#allocation11 + $0x60] sm:$0xff] }
 0x6b2   :  { %7800 = vtanh.f32 %v8945_v31 }
 0x6bc   :  { %v7801_v9 = vpop.eup %7800 }
 0x6bd   :  { %v8948_v27 = vmul.f32 %v7801_v9, %v1646_v52  ;;  %v1999_v52 = vld [vmem:[#allocation11 + $0x70] sm:$0xff]  ;;  %v2002_v9 = vld [vmem:[#allocation11 + $0x88] sm:$0xff] }
 0x6bf   :  { %1718 = vmatmul.mubr.f32.vlgmr.msra.gmra.mrb[12].mxu0 %v8948_v27  ;;  %1789 = vmatmul.mubr.f32.vlgmr.msra.gmra.mrb[12].mxu1 %v8948_v27 }
 0x6c0   :  { %6275 = vmatpush1.bf16.msra.mxu0 %v8482_v47  ;;  %6307 = vmatpush1.bf16.msra.mxu1 %v8606_v13  ;;  %v1986_v47 = vld [vmem:[#allocation11 + $0x8] sm:$0xff] }
 0x6c1   :  { %6277 = vmatprep.subr.bf16.mxu0 %v8486_v50  ;;  %6309 = vmatprep.subr.bf16.mxu1 %v8609_v14  ;;  %v1990_v50 = vld [vmem:[#allocation11 + $0x28] sm:$0xff] }
 0x6c2   :  { %1882 = vmatprep.mubr.f32.mxu0 %v10064_v0  ;;  %1953 = vmatprep.mubr.f32.mxu1 %v10064_v0 }
 0x6c4   :  { %6279 = vmatpush1.bf16.msra.mxu0 %v8508_v2  ;;  %6311 = vmatpush1.bf16.msra.mxu1 %v8617_v20  ;;  %v1988_v2 = vld [vmem:[#allocation11 + $0x18] sm:$0xff] }
 0x6c5   :  { %6281 = vmatprep.subr.bf16.mxu0 %v8511_v8  ;;  %6313 = vmatprep.subr.bf16.mxu1 %v8621_v22  ;;  %v6336_v8 = vpack.c.bf16 %v1990_v50, %v1986_v47  ;;  %v2006_v47 = vld [vmem:[#allocation11 + $0xa8] sm:$0xff]  ;;  %v2004_v50 = vld [vmem:[#allocation11 + $0x98] sm:$0xff] }
 0x6c8   :  { %6283 = vmatpush1.bf16.msra.mxu0 %v8523_v21  ;;  %6315 = vmatpush1.bf16.msra.mxu1 %v8629_v28  ;;  %v1992_v21 = vld [vmem:[#allocation11 + $0x38] sm:$0xff] }
 0x6c9   :  { %6285 = vmatprep.subr.bf16.mxu0 %v8526_v23  ;;  %6317 = vmatprep.subr.bf16.mxu1 %v8633_v30  ;;  %v6368_v23 = vpack.c.bf16 %v1992_v21, %v1988_v2  ;;  %v2008_v2 = vld [vmem:[#allocation11 + $0xb8] sm:$0xff]  ;;  %v6374_v21 = vpack.c.bf16 %v1999_v52, %v1995_v12  ;;  %v2027_v52 = vld [vmem:[#allocation11 + $0x150] sm:$0xff] }
 0x6cc   :  { %6287 = vmatpush1.bf16.msra.mxu0 %v8536_v32  ;;  %6319 = vmatpush1.bf16.msra.mxu1 %v8639_v38 }
 0x6cd   :  { %6289 = vmatprep.subr.bf16.mxu0 %v8539_v34  ;;  %6321 = vmatprep.subr.bf16.mxu1 %v8643_v39 }
 0x6d0   :  { %6291 = vmatpush1.bf16.msra.mxu0 %v8553_v42  ;;  %6323 = vmatpush1.bf16.msra.mxu1 %v8646_v46 }
 0x6d1   :  { %6293 = vmatprep.subr.bf16.mxu0 %v8556_v43  ;;  %6325 = vmatprep.subr.bf16.mxu1 %v8649_v48 }
 0x6d4   :  { %6295 = vmatpush1.bf16.msra.mxu0 %v8568_v54  ;;  %6327 = vmatpush1.bf16.msra.mxu1 %v8652_v56 }
 0x6d5   :  { %6297 = vmatprep.subr.bf16.mxu0 %v8571_v55  ;;  %6329 = vmatprep.subr.bf16.mxu1 %v8655_v57 }
 0x6d8   :  { %6299 = vmatpush1.bf16.msra.mxu0 %v8581_v60  ;;  %6331 = vmatpush1.bf16.msra.mxu1 %v8658_v1 }
 0x6d9   :  { %6301 = vmatprep.subr.bf16.mxu0 %v8584_v61  ;;  %6333 = vmatprep.subr.bf16.mxu1 %v8661_v3 }
 0x6dc   :  { %6303 = vmatpush1.bf16.msra.mxu0 %v8594_v6  ;;  %6335 = vmatpush1.bf16.msra.mxu1 %v8664_v10  ;;  %v1985_v10 = vld [vmem:[#allocation11] sm:$0xff] }
 0x6dd   :  { %6337 = vmatprep.subr.bf16.mxu0 %v6336_v8  ;;  %6369 = vmatprep.subr.bf16.mxu1 %v6368_v23  ;;  %v6338_v53 = vpack.c.bf16 %v1989_v58, %v1985_v10  ;;  %v6342_v8 = vpack.c.bf16 %v1997_v16, %v1993_v63  ;;  %v2001_v23 = vld [vmem:[#allocation11 + $0x80] sm:$0xff] }
 0x6de   :  { %v2017_v58 = vld [vmem:[#allocation11 + $0x100] sm:$0xff] }
 0x6df   :  { %v2025_v16 = vld [vmem:[#allocation11 + $0x140] sm:$0xff] }
 0x792   :  { %v1719_v32 = vpop.f32.mrb[12].mxu0  ;;  %v1790_v34 = vpop.f32.mrb[12].mxu1 }
 0x793   :  { %v7534_v42 = vadd.f32 %v1719_v32, %v8694_v18  ;;  %v1721_v43 = vpop.f32.mrb[13].mxu0  ;;  %v1792_v54 = vpop.f32.mrb[13].mxu1  ;;  %v7550_v6 = vadd.f32 %v1790_v34, %v8708_v45  ;;  %v2005_v32 = vld [vmem:[#allocation11 + $0xa0] sm:$0xff]  ;;  %v6344_v34 = vpack.c.bf16 %v2006_v47, %v2002_v9  ;;  %v2031_v9 = vld [vmem:[#allocation11 + $0x170] sm:$0xff]  ;;  %v2034_v47 = vld [vmem:[#allocation11 + $0x188] sm:$0xff] }
 0x794   :  { %v7535_v55 = vadd.f32 %v1721_v43, %v8697_v24  ;;  %v7551_v13 = vadd.f32 %v1792_v54, %v8711_v49  ;;  %v2003_v43 = vld [vmem:[#allocation11 + $0x90] sm:$0xff] }
 0x795   :  { %v1799_v60 = vmul.f32 0.5, %v7534_v42  ;;  %v6376_v42 = vpack.c.bf16 %v2008_v2, %v2004_v50  ;;  %v2007_v54 = vld [vmem:[#allocation11 + $0xb0] sm:$0xff]  ;;  %v2038_v50 = vld [vmem:[#allocation11 + $0x1a8] sm:$0xff]  ;;  %v2036_v2 = vld [vmem:[#allocation11 + $0x198] sm:$0xff] }
 0x796   :  { %v1803_v61 = vmul.f32 0.5, %v7535_v55  ;;  %v1808_v14 = vmul.f32 0.5, %v7551_v13  ;;  %v2010_v55 = vld [vmem:[#allocation11 + $0xc8] sm:$0xff]  ;;  %v6346_v13 = vpack.c.bf16 %v2005_v32, %v2001_v23  ;;  %v6390_v23 = vpack.c.bf16 %v2031_v9, %v2027_v52  ;;  %v2033_v32 = vld [vmem:[#allocation11 + $0x180] sm:$0xff]  ;;  %v2068_v52 = vld [vmem:[#allocation12 + $0x98] sm:$0xff] }
 0x797   :  { %7802 = vtanh.f32 %v1799_v60  ;;  %v2014_v60 = vld [vmem:[#allocation11 + $0xe8] sm:$0xff] }
 0x798   :  { %7804 = vtanh.f32 %v1803_v61  ;;  %v2012_v61 = vld [vmem:[#allocation11 + $0xd8] sm:$0xff] }
 0x799   :  { %7806 = vtanh.f32 %v7550_v6  ;;  %v2016_v6 = vld [vmem:[#allocation11 + $0xf8] sm:$0xff] }
 0x79a   :  { %7808 = vtanh.f32 %v1808_v14  ;;  %v6378_v14 = vpack.c.bf16 %v2007_v54, %v2003_v43  ;;  %v2035_v54 = vld [vmem:[#allocation11 + $0x190] sm:$0xff] }
 0x7a1   :  { %v7803_v20 = vpop.eup %7802 }
 0x7a2   :  { %v7805_v22 = vpop.eup %7804  ;;  %v1801_v28 = vmul.f32 0.5, %v7803_v20  ;;  %v2009_v20 = vld [vmem:[#allocation11 + $0xc0] sm:$0xff] }
 0x7a3   :  { %v1805_v30 = vmul.f32 0.5, %v7805_v22  ;;  %v7807_v39 = vpop.eup %7806  ;;  %v2013_v22 = vld [vmem:[#allocation11 + $0xe0] sm:$0xff] }
 0x7a4   :  { %v1802_v38 = vadd.f32 0.5, %v1801_v28  ;;  %v7809_v1 = vpop.eup %7808  ;;  %v6348_v28 = vpack.c.bf16 %v2014_v60, %v2010_v55  ;;  %v2039_v55 = vld [vmem:[#allocation11 + $0x1b0] sm:$0xff]  ;;  %v2042_v60 = vld [vmem:[#allocation11 + $0x1c8] sm:$0xff] }
 0x7a5   :  { %v1806_v46 = vadd.f32 0.5, %v1805_v30  ;;  %v1810_v3 = vmul.f32 0.5, %v7809_v1  ;;  %v6380_v30 = vpack.c.bf16 %v2016_v6, %v2012_v61  ;;  %v2024_v1 = vld [vmem:[#allocation11 + $0x138] sm:$0xff]  ;;  %v2046_v61 = vld [vmem:[#allocation11 + $0x1e8] sm:$0xff] }
 0x7a6   :  { %v1813_v48 = vmul.f32 %v7807_v39, %v1802_v38  ;;  %v2011_v38 = vld [vmem:[#allocation11 + $0xd0] sm:$0xff]  ;;  %v2044_v6 = vld [vmem:[#allocation11 + $0x1d8] sm:$0xff] }
 0x7a7   :  { %v1812_v56 = vmul.f32 %v1806_v46, %v8945_v31  ;;  %v1811_v5 = vadd.f32 0.5, %v1810_v3  ;;  %v6340_v31 = vpack.c.bf16 %v1998_v33, %v1994_v40  ;;  %v2015_v39 = vld [vmem:[#allocation11 + $0xf0] sm:$0xff]  ;;  %v2018_v46 = vld [vmem:[#allocation11 + $0x108] sm:$0xff]  ;;  %v6350_v3 = vpack.c.bf16 %v2013_v22, %v2009_v20  ;;  %v2041_v22 = vld [vmem:[#allocation11 + $0x1c0] sm:$0xff] }
 0x7a8   :  { %v6382_v10 = vpack.c.bf16 %v2015_v39, %v2011_v38  ;;  %v2019_v33 = vld [vmem:[#allocation11 + $0x110] sm:$0xff]  ;;  %v6394_v20 = vpack.c.bf16 %v2039_v55, %v2035_v54  ;;  %v2045_v38 = vld [vmem:[#allocation11 + $0x1e0] sm:$0xff]  ;;  %v2076_v54 = vld [vmem:[#allocation12 + $0xd8] sm:$0xff] }
 0x7a9   :  { %v8989_v57 = vadd.f32 %v1813_v48, %v1812_v56  ;;  %v2022_v48 = vld [vmem:[#allocation11 + $0x128] sm:$0xff]  ;;  %v2020_v56 = vld [vmem:[#allocation11 + $0x118] sm:$0xff]  ;;  %v6386_v63 = vpack.c.bf16 %v2023_v35, %v2019_v33  ;;  %v2043_v39 = vld [vmem:[#allocation11 + $0x1d0] sm:$0xff] }
 0x7aa   :  { %v6352_v36 = vpack.c.bf16 %v2022_v48, %v2018_v46  ;;  %v6384_v40 = vpack.c.bf16 %v2024_v1, %v2020_v56  ;;  %v2047_v46 = vld [vmem:[#allocation11 + $0x1f0] sm:$0xff]  ;;  %v6366_v48 = vpack.c.bf16 %v2045_v38, %v2041_v22  ;;  %v2053_v1 = vld [vmem:[#allocation12 + $0x20] sm:$0xff]  ;;  %v2060_v33 = vld [vmem:[#allocation12 + $0x58] sm:$0xff] }
 0x7ab   :  { %7810 = vtanh.f32 %v8989_v57  ;;  %v6398_v56 = vpack.c.bf16 %v2047_v46, %v2043_v39  ;;  %v2079_v22 = vld [vmem:[#allocation12 + $0xf0] sm:$0xff]  ;;  %v2086_v38 = vld [vmem:[#allocation12 + $0x128] sm:$0xff]  ;;  %v2084_v39 = vld [vmem:[#allocation12 + $0x118] sm:$0xff] }
 0x7b5   :  { %v7811_v59 = vpop.eup %7810 }
 0x7b6   :  { %v8992_v19 = vmul.f32 %v7811_v59, %v1811_v5  ;;  %v2030_v5 = vld [vmem:[#allocation11 + $0x168] sm:$0xff]  ;;  %v2028_v59 = vld [vmem:[#allocation11 + $0x158] sm:$0xff] }
 0x7b8   :  { %1883 = vmatmul.mubr.f32.vlgmr.msra.gmra.mrb[14].mxu0 %v8992_v19  ;;  %1954 = vmatmul.mubr.f32.vlgmr.msra.gmra.mrb[14].mxu1 %v8992_v19 }
 0x7b9   :  { %6339 = vmatpush1.bf16.msra.mxu0 %v6338_v53  ;;  %6371 = vmatpush1.bf16.msra.mxu1 %v6370_v4  ;;  %v2032_v53 = vld [vmem:[#allocation11 + $0x178] sm:$0xff]  ;;  %v6354_v4 = vpack.c.bf16 %v2021_v26, %v2017_v58  ;;  %v2051_v58 = vld [vmem:[#allocation12 + $0x10] sm:$0xff] }
 0x7ba   :  { %6341 = vmatprep.subr.bf16.mxu0 %v6340_v31  ;;  %6373 = vmatprep.subr.bf16.mxu1 %v6372_v29  ;;  %v2029_v31 = vld [vmem:[#allocation11 + $0x160] sm:$0xff]  ;;  %v6356_v29 = vpack.c.bf16 %v2030_v5, %v2026_v7  ;;  %v6388_v12 = vpack.c.bf16 %v2032_v53, %v2028_v59  ;;  %v2055_v26 = vld [vmem:[#allocation12 + $0x30] sm:$0xff]  ;;  %v2064_v59 = vld [vmem:[#allocation12 + $0x78] sm:$0xff] }
 0x7bb   :  { %2207 = vmatprep.mubr.f32.mxu0 %v10064_v0  ;;  %2320 = vmatprep.mubr.f32.mxu1 %v10064_v0  ;;  %v2057_v7 = vld [vmem:[#allocation12 + $0x40] sm:$0xff] }
 0x7bc   :  { %v2061_v5 = vld [vmem:[#allocation12 + $0x60] sm:$0xff] }
 0x7bd   :  { %6343 = vmatpush1.bf16.msra.mxu0 %v6342_v8  ;;  %6375 = vmatpush1.bf16.msra.mxu1 %v6374_v21  ;;  %v2040_v8 = vld [vmem:[#allocation11 + $0x1b8] sm:$0xff]  ;;  %v6358_v21 = vpack.c.bf16 %v2029_v31, %v2025_v16  ;;  %v9040_v53 = vpack.c.bf16 %v2061_v5, %v2057_v7  ;;  %v2063_v16 = vld [vmem:[#allocation12 + $0x70] sm:$0xff] }
 0x7be   :  { %6345 = vmatprep.subr.bf16.mxu0 %v6344_v34  ;;  %6377 = vmatprep.subr.bf16.mxu1 %v6376_v42  ;;  %v2037_v34 = vld [vmem:[#allocation11 + $0x1a0] sm:$0xff]  ;;  %v6360_v42 = vpack.c.bf16 %v2038_v50, %v2034_v47  ;;  %v6392_v43 = vpack.c.bf16 %v2040_v8, %v2036_v2  ;;  %v2072_v2 = vld [vmem:[#allocation12 + $0xb8] sm:$0xff] }
 0x7bf   :  { %v2065_v47 = vld [vmem:[#allocation12 + $0x80] sm:$0xff]  ;;  %v2092_v5 = vld [vmem:[#allocation12 + $0x158] sm:$0xff] }
 0x7c0   :  { %v2069_v50 = vld [vmem:[#allocation12 + $0xa0] sm:$0xff] }
 0x7c1   :  { %6347 = vmatpush1.bf16.msra.mxu0 %v6346_v13  ;;  %6379 = vmatpush1.bf16.msra.mxu1 %v6378_v14  ;;  %v2048_v13 = vld [vmem:[#allocation11 + $0x1f8] sm:$0xff]  ;;  %v6362_v14 = vpack.c.bf16 %v2037_v34, %v2033_v32  ;;  %v9052_v8 = vpack.c.bf16 %v2069_v50, %v2065_v47  ;;  %v2071_v32 = vld [vmem:[#allocation12 + $0xb0] sm:$0xff] }
 0x7c2   :  { %6349 = vmatprep.subr.bf16.mxu0 %v6348_v28  ;;  %6381 = vmatprep.subr.bf16.mxu1 %v6380_v30  ;;  %v6364_v28 = vpack.c.bf16 %v2046_v61, %v2042_v60  ;;  %v6396_v30 = vpack.c.bf16 %v2048_v13, %v2044_v6  ;;  %v2073_v60 = vld [vmem:[#allocation12 + $0xc0] sm:$0xff]  ;;  %v2080_v6 = vld [vmem:[#allocation12 + $0xf8] sm:$0xff] }
 0x7c3   :  { %v2077_v61 = vld [vmem:[#allocation12 + $0xe0] sm:$0xff] }
 0x7c4   :  { %v9064_v13 = vpack.c.bf16 %v2077_v61, %v2073_v60 }
 0x7c5   :  { %6351 = vmatpush1.bf16.msra.mxu0 %v6350_v3  ;;  %6383 = vmatpush1.bf16.msra.mxu1 %v6382_v10 }
 0x7c6   :  { %6353 = vmatprep.subr.bf16.mxu0 %v6352_v36  ;;  %6385 = vmatprep.subr.bf16.mxu1 %v6384_v40  ;;  %v2058_v36 = vld [vmem:[#allocation12 + $0x48] sm:$0xff] }
 0x7c7   :  { %v2062_v40 = vld [vmem:[#allocation12 + $0x68] sm:$0xff] }
 0x7c8   :  { %v9038_v35 = vpack.c.bf16 %v2062_v40, %v2058_v36  ;;  %v2089_v36 = vld [vmem:[#allocation12 + $0x140] sm:$0xff] }
 0x7c9   :  { %6355 = vmatpush1.bf16.msra.mxu0 %v6354_v4  ;;  %6387 = vmatpush1.bf16.msra.mxu1 %v6386_v63  ;;  %v9042_v4 = vpack.c.bf16 %v2064_v59, %v2060_v33  ;;  %v2059_v63 = vld [vmem:[#allocation12 + $0x50] sm:$0xff]  ;;  %v2093_v40 = vld [vmem:[#allocation12 + $0x160] sm:$0xff]  ;;  %v2096_v59 = vld [vmem:[#allocation12 + $0x178] sm:$0xff] }
 0x7ca   :  { %6357 = vmatprep.subr.bf16.mxu0 %v6356_v29  ;;  %6389 = vmatprep.subr.bf16.mxu1 %v6388_v12  ;;  %v9045_v31 = vpack.c.bf16 %v2063_v16, %v2059_v63  ;;  %v2066_v29 = vld [vmem:[#allocation12 + $0x88] sm:$0xff]  ;;  %v9087_v7 = vpack.c.bf16 %v2093_v40, %v2089_v36  ;;  %v2091_v63 = vld [vmem:[#allocation12 + $0x150] sm:$0xff]  ;;  %v9090_v16 = vpack.c.bf16 %v2096_v59, %v2092_v5 }
 0x7cb   :  { %v2070_v12 = vld [vmem:[#allocation12 + $0xa8] sm:$0xff] }
 0x7cc   :  { %v9050_v9 = vpack.c.bf16 %v2070_v12, %v2066_v29  ;;  %v2095_v29 = vld [vmem:[#allocation12 + $0x170] sm:$0xff]  ;;  %v2098_v12 = vld [vmem:[#allocation12 + $0x188] sm:$0xff] }
 0x7cd   :  { %6359 = vmatpush1.bf16.msra.mxu0 %v6358_v21  ;;  %6391 = vmatpush1.bf16.msra.mxu1 %v6390_v23  ;;  %v9054_v21 = vpack.c.bf16 %v2072_v2, %v2068_v52  ;;  %v2067_v23 = vld [vmem:[#allocation12 + $0x90] sm:$0xff]  ;;  %v2102_v52 = vld [vmem:[#allocation12 + $0x1a8] sm:$0xff]  ;;  %v9093_v47 = vpack.c.bf16 %v2095_v29, %v2091_v63  ;;  %v2097_v2 = vld [vmem:[#allocation12 + $0x180] sm:$0xff] }
 0x7ce   :  { %6361 = vmatprep.subr.bf16.mxu0 %v6360_v42  ;;  %6393 = vmatprep.subr.bf16.mxu1 %v6392_v43  ;;  %v9057_v34 = vpack.c.bf16 %v2071_v32, %v2067_v23  ;;  %v2074_v42 = vld [vmem:[#allocation12 + $0xc8] sm:$0xff]  ;;  %v9095_v50 = vpack.c.bf16 %v2102_v52, %v2098_v12  ;;  %v2101_v23 = vld [vmem:[#allocation12 + $0x1a0] sm:$0xff]  ;;  %v2100_v32 = vld [vmem:[#allocation12 + $0x198] sm:$0xff] }
 0x7cf   :  { %v2078_v43 = vld [vmem:[#allocation12 + $0xe8] sm:$0xff]  ;;  %v9099_v60 = vpack.c.bf16 %v2101_v23, %v2097_v2 }
 0x7d0   :  { %v9062_v55 = vpack.c.bf16 %v2078_v43, %v2074_v42  ;;  %v2104_v42 = vld [vmem:[#allocation12 + $0x1b8] sm:$0xff]  ;;  %v2099_v43 = vld [vmem:[#allocation12 + $0x190] sm:$0xff] }
 0x7d1   :  { %6363 = vmatpush1.bf16.msra.mxu0 %v6362_v14  ;;  %6395 = vmatpush1.bf16.msra.mxu1 %v6394_v20  ;;  %v9066_v14 = vpack.c.bf16 %v2080_v6, %v2076_v54  ;;  %v2075_v20 = vld [vmem:[#allocation12 + $0xd0] sm:$0xff]  ;;  %v9101_v61 = vpack.c.bf16 %v2104_v42, %v2100_v32  ;;  %v2106_v6 = vld [vmem:[#allocation12 + $0x1c8] sm:$0xff] }
 0x7d2   :  { %6365 = vmatprep.subr.bf16.mxu0 %v6364_v28  ;;  %6397 = vmatprep.subr.bf16.mxu1 %v6396_v30  ;;  %v9069_v28 = vpack.c.bf16 %v2079_v22, %v2075_v20  ;;  %v2082_v30 = vld [vmem:[#allocation12 + $0x108] sm:$0xff]  ;;  %v2103_v54 = vld [vmem:[#allocation12 + $0x1b0] sm:$0xff] }
 0x7d3   :  { %v9074_v46 = vpack.c.bf16 %v2086_v38, %v2082_v30  ;;  %v2110_v20 = vld [vmem:[#allocation12 + $0x1e8] sm:$0xff]  ;;  %v9105_v22 = vpack.c.bf16 %v2103_v54, %v2099_v43  ;;  %v2108_v38 = vld [vmem:[#allocation12 + $0x1d8] sm:$0xff] }
 0x7d4   :  { %v9107_v30 = vpack.c.bf16 %v2110_v20, %v2106_v6 }
 0x7d5   :  { %6367 = vmatpush1.bf16.msra.mxu0 %v6366_v48  ;;  %6399 = vmatpush1.bf16.msra.mxu1 %v6398_v56  ;;  %v2081_v48 = vld [vmem:[#allocation12 + $0x100] sm:$0xff] }
 0x7d6   :  { %v2085_v56 = vld [vmem:[#allocation12 + $0x120] sm:$0xff] }
 0x7d8   :  { %2208 = vmatmul.mubr.f32.vlgmr.msra.gmra.mrb[16].mxu0 %v8718_v37  ;;  %2321 = vmatmul.mubr.f32.vlgmr.msra.gmra.mrb[18].mxu1 %v8718_v37  ;;  %v2050_v37 = vld [vmem:[#allocation12 + $0x8] sm:$0xff] }
 0x7d9   :  { %2213 = vmatprep.mubr.f32.mxu0 %v10064_v0  ;;  %2326 = vmatprep.mubr.f32.mxu1 %v10064_v0 }
 0x7dc   :  { %2214 = vmatmul.mubr.f32.gmra.mrb[18].mxu0 %v8764_v62  ;;  %2327 = vmatmul.mubr.f32.gmra.mrb[20].mxu1 %v8764_v62  ;;  %v2054_v62 = vld [vmem:[#allocation12 + $0x28] sm:$0xff] }
 0x7dd   :  { %2219 = vmatprep.mubr.f32.mxu0 %v10064_v0  ;;  %2332 = vmatprep.mubr.f32.mxu1 %v10064_v0 }
 0x7e0   :  { %2220 = vmatmul.mubr.f32.gmra.mrb[20].mxu0 %v8810_v25  ;;  %2333 = vmatmul.mubr.f32.gmra.mrb[22].mxu1 %v8810_v25  ;;  %v2052_v25 = vld [vmem:[#allocation12 + $0x18] sm:$0xff] }
 0x7e1   :  { %2225 = vmatprep.mubr.f32.mxu0 %v10064_v0  ;;  %2338 = vmatprep.mubr.f32.mxu1 %v10064_v0 }
 0x7e4   :  { %2226 = vmatmul.mubr.f32.gmra.mrb[22].mxu0 %v8856_v51  ;;  %2339 = vmatmul.mubr.f32.gmra.mrb[24].mxu1 %v8856_v51  ;;  %v9026_v51 = vpack.c.bf16 %v2054_v62, %v2050_v37  ;;  %v2088_v37 = vld [vmem:[#allocation12 + $0x138] sm:$0xff]  ;;  %v9076_v62 = vpack.c.bf16 %v2085_v56, %v2081_v48  ;;  %v2105_v48 = vld [vmem:[#allocation12 + $0x1c0] sm:$0xff] }
 0x7e5   :  { %2231 = vmatprep.mubr.f32.mxu0 %v10064_v0  ;;  %2344 = vmatprep.mubr.f32.mxu1 %v10064_v0  ;;  %v2109_v56 = vld [vmem:[#allocation12 + $0x1e0] sm:$0xff] }
 0x7e6   :  { %6401 = vmatprep.subr.bf16.mxu0 %v9026_v51 }
 0x7e8   :  { %2232 = vmatmul.mubr.f32.gmra.mrb[24].mxu0 %v8902_v11  ;;  %2345 = vmatmul.mubr.f32.gmra.mrb[26].mxu1 %v8902_v11  ;;  %v2049_v11 = vld [vmem:[#allocation12] sm:$0xff] }
 0x7e9   :  { %2237 = vmatprep.mubr.f32.mxu0 %v10064_v0  ;;  %2350 = vmatprep.mubr.f32.mxu1 %v10064_v0  ;;  %v9028_v3 = vpack.c.bf16 %v2053_v1, %v2049_v11  ;;  %v2083_v11 = vld [vmem:[#allocation12 + $0x110] sm:$0xff] }
 0x7ea   :  { %v2087_v1 = vld [vmem:[#allocation12 + $0x130] sm:$0xff] }
 0x7eb   :  { %6403 = vmatpush1.bf16.msra.mxu0 %v9028_v3 }
 0x7ec   :  { %2238 = vmatmul.mubr.f32.gmra.mrb[26].mxu0 %v8948_v27  ;;  %2351 = vmatmul.mubr.f32.gmra.mrb[28].mxu1 %v8948_v27  ;;  %v2056_v27 = vld [vmem:[#allocation12 + $0x38] sm:$0xff] }
 0x7ed   :  { %2243 = vmatprep.mubr.f32.mxu0 %v10064_v0  ;;  %2356 = vmatprep.mubr.f32.mxu1 %v10064_v0  ;;  %v9030_v10 = vpack.c.bf16 %v2056_v27, %v2052_v25  ;;  %v9078_v25 = vpack.c.bf16 %v2088_v37, %v2084_v39  ;;  %v2090_v27 = vld [vmem:[#allocation12 + $0x148] sm:$0xff]  ;;  %v2112_v39 = vld [vmem:[#allocation12 + $0x1f8] sm:$0xff] }
 0x7ee   :  { %6405 = vmatprep.subr.bf16.mxu0 %v9038_v35  ;;  %v9113_v37 = vpack.c.bf16 %v2112_v39, %v2108_v38 }
 0x7ef   :  { %6433 = vmatprep.subr.bf16.mxu1 %v9030_v10  ;;  %6407 = vmatpush1.bf16.msra.mxu0 %v9040_v53 }
 0x7f0   :  { %2244 = vmatmul.mubr.f32.gmra.mrb[28].mxu0 %v8992_v19  ;;  %2357 = vmatmul.mubr.f32.gmra.mrb[30].mxu1 %v8992_v19  ;;  %v9033_v19 = vpack.c.bf16 %v2055_v26, %v2051_v58  ;;  %v9081_v58 = vpack.c.bf16 %v2087_v1, %v2083_v11  ;;  %v2094_v26 = vld [vmem:[#allocation12 + $0x168] sm:$0xff]  ;;  %v2107_v11 = vld [vmem:[#allocation12 + $0x1d0] sm:$0xff]  ;;  %v9115_v1 = vpack.c.bf16 %v2109_v56, %v2105_v48 }
 0x7f1   :  { %2249 = vmatprep.mubr.f32.mxu0 %v10064_v0  ;;  %2362 = vmatprep.mubr.f32.mxu1 %v10064_v0  ;;  %v9085_v33 = vpack.c.bf16 %v2094_v26, %v2090_v27  ;;  %v2111_v27 = vld [vmem:[#allocation12 + $0x1f0] sm:$0xff] }
 0x7f2   :  { %6435 = vmatpush1.bf16.msra.mxu1 %v9033_v19  ;;  %6409 = vmatprep.subr.bf16.mxu0 %v9050_v9  ;;  %v9118_v26 = vpack.c.bf16 %v2111_v27, %v2107_v11 }
 0x7f3   :  { %6437 = vmatprep.subr.bf16.mxu1 %v9042_v4  ;;  %6411 = vmatpush1.bf16.msra.mxu0 %v9052_v8 }
 0x7f4   :  { %6413 = vmatprep.subr.bf16.mxu0 %v9062_v55 }
 0x7f6   :  { %6439 = vmatpush1.bf16.msra.mxu1 %v9045_v31 }
 0x7f7   :  { %6441 = vmatprep.subr.bf16.mxu1 %v9054_v21  ;;  %6415 = vmatpush1.bf16.msra.mxu0 %v9064_v13 }
 0x7f8   :  { %6417 = vmatprep.subr.bf16.mxu0 %v9074_v46 }
 0x7fa   :  { %6443 = vmatpush1.bf16.msra.mxu1 %v9057_v34 }
 0x7fb   :  { %6445 = vmatprep.subr.bf16.mxu1 %v9066_v14  ;;  %6419 = vmatpush1.bf16.msra.mxu0 %v9076_v62 }
 0x7fc   :  { %6421 = vmatprep.subr.bf16.mxu0 %v9085_v33 }
 0x7fe   :  { %6447 = vmatpush1.bf16.msra.mxu1 %v9069_v28 }
 0x7ff   :  { %6449 = vmatprep.subr.bf16.mxu1 %v9078_v25  ;;  %6423 = vmatpush1.bf16.msra.mxu0 %v9087_v7 }
 0x800   :  { %6425 = vmatprep.subr.bf16.mxu0 %v9095_v50 }
 0x802   :  { %6451 = vmatpush1.bf16.msra.mxu1 %v9081_v58 }
 0x803   :  { %6453 = vmatprep.subr.bf16.mxu1 %v9090_v16  ;;  %6427 = vmatpush1.bf16.msra.mxu0 %v9099_v60 }
 0x804   :  { %6429 = vmatprep.subr.bf16.mxu0 %v9107_v30 }
 0x806   :  { %6455 = vmatpush1.bf16.msra.mxu1 %v9093_v47 }
 0x807   :  { %6457 = vmatprep.subr.bf16.mxu1 %v9101_v61  ;;  %6431 = vmatpush1.bf16.msra.mxu0 %v9115_v1 }
 0x808   :  { %6465 = vmatprep.subr.bf16.mxu0 %v9026_v51 }
 0x80a   :  { %6459 = vmatpush1.bf16.msra.mxu1 %v9105_v22 }
 0x80b   :  { %6461 = vmatprep.subr.bf16.mxu1 %v9113_v37 }
 0x80e   :  { %6463 = vmatpush1.bf16.msra.mxu1 %v9118_v26 }
 0x80f   :  { %6497 = vmatprep.subr.bf16.mxu1 %v9030_v10 }
 0x88b   :  { %v1884_v36 = vpop.f32.mrb[14].mxu0  ;;  %v1955_v40 = vpop.f32.mrb[14].mxu1 }
 0x88c   :  { %v7536_v5 = vadd.f32 %v1884_v36, %v8694_v18  ;;  %v1886_v59 = vpop.f32.mrb[15].mxu0  ;;  %v1957_v63 = vpop.f32.mrb[15].mxu1  ;;  %v7552_v2 = vadd.f32 %v1955_v40, %v8708_v45 }
 0x88d   :  { %v7537_v29 = vadd.f32 %v1886_v59, %v8697_v24  ;;  %v7553_v23 = vadd.f32 %v1957_v63, %v8711_v49 }
 0x88e   :  { %v1964_v12 = vmul.f32 0.5, %v7536_v5 }
 0x88f   :  { %v1968_v52 = vmul.f32 0.5, %v7537_v29  ;;  %v1973_v32 = vmul.f32 0.5, %v7553_v23 }
 0x890   :  { %7812 = vtanh.f32 %v1964_v12 }
 0x891   :  { %7814 = vtanh.f32 %v1968_v52 }
 0x892   :  { %7816 = vtanh.f32 %v7552_v2 }
 0x893   :  { %7818 = vtanh.f32 %v1973_v32 }
 0x89a   :  { %v7813_v42 = vpop.eup %7812 }
 0x89b   :  { %v7815_v43 = vpop.eup %7814  ;;  %v1966_v54 = vmul.f32 0.5, %v7813_v42 }
 0x89c   :  { %v1970_v6 = vmul.f32 0.5, %v7815_v43  ;;  %v7817_v20 = vpop.eup %7816 }
 0x89d   :  { %v1967_v18 = vadd.f32 0.5, %v1966_v54  ;;  %v7819_v45 = vpop.eup %7818 }
 0x89e   :  { %v1971_v38 = vadd.f32 0.5, %v1970_v6  ;;  %v1975_v56 = vmul.f32 0.5, %v7819_v45 }
 0x89f   :  { %v1978_v39 = vmul.f32 %v7817_v20, %v1967_v18 }
 0x8a0   :  { %v1977_v24 = vmul.f32 %v1971_v38, %v8989_v57  ;;  %v1976_v11 = vadd.f32 0.5, %v1975_v56  ;;  %v2113_v57 = vld [vmem:[%s10047_s6] sm:$0xf] }
 0x8a1   :  { %v9171_v36 = vrot.slane %v2113_v57, %v8688_v15  ;;  %v9174_v40 = vrot.slane %v2113_v57, %v8691_v17  ;;  %v9178_v29 = vrot.slane %v2113_v57, %v8702_v41  ;;  %v9183_v43 = vrot.slane %v2113_v57, %v8705_v44 }
 0x8a2   :  { %v1979_v48 = vadd.f32 %v1978_v39, %v1977_v24 }
 0x8a4   :  { %7820 = vtanh.f32 %v1979_v48  ;;  %1984 = vst [vmem:[#allocation19] sm:$0xff] %v1979_v48 }
 0x8ae   :  { %v7821_v27 = vpop.eup %7820 }
 0x8af   :  { %v1981_v49 = vmul.f32 %v7821_v27, %v1976_v11 }
 0x8b1   :  { %2250 = vmatmul.mubr.f32.gmra.mrb[30].mxu0 %v1981_v49  ;;  %1983 = vst [vmem:[#allocation18] sm:$0xff] %v1981_v49  ;;  %2363 = vmatmul.mubr.f32.gmra.mrb[32].mxu1 %v1981_v49 }
 0x8b2   :  { %2433 = vmatprep.mubr.f32.mxu0 %v10064_v0  ;;  %2504 = vmatprep.mubr.f32.mxu1 %v10064_v0 }
 0x8b5   :  { %2434 = vmatmul.mubr.f32.vlgmr.msra.gmra.mrb[16].mxu0 %v10064_v0  ;;  %2505 = vmatmul.mubr.f32.vlgmr.msra.gmra.mrb[18].mxu1 %v10064_v0 }
 0x8b6   :  { %6467 = vmatpush1.bf16.msra.mxu0 %v9028_v3  ;;  %6499 = vmatpush1.bf16.msra.mxu1 %v9033_v19 }
 0x8b7   :  { %6469 = vmatprep.subr.bf16.mxu0 %v9038_v35  ;;  %6501 = vmatprep.subr.bf16.mxu1 %v9042_v4 }
 0x8b8   :  { %2598 = vmatprep.mubr.f32.mxu0 %v10064_v0  ;;  %2669 = vmatprep.mubr.f32.mxu1 %v10064_v0 }
 0x8ba   :  { %6471 = vmatpush1.bf16.msra.mxu0 %v9040_v53  ;;  %6503 = vmatpush1.bf16.msra.mxu1 %v9045_v31 }
 0x8bb   :  { %6473 = vmatprep.subr.bf16.mxu0 %v9050_v9  ;;  %6505 = vmatprep.subr.bf16.mxu1 %v9054_v21 }
 0x8be   :  { %6475 = vmatpush1.bf16.msra.mxu0 %v9052_v8  ;;  %6507 = vmatpush1.bf16.msra.mxu1 %v9057_v34 }
 0x8bf   :  { %6477 = vmatprep.subr.bf16.mxu0 %v9062_v55  ;;  %6509 = vmatprep.subr.bf16.mxu1 %v9066_v14 }
 0x8c2   :  { %6479 = vmatpush1.bf16.msra.mxu0 %v9064_v13  ;;  %6511 = vmatpush1.bf16.msra.mxu1 %v9069_v28 }
 0x8c3   :  { %6481 = vmatprep.subr.bf16.mxu0 %v9074_v46  ;;  %6513 = vmatprep.subr.bf16.mxu1 %v9078_v25 }
 0x8c6   :  { %6483 = vmatpush1.bf16.msra.mxu0 %v9076_v62  ;;  %6515 = vmatpush1.bf16.msra.mxu1 %v9081_v58 }
 0x8c7   :  { %6485 = vmatprep.subr.bf16.mxu0 %v9085_v33  ;;  %6517 = vmatprep.subr.bf16.mxu1 %v9090_v16 }
 0x8ca   :  { %6487 = vmatpush1.bf16.msra.mxu0 %v9087_v7  ;;  %6519 = vmatpush1.bf16.msra.mxu1 %v9093_v47 }
 0x8cb   :  { %6489 = vmatprep.subr.bf16.mxu0 %v9095_v50  ;;  %6521 = vmatprep.subr.bf16.mxu1 %v9101_v61 }
 0x8ce   :  { %6491 = vmatpush1.bf16.msra.mxu0 %v9099_v60  ;;  %6523 = vmatpush1.bf16.msra.mxu1 %v9105_v22 }
 0x8cf   :  { %6493 = vmatprep.subr.bf16.mxu0 %v9107_v30  ;;  %6525 = vmatprep.subr.bf16.mxu1 %v9113_v37 }
 0x8d2   :  { %6495 = vmatpush1.bf16.msra.mxu0 %v9115_v1  ;;  %6527 = vmatpush1.bf16.msra.mxu1 %v9118_v26 }
 0x8d3   :  { %6529 = vmatprep.subr.bf16.mxu0 %v9026_v51  ;;  %6561 = vmatprep.subr.bf16.mxu1 %v9030_v10 }
 0x988   :  { %v2435_v5 = vpop.f32.mrb[16].mxu0  ;;  %v2506_v59 = vpop.f32.mrb[18].mxu1 }
 0x989   :  { %v7554_v63 = vadd.f32 %v2435_v5, %v9171_v36  ;;  %v2437_v12 = vpop.f32.mrb[17].mxu0  ;;  %v2508_v52 = vpop.f32.mrb[19].mxu1  ;;  %v7570_v42 = vadd.f32 %v2506_v59, %v9178_v29 }
 0x98a   :  { %v7555_v2 = vadd.f32 %v2437_v12, %v9174_v40  ;;  %v7571_v54 = vadd.f32 %v2508_v52, %v9183_v43 }
 0x98b   :  { %v2515_v23 = vmul.f32 0.5, %v7554_v63 }
 0x98c   :  { %v2519_v32 = vmul.f32 0.5, %v7555_v2  ;;  %v2524_v6 = vmul.f32 0.5, %v7571_v54 }
 0x98d   :  { %7822 = vtanh.f32 %v2515_v23 }
 0x98e   :  { %7824 = vtanh.f32 %v2519_v32 }
 0x98f   :  { %7826 = vtanh.f32 %v7570_v42 }
 0x990   :  { %7828 = vtanh.f32 %v2524_v6 }
 0x997   :  { %v7823_v18 = vpop.eup %7822 }
 0x998   :  { %v7825_v20 = vpop.eup %7824  ;;  %v2517_v38 = vmul.f32 0.5, %v7823_v18 }
 0x999   :  { %v2521_v39 = vmul.f32 0.5, %v7825_v20  ;;  %v7827_v48 = vpop.eup %7826 }
 0x99a   :  { %v2518_v24 = vadd.f32 0.5, %v2517_v38  ;;  %v7829_v49 = vpop.eup %7828 }
 0x99b   :  { %v2522_v45 = vadd.f32 0.5, %v2521_v39  ;;  %v2526_v57 = vmul.f32 0.5, %v7829_v49 }
 0x99c   :  { %v2529_v56 = vmul.f32 %v7827_v48, %v2518_v24 }
 0x99d   :  { %v2528_v11 = vmul.f32 0.0, %v2522_v45  ;;  %v2527_v5 = vadd.f32 0.5, %v2526_v57 }
 0x99f   :  { %v9186_v27 = vadd.f32 %v2529_v56, %v2528_v11 }
 0x9a1   :  { %7830 = vtanh.f32 %v9186_v27 }
 0x9ab   :  { %v7831_v59 = vpop.eup %7830 }
 0x9ac   :  { %v9189_v63 = vmul.f32 %v7831_v59, %v2527_v5 }
 0x9ae   :  { %2599 = vmatmul.mubr.f32.vlgmr.msra.gmra.mrb[18].mxu0 %v9189_v63  ;;  %2670 = vmatmul.mubr.f32.vlgmr.msra.gmra.mrb[20].mxu1 %v9189_v63 }
 0x9af   :  { %6531 = vmatpush1.bf16.msra.mxu0 %v9028_v3  ;;  %6563 = vmatpush1.bf16.msra.mxu1 %v9033_v19 }
 0x9b0   :  { %6533 = vmatprep.subr.bf16.mxu0 %v9038_v35  ;;  %6565 = vmatprep.subr.bf16.mxu1 %v9042_v4 }
 0x9b1   :  { %2763 = vmatprep.mubr.f32.mxu0 %v10064_v0  ;;  %2834 = vmatprep.mubr.f32.mxu1 %v10064_v0 }
 0x9b3   :  { %6535 = vmatpush1.bf16.msra.mxu0 %v9040_v53  ;;  %6567 = vmatpush1.bf16.msra.mxu1 %v9045_v31 }
 0x9b4   :  { %6537 = vmatprep.subr.bf16.mxu0 %v9050_v9  ;;  %6569 = vmatprep.subr.bf16.mxu1 %v9054_v21 }
 0x9b7   :  { %6539 = vmatpush1.bf16.msra.mxu0 %v9052_v8  ;;  %6571 = vmatpush1.bf16.msra.mxu1 %v9057_v34 }
 0x9b8   :  { %6541 = vmatprep.subr.bf16.mxu0 %v9062_v55  ;;  %6573 = vmatprep.subr.bf16.mxu1 %v9066_v14 }
 0x9bb   :  { %6543 = vmatpush1.bf16.msra.mxu0 %v9064_v13  ;;  %6575 = vmatpush1.bf16.msra.mxu1 %v9069_v28 }
 0x9bc   :  { %6545 = vmatprep.subr.bf16.mxu0 %v9074_v46  ;;  %6577 = vmatprep.subr.bf16.mxu1 %v9078_v25 }
 0x9bf   :  { %6547 = vmatpush1.bf16.msra.mxu0 %v9076_v62  ;;  %6579 = vmatpush1.bf16.msra.mxu1 %v9081_v58 }
 0x9c0   :  { %6549 = vmatprep.subr.bf16.mxu0 %v9085_v33  ;;  %6581 = vmatprep.subr.bf16.mxu1 %v9090_v16 }
 0x9c3   :  { %6551 = vmatpush1.bf16.msra.mxu0 %v9087_v7  ;;  %6583 = vmatpush1.bf16.msra.mxu1 %v9093_v47 }
 0x9c4   :  { %6553 = vmatprep.subr.bf16.mxu0 %v9095_v50  ;;  %6585 = vmatprep.subr.bf16.mxu1 %v9101_v61 }
 0x9c7   :  { %6555 = vmatpush1.bf16.msra.mxu0 %v9099_v60  ;;  %6587 = vmatpush1.bf16.msra.mxu1 %v9105_v22 }
 0x9c8   :  { %6557 = vmatprep.subr.bf16.mxu0 %v9107_v30  ;;  %6589 = vmatprep.subr.bf16.mxu1 %v9113_v37 }
 0x9cb   :  { %6559 = vmatpush1.bf16.msra.mxu0 %v9115_v1  ;;  %6591 = vmatpush1.bf16.msra.mxu1 %v9118_v26 }
 0x9cc   :  { %6593 = vmatprep.subr.bf16.mxu0 %v9026_v51  ;;  %6625 = vmatprep.subr.bf16.mxu1 %v9030_v10 }
 0xa81   :  { %v2600_v12 = vpop.f32.mrb[18].mxu0  ;;  %v2671_v52 = vpop.f32.mrb[20].mxu1 }
 0xa82   :  { %v7556_v2 = vadd.f32 %v2600_v12, %v9171_v36  ;;  %v2602_v23 = vpop.f32.mrb[19].mxu0  ;;  %v2673_v32 = vpop.f32.mrb[21].mxu1  ;;  %v7572_v18 = vadd.f32 %v2671_v52, %v9178_v29 }
 0xa83   :  { %v7557_v42 = vadd.f32 %v2602_v23, %v9174_v40  ;;  %v7573_v20 = vadd.f32 %v2673_v32, %v9183_v43 }
 0xa84   :  { %v2680_v54 = vmul.f32 0.5, %v7556_v2 }
 0xa85   :  { %v2684_v6 = vmul.f32 0.5, %v7557_v42  ;;  %v2689_v38 = vmul.f32 0.5, %v7573_v20 }
 0xa86   :  { %7832 = vtanh.f32 %v2680_v54 }
 0xa87   :  { %7834 = vtanh.f32 %v2684_v6 }
 0xa88   :  { %7836 = vtanh.f32 %v7572_v18 }
 0xa89   :  { %7838 = vtanh.f32 %v2689_v38 }
 0xa90   :  { %v7833_v39 = vpop.eup %7832 }
 0xa91   :  { %v7835_v24 = vpop.eup %7834  ;;  %v2682_v48 = vmul.f32 0.5, %v7833_v39 }
 0xa92   :  { %v2686_v45 = vmul.f32 0.5, %v7835_v24  ;;  %v7837_v11 = vpop.eup %7836 }
 0xa93   :  { %v2683_v56 = vadd.f32 0.5, %v2682_v48  ;;  %v7839_v12 = vpop.eup %7838 }
 0xa94   :  { %v2687_v49 = vadd.f32 0.5, %v2686_v45  ;;  %v2691_v52 = vmul.f32 0.5, %v7839_v12 }
 0xa95   :  { %v2694_v57 = vmul.f32 %v7837_v11, %v2683_v56 }
 0xa96   :  { %v2693_v5 = vmul.f32 %v2687_v49, %v9186_v27  ;;  %v2692_v2 = vadd.f32 0.5, %v2691_v52 }
 0xa98   :  { %v9232_v59 = vadd.f32 %v2694_v57, %v2693_v5 }
 0xa9a   :  { %7840 = vtanh.f32 %v9232_v59 }
 0xaa4   :  { %v7841_v23 = vpop.eup %7840 }
 0xaa5   :  { %v9235_v32 = vmul.f32 %v7841_v23, %v2692_v2 }
 0xaa7   :  { %2764 = vmatmul.mubr.f32.vlgmr.msra.gmra.mrb[20].mxu0 %v9235_v32  ;;  %2835 = vmatmul.mubr.f32.vlgmr.msra.gmra.mrb[22].mxu1 %v9235_v32 }
 0xaa8   :  { %6595 = vmatpush1.bf16.msra.mxu0 %v9028_v3  ;;  %6627 = vmatpush1.bf16.msra.mxu1 %v9033_v19 }
 0xaa9   :  { %6597 = vmatprep.subr.bf16.mxu0 %v9038_v35  ;;  %6629 = vmatprep.subr.bf16.mxu1 %v9042_v4 }
 0xaaa   :  { %2928 = vmatprep.mubr.f32.mxu0 %v10064_v0  ;;  %2999 = vmatprep.mubr.f32.mxu1 %v10064_v0 }
 0xaac   :  { %6599 = vmatpush1.bf16.msra.mxu0 %v9040_v53  ;;  %6631 = vmatpush1.bf16.msra.mxu1 %v9045_v31 }
 0xaad   :  { %6601 = vmatprep.subr.bf16.mxu0 %v9050_v9  ;;  %6633 = vmatprep.subr.bf16.mxu1 %v9054_v21 }
 0xab0   :  { %6603 = vmatpush1.bf16.msra.mxu0 %v9052_v8  ;;  %6635 = vmatpush1.bf16.msra.mxu1 %v9057_v34 }
 0xab1   :  { %6605 = vmatprep.subr.bf16.mxu0 %v9062_v55  ;;  %6637 = vmatprep.subr.bf16.mxu1 %v9066_v14 }
 0xab4   :  { %6607 = vmatpush1.bf16.msra.mxu0 %v9064_v13  ;;  %6639 = vmatpush1.bf16.msra.mxu1 %v9069_v28 }
 0xab5   :  { %6609 = vmatprep.subr.bf16.mxu0 %v9074_v46  ;;  %6641 = vmatprep.subr.bf16.mxu1 %v9078_v25 }
 0xab8   :  { %6611 = vmatpush1.bf16.msra.mxu0 %v9076_v62  ;;  %6643 = vmatpush1.bf16.msra.mxu1 %v9081_v58 }
 0xab9   :  { %6613 = vmatprep.subr.bf16.mxu0 %v9085_v33  ;;  %6645 = vmatprep.subr.bf16.mxu1 %v9090_v16 }
 0xabc   :  { %6615 = vmatpush1.bf16.msra.mxu0 %v9087_v7  ;;  %6647 = vmatpush1.bf16.msra.mxu1 %v9093_v47 }
 0xabd   :  { %6617 = vmatprep.subr.bf16.mxu0 %v9095_v50  ;;  %6649 = vmatprep.subr.bf16.mxu1 %v9101_v61 }
 0xac0   :  { %6619 = vmatpush1.bf16.msra.mxu0 %v9099_v60  ;;  %6651 = vmatpush1.bf16.msra.mxu1 %v9105_v22 }
 0xac1   :  { %6621 = vmatprep.subr.bf16.mxu0 %v9107_v30  ;;  %6653 = vmatprep.subr.bf16.mxu1 %v9113_v37 }
 0xac4   :  { %6623 = vmatpush1.bf16.msra.mxu0 %v9115_v1  ;;  %6655 = vmatpush1.bf16.msra.mxu1 %v9118_v26 }
 0xac5   :  { %6657 = vmatprep.subr.bf16.mxu0 %v9026_v51  ;;  %6689 = vmatprep.subr.bf16.mxu1 %v9030_v10 }
 0xb7a   :  { %v2765_v27 = vpop.f32.mrb[20].mxu0  ;;  %v2836_v42 = vpop.f32.mrb[22].mxu1 }
 0xb7b   :  { %v7558_v54 = vadd.f32 %v2765_v27, %v9171_v36  ;;  %v2767_v6 = vpop.f32.mrb[21].mxu0  ;;  %v2838_v18 = vpop.f32.mrb[23].mxu1  ;;  %v7574_v24 = vadd.f32 %v2836_v42, %v9178_v29 }
 0xb7c   :  { %v7559_v20 = vadd.f32 %v2767_v6, %v9174_v40  ;;  %v7575_v48 = vadd.f32 %v2838_v18, %v9183_v43 }
 0xb7d   :  { %v2845_v38 = vmul.f32 0.5, %v7558_v54 }
 0xb7e   :  { %v2849_v39 = vmul.f32 0.5, %v7559_v20  ;;  %v2854_v45 = vmul.f32 0.5, %v7575_v48 }
 0xb7f   :  { %7842 = vtanh.f32 %v2845_v38 }
 0xb80   :  { %7844 = vtanh.f32 %v2849_v39 }
 0xb81   :  { %7846 = vtanh.f32 %v7574_v24 }
 0xb82   :  { %7848 = vtanh.f32 %v2854_v45 }
 0xb89   :  { %v7843_v56 = vpop.eup %7842 }
 0xb8a   :  { %v7845_v11 = vpop.eup %7844  ;;  %v2847_v49 = vmul.f32 0.5, %v7843_v56 }
 0xb8b   :  { %v2851_v57 = vmul.f32 0.5, %v7845_v11  ;;  %v7847_v12 = vpop.eup %7846 }
 0xb8c   :  { %v2848_v5 = vadd.f32 0.5, %v2847_v49  ;;  %v7849_v42 = vpop.eup %7848 }
 0xb8d   :  { %v2852_v52 = vadd.f32 0.5, %v2851_v57  ;;  %v2856_v54 = vmul.f32 0.5, %v7849_v42 }
 0xb8e   :  { %v2859_v2 = vmul.f32 %v7847_v12, %v2848_v5 }
 0xb8f   :  { %v2858_v23 = vmul.f32 %v2852_v52, %v9232_v59  ;;  %v2857_v6 = vadd.f32 0.5, %v2856_v54 }
 0xb91   :  { %v9278_v27 = vadd.f32 %v2859_v2, %v2858_v23 }
 0xb93   :  { %7850 = vtanh.f32 %v9278_v27 }
 0xb9d   :  { %v7851_v18 = vpop.eup %7850 }
 0xb9e   :  { %v9281_v20 = vmul.f32 %v7851_v18, %v2857_v6 }
 0xba0   :  { %2929 = vmatmul.mubr.f32.vlgmr.msra.gmra.mrb[22].mxu0 %v9281_v20  ;;  %3000 = vmatmul.mubr.f32.vlgmr.msra.gmra.mrb[24].mxu1 %v9281_v20 }
 0xba1   :  { %6659 = vmatpush1.bf16.msra.mxu0 %v9028_v3  ;;  %6691 = vmatpush1.bf16.msra.mxu1 %v9033_v19 }
 0xba2   :  { %6661 = vmatprep.subr.bf16.mxu0 %v9038_v35  ;;  %6693 = vmatprep.subr.bf16.mxu1 %v9042_v4 }
 0xba3   :  { %3093 = vmatprep.mubr.f32.mxu0 %v10064_v0  ;;  %3164 = vmatprep.mubr.f32.mxu1 %v10064_v0 }
 0xba5   :  { %6663 = vmatpush1.bf16.msra.mxu0 %v9040_v53  ;;  %6695 = vmatpush1.bf16.msra.mxu1 %v9045_v31 }
 0xba6   :  { %6665 = vmatprep.subr.bf16.mxu0 %v9050_v9  ;;  %6697 = vmatprep.subr.bf16.mxu1 %v9054_v21 }
 0xba9   :  { %6667 = vmatpush1.bf16.msra.mxu0 %v9052_v8  ;;  %6699 = vmatpush1.bf16.msra.mxu1 %v9057_v34 }
 0xbaa   :  { %6669 = vmatprep.subr.bf16.mxu0 %v9062_v55  ;;  %6701 = vmatprep.subr.bf16.mxu1 %v9066_v14 }
 0xbad   :  { %6671 = vmatpush1.bf16.msra.mxu0 %v9064_v13  ;;  %6703 = vmatpush1.bf16.msra.mxu1 %v9069_v28 }
 0xbae   :  { %6673 = vmatprep.subr.bf16.mxu0 %v9074_v46  ;;  %6705 = vmatprep.subr.bf16.mxu1 %v9078_v25 }
 0xbb1   :  { %6675 = vmatpush1.bf16.msra.mxu0 %v9076_v62  ;;  %6707 = vmatpush1.bf16.msra.mxu1 %v9081_v58 }
 0xbb2   :  { %6677 = vmatprep.subr.bf16.mxu0 %v9085_v33  ;;  %6709 = vmatprep.subr.bf16.mxu1 %v9090_v16 }
 0xbb5   :  { %6679 = vmatpush1.bf16.msra.mxu0 %v9087_v7  ;;  %6711 = vmatpush1.bf16.msra.mxu1 %v9093_v47 }
 0xbb6   :  { %6681 = vmatprep.subr.bf16.mxu0 %v9095_v50  ;;  %6713 = vmatprep.subr.bf16.mxu1 %v9101_v61 }
 0xbb9   :  { %6683 = vmatpush1.bf16.msra.mxu0 %v9099_v60  ;;  %6715 = vmatpush1.bf16.msra.mxu1 %v9105_v22 }
 0xbba   :  { %6685 = vmatprep.subr.bf16.mxu0 %v9107_v30  ;;  %6717 = vmatprep.subr.bf16.mxu1 %v9113_v37 }
 0xbbd   :  { %6687 = vmatpush1.bf16.msra.mxu0 %v9115_v1  ;;  %6719 = vmatpush1.bf16.msra.mxu1 %v9118_v26 }
 0xbbe   :  { %6721 = vmatprep.subr.bf16.mxu0 %v9026_v51  ;;  %6753 = vmatprep.subr.bf16.mxu1 %v9030_v10 }
 0xc73   :  { %v2930_v59 = vpop.f32.mrb[22].mxu0  ;;  %v3001_v38 = vpop.f32.mrb[24].mxu1 }
 0xc74   :  { %v7560_v39 = vadd.f32 %v2930_v59, %v9171_v36  ;;  %v2932_v24 = vpop.f32.mrb[23].mxu0  ;;  %v3003_v48 = vpop.f32.mrb[25].mxu1  ;;  %v7576_v49 = vadd.f32 %v3001_v38, %v9178_v29 }
 0xc75   :  { %v7561_v45 = vadd.f32 %v2932_v24, %v9174_v40  ;;  %v7577_v57 = vadd.f32 %v3003_v48, %v9183_v43 }
 0xc76   :  { %v3010_v56 = vmul.f32 0.5, %v7560_v39 }
 0xc77   :  { %v3014_v11 = vmul.f32 0.5, %v7561_v45  ;;  %v3019_v5 = vmul.f32 0.5, %v7577_v57 }
 0xc78   :  { %7852 = vtanh.f32 %v3010_v56 }
 0xc79   :  { %7854 = vtanh.f32 %v3014_v11 }
 0xc7a   :  { %7856 = vtanh.f32 %v7576_v49 }
 0xc7b   :  { %7858 = vtanh.f32 %v3019_v5 }
 0xc82   :  { %v7853_v12 = vpop.eup %7852 }
 0xc83   :  { %v7855_v52 = vpop.eup %7854  ;;  %v3012_v2 = vmul.f32 0.5, %v7853_v12 }
 0xc84   :  { %v3016_v23 = vmul.f32 0.5, %v7855_v52  ;;  %v7857_v54 = vpop.eup %7856 }
 0xc85   :  { %v3013_v42 = vadd.f32 0.5, %v3012_v2  ;;  %v7859_v38 = vpop.eup %7858 }
 0xc86   :  { %v3017_v6 = vadd.f32 0.5, %v3016_v23  ;;  %v3021_v24 = vmul.f32 0.5, %v7859_v38 }
 0xc87   :  { %v3024_v18 = vmul.f32 %v7857_v54, %v3013_v42 }
 0xc88   :  { %v3023_v59 = vmul.f32 %v3017_v6, %v9278_v27  ;;  %v3022_v45 = vadd.f32 0.5, %v3021_v24 }
 0xc8a   :  { %v9324_v39 = vadd.f32 %v3024_v18, %v3023_v59 }
 0xc8c   :  { %7860 = vtanh.f32 %v9324_v39 }
 0xc96   :  { %v7861_v48 = vpop.eup %7860 }
 0xc97   :  { %v9327_v56 = vmul.f32 %v7861_v48, %v3022_v45 }
 0xc99   :  { %3094 = vmatmul.mubr.f32.vlgmr.msra.gmra.mrb[24].mxu0 %v9327_v56  ;;  %3165 = vmatmul.mubr.f32.vlgmr.msra.gmra.mrb[26].mxu1 %v9327_v56 }
 0xc9a   :  { %6723 = vmatpush1.bf16.msra.mxu0 %v9028_v3  ;;  %6755 = vmatpush1.bf16.msra.mxu1 %v9033_v19 }
 0xc9b   :  { %6725 = vmatprep.subr.bf16.mxu0 %v9038_v35  ;;  %6757 = vmatprep.subr.bf16.mxu1 %v9042_v4 }
 0xc9c   :  { %3258 = vmatprep.mubr.f32.mxu0 %v10064_v0  ;;  %3329 = vmatprep.mubr.f32.mxu1 %v10064_v0 }
 0xc9e   :  { %6727 = vmatpush1.bf16.msra.mxu0 %v9040_v53  ;;  %6759 = vmatpush1.bf16.msra.mxu1 %v9045_v31 }
 0xc9f   :  { %6729 = vmatprep.subr.bf16.mxu0 %v9050_v9  ;;  %6761 = vmatprep.subr.bf16.mxu1 %v9054_v21 }
 0xca2   :  { %6731 = vmatpush1.bf16.msra.mxu0 %v9052_v8  ;;  %6763 = vmatpush1.bf16.msra.mxu1 %v9057_v34 }
 0xca3   :  { %6733 = vmatprep.subr.bf16.mxu0 %v9062_v55  ;;  %6765 = vmatprep.subr.bf16.mxu1 %v9066_v14 }
 0xca6   :  { %6735 = vmatpush1.bf16.msra.mxu0 %v9064_v13  ;;  %6767 = vmatpush1.bf16.msra.mxu1 %v9069_v28 }
 0xca7   :  { %6737 = vmatprep.subr.bf16.mxu0 %v9074_v46  ;;  %6769 = vmatprep.subr.bf16.mxu1 %v9078_v25 }
 0xcaa   :  { %6739 = vmatpush1.bf16.msra.mxu0 %v9076_v62  ;;  %6771 = vmatpush1.bf16.msra.mxu1 %v9081_v58 }
 0xcab   :  { %6741 = vmatprep.subr.bf16.mxu0 %v9085_v33  ;;  %6773 = vmatprep.subr.bf16.mxu1 %v9090_v16 }
 0xcae   :  { %6743 = vmatpush1.bf16.msra.mxu0 %v9087_v7  ;;  %6775 = vmatpush1.bf16.msra.mxu1 %v9093_v47 }
 0xcaf   :  { %6745 = vmatprep.subr.bf16.mxu0 %v9095_v50  ;;  %6777 = vmatprep.subr.bf16.mxu1 %v9101_v61 }
 0xcb2   :  { %6747 = vmatpush1.bf16.msra.mxu0 %v9099_v60  ;;  %6779 = vmatpush1.bf16.msra.mxu1 %v9105_v22 }
 0xcb3   :  { %6749 = vmatprep.subr.bf16.mxu0 %v9107_v30  ;;  %6781 = vmatprep.subr.bf16.mxu1 %v9113_v37 }
 0xcb6   :  { %6751 = vmatpush1.bf16.msra.mxu0 %v9115_v1  ;;  %6783 = vmatpush1.bf16.msra.mxu1 %v9118_v26 }
 0xcb7   :  { %6785 = vmatprep.subr.bf16.mxu0 %v9026_v51  ;;  %6817 = vmatprep.subr.bf16.mxu1 %v9030_v10 }
 0xd6c   :  { %v3095_v27 = vpop.f32.mrb[24].mxu0  ;;  %v3166_v11 = vpop.f32.mrb[26].mxu1 }
 0xd6d   :  { %v7562_v49 = vadd.f32 %v3095_v27, %v9171_v36  ;;  %v3097_v57 = vpop.f32.mrb[25].mxu0  ;;  %v3168_v5 = vpop.f32.mrb[27].mxu1  ;;  %v7578_v23 = vadd.f32 %v3166_v11, %v9178_v29 }
 0xd6e   :  { %v7563_v12 = vadd.f32 %v3097_v57, %v9174_v40  ;;  %v7579_v42 = vadd.f32 %v3168_v5, %v9183_v43 }
 0xd6f   :  { %v3175_v52 = vmul.f32 0.5, %v7562_v49 }
 0xd70   :  { %v3179_v2 = vmul.f32 0.5, %v7563_v12  ;;  %v3184_v54 = vmul.f32 0.5, %v7579_v42 }
 0xd71   :  { %7862 = vtanh.f32 %v3175_v52 }
 0xd72   :  { %7864 = vtanh.f32 %v3179_v2 }
 0xd73   :  { %7866 = vtanh.f32 %v7578_v23 }
 0xd74   :  { %7868 = vtanh.f32 %v3184_v54 }
 0xd7b   :  { %v7863_v6 = vpop.eup %7862 }
 0xd7c   :  { %v7865_v18 = vpop.eup %7864  ;;  %v3177_v59 = vmul.f32 0.5, %v7863_v6 }
 0xd7d   :  { %v3181_v38 = vmul.f32 0.5, %v7865_v18  ;;  %v7867_v45 = vpop.eup %7866 }
 0xd7e   :  { %v3178_v24 = vadd.f32 0.5, %v3177_v59  ;;  %v7869_v11 = vpop.eup %7868 }
 0xd7f   :  { %v3182_v48 = vadd.f32 0.5, %v3181_v38  ;;  %v3186_v12 = vmul.f32 0.5, %v7869_v11 }
 0xd80   :  { %v3189_v27 = vmul.f32 %v7867_v45, %v3178_v24 }
 0xd81   :  { %v3188_v49 = vmul.f32 %v3182_v48, %v9324_v39  ;;  %v3187_v52 = vadd.f32 0.5, %v3186_v12 }
 0xd83   :  { %v9370_v57 = vadd.f32 %v3189_v27, %v3188_v49 }
 0xd85   :  { %7870 = vtanh.f32 %v9370_v57 }
 0xd8f   :  { %v7871_v5 = vpop.eup %7870 }
 0xd90   :  { %v9373_v2 = vmul.f32 %v7871_v5, %v3187_v52 }
 0xd92   :  { %3259 = vmatmul.mubr.f32.vlgmr.msra.gmra.mrb[26].mxu0 %v9373_v2  ;;  %3330 = vmatmul.mubr.f32.vlgmr.msra.gmra.mrb[28].mxu1 %v9373_v2 }
 0xd93   :  { %6787 = vmatpush1.bf16.msra.mxu0 %v9028_v3  ;;  %6819 = vmatpush1.bf16.msra.mxu1 %v9033_v19 }
 0xd94   :  { %6789 = vmatprep.subr.bf16.mxu0 %v9038_v35  ;;  %6821 = vmatprep.subr.bf16.mxu1 %v9042_v4 }
 0xd95   :  { %3423 = vmatprep.mubr.f32.mxu0 %v10064_v0  ;;  %3494 = vmatprep.mubr.f32.mxu1 %v10064_v0 }
 0xd97   :  { %6791 = vmatpush1.bf16.msra.mxu0 %v9040_v53  ;;  %6823 = vmatpush1.bf16.msra.mxu1 %v9045_v31 }
 0xd98   :  { %6793 = vmatprep.subr.bf16.mxu0 %v9050_v9  ;;  %6825 = vmatprep.subr.bf16.mxu1 %v9054_v21 }
 0xd9b   :  { %6795 = vmatpush1.bf16.msra.mxu0 %v9052_v8  ;;  %6827 = vmatpush1.bf16.msra.mxu1 %v9057_v34 }
 0xd9c   :  { %6797 = vmatprep.subr.bf16.mxu0 %v9062_v55  ;;  %6829 = vmatprep.subr.bf16.mxu1 %v9066_v14 }
 0xd9f   :  { %6799 = vmatpush1.bf16.msra.mxu0 %v9064_v13  ;;  %6831 = vmatpush1.bf16.msra.mxu1 %v9069_v28 }
 0xda0   :  { %6801 = vmatprep.subr.bf16.mxu0 %v9074_v46  ;;  %6833 = vmatprep.subr.bf16.mxu1 %v9078_v25 }
 0xda3   :  { %6803 = vmatpush1.bf16.msra.mxu0 %v9076_v62  ;;  %6835 = vmatpush1.bf16.msra.mxu1 %v9081_v58 }
 0xda4   :  { %6805 = vmatprep.subr.bf16.mxu0 %v9085_v33  ;;  %6837 = vmatprep.subr.bf16.mxu1 %v9090_v16 }
 0xda7   :  { %6807 = vmatpush1.bf16.msra.mxu0 %v9087_v7  ;;  %6839 = vmatpush1.bf16.msra.mxu1 %v9093_v47 }
 0xda8   :  { %6809 = vmatprep.subr.bf16.mxu0 %v9095_v50  ;;  %6841 = vmatprep.subr.bf16.mxu1 %v9101_v61 }
 0xdab   :  { %6811 = vmatpush1.bf16.msra.mxu0 %v9099_v60  ;;  %6843 = vmatpush1.bf16.msra.mxu1 %v9105_v22 }
 0xdac   :  { %6813 = vmatprep.subr.bf16.mxu0 %v9107_v30  ;;  %6845 = vmatprep.subr.bf16.mxu1 %v9113_v37 }
 0xdaf   :  { %6815 = vmatpush1.bf16.msra.mxu0 %v9115_v1  ;;  %6847 = vmatpush1.bf16.msra.mxu1 %v9118_v26 }
 0xdb0   :  { %6849 = vmatprep.subr.bf16.mxu0 %v9026_v51  ;;  %6881 = vmatprep.subr.bf16.mxu1 %v9030_v10 }
 0xe65   :  { %v3260_v39 = vpop.f32.mrb[26].mxu0  ;;  %v3331_v23 = vpop.f32.mrb[28].mxu1 }
 0xe66   :  { %v7564_v42 = vadd.f32 %v3260_v39, %v9171_v36  ;;  %v3262_v54 = vpop.f32.mrb[27].mxu0  ;;  %v3333_v6 = vpop.f32.mrb[29].mxu1  ;;  %v7580_v24 = vadd.f32 %v3331_v23, %v9178_v29 }
 0xe67   :  { %v7565_v18 = vadd.f32 %v3262_v54, %v9174_v40  ;;  %v7581_v45 = vadd.f32 %v3333_v6, %v9183_v43 }
 0xe68   :  { %v3340_v59 = vmul.f32 0.5, %v7564_v42 }
 0xe69   :  { %v3344_v38 = vmul.f32 0.5, %v7565_v18  ;;  %v3349_v51 = vmul.f32 0.5, %v7581_v45  ;;  %v3702_v45 = vld [vmem:[#allocation14 + $0x48] sm:$0xff] }
 0xe6a   :  { %7872 = vtanh.f32 %v3340_v59 }
 0xe6b   :  { %7874 = vtanh.f32 %v3344_v38  ;;  %v3695_v38 = vld [vmem:[#allocation14 + $0x10] sm:$0xff] }
 0xe6c   :  { %7876 = vtanh.f32 %v7580_v24  ;;  %v3699_v24 = vld [vmem:[#allocation14 + $0x30] sm:$0xff] }
 0xe6d   :  { %7878 = vtanh.f32 %v3349_v51  ;;  %v3706_v51 = vld [vmem:[#allocation14 + $0x68] sm:$0xff] }
 0xe74   :  { %v7873_v48 = vpop.eup %7872 }
 0xe75   :  { %v7875_v10 = vpop.eup %7874  ;;  %v3342_v27 = vmul.f32 0.5, %v7873_v48  ;;  %v3704_v48 = vld [vmem:[#allocation14 + $0x58] sm:$0xff] }
 0xe76   :  { %v3346_v49 = vmul.f32 0.5, %v7875_v10  ;;  %v7877_v12 = vpop.eup %7876  ;;  %v3708_v10 = vld [vmem:[#allocation14 + $0x78] sm:$0xff] }
 0xe77   :  { %v3343_v11 = vadd.f32 0.5, %v3342_v27  ;;  %v7879_v23 = vpop.eup %7878 }
 0xe78   :  { %v3347_v52 = vadd.f32 0.5, %v3346_v49  ;;  %v3351_v54 = vmul.f32 0.5, %v7879_v23  ;;  %v6948_v23 = vpack.c.bf16 %v3708_v10, %v3704_v48  ;;  %v3731_v48 = vld [vmem:[#allocation14 + $0x130] sm:$0xff]  ;;  %v3734_v10 = vld [vmem:[#allocation14 + $0x148] sm:$0xff] }
 0xe79   :  { %v3354_v5 = vmul.f32 %v7877_v12, %v3343_v11  ;;  %v6946_v12 = vpack.c.bf16 %v3699_v24, %v3695_v38  ;;  %v3729_v38 = vld [vmem:[#allocation14 + $0x120] sm:$0xff] }
 0xe7a   :  { %v3353_v39 = vmul.f32 %v3347_v52, %v9370_v57  ;;  %v3352_v18 = vadd.f32 0.5, %v3351_v54  ;;  %v3697_v57 = vld [vmem:[#allocation14 + $0x20] sm:$0xff]  ;;  %v3703_v54 = vld [vmem:[#allocation14 + $0x50] sm:$0xff] }
 0xe7b   :  { %v3701_v52 = vld [vmem:[#allocation14 + $0x40] sm:$0xff] }
 0xe7c   :  { %v9416_v42 = vadd.f32 %v3354_v5, %v3353_v39  ;;  %v3705_v5 = vld [vmem:[#allocation14 + $0x60] sm:$0xff] }
 0xe7e   :  { %7880 = vtanh.f32 %v9416_v42 }
 0xe88   :  { %v7881_v6 = vpop.eup %7880 }
 0xe89   :  { %v9419_v59 = vmul.f32 %v7881_v6, %v3352_v18  ;;  %v3707_v18 = vld [vmem:[#allocation14 + $0x70] sm:$0xff]  ;;  %v3710_v6 = vld [vmem:[#allocation14 + $0x88] sm:$0xff] }
 0xe8b   :  { %3424 = vmatmul.mubr.f32.vlgmr.msra.gmra.mrb[28].mxu0 %v9419_v59  ;;  %3495 = vmatmul.mubr.f32.vlgmr.msra.gmra.mrb[30].mxu1 %v9419_v59 }
 0xe8c   :  { %6851 = vmatpush1.bf16.msra.mxu0 %v9028_v3  ;;  %6883 = vmatpush1.bf16.msra.mxu1 %v9033_v19  ;;  %v3694_v3 = vld [vmem:[#allocation14 + $0x8] sm:$0xff] }
 0xe8d   :  { %6853 = vmatprep.subr.bf16.mxu0 %v9038_v35  ;;  %6885 = vmatprep.subr.bf16.mxu1 %v9042_v4  ;;  %v3698_v19 = vld [vmem:[#allocation14 + $0x28] sm:$0xff]  ;;  %v3696_v35 = vld [vmem:[#allocation14 + $0x18] sm:$0xff] }
 0xe8e   :  { %3588 = vmatprep.mubr.f32.mxu0 %v10064_v0  ;;  %3659 = vmatprep.mubr.f32.mxu1 %v10064_v0  ;;  %v3700_v4 = vld [vmem:[#allocation14 + $0x38] sm:$0xff] }
 0xe90   :  { %6855 = vmatpush1.bf16.msra.mxu0 %v9040_v53  ;;  %6887 = vmatpush1.bf16.msra.mxu1 %v9045_v31  ;;  %v6912_v53 = vpack.c.bf16 %v3698_v19, %v3694_v3  ;;  %v6944_v31 = vpack.c.bf16 %v3700_v4, %v3696_v35  ;;  %v3714_v3 = vld [vmem:[#allocation14 + $0xa8] sm:$0xff]  ;;  %v3712_v19 = vld [vmem:[#allocation14 + $0x98] sm:$0xff]  ;;  %v6950_v4 = vpack.c.bf16 %v3707_v18, %v3703_v54  ;;  %v3735_v18 = vld [vmem:[#allocation14 + $0x150] sm:$0xff] }
 0xe91   :  { %6857 = vmatprep.subr.bf16.mxu0 %v9050_v9  ;;  %6889 = vmatprep.subr.bf16.mxu1 %v9054_v21  ;;  %v3716_v35 = vld [vmem:[#allocation14 + $0xb8] sm:$0xff] }
 0xe94   :  { %6859 = vmatpush1.bf16.msra.mxu0 %v9052_v8  ;;  %6891 = vmatpush1.bf16.msra.mxu1 %v9057_v34 }
 0xe95   :  { %6861 = vmatprep.subr.bf16.mxu0 %v9062_v55  ;;  %6893 = vmatprep.subr.bf16.mxu1 %v9066_v14 }
 0xe98   :  { %6863 = vmatpush1.bf16.msra.mxu0 %v9064_v13  ;;  %6895 = vmatpush1.bf16.msra.mxu1 %v9069_v28 }
 0xe99   :  { %6865 = vmatprep.subr.bf16.mxu0 %v9074_v46  ;;  %6897 = vmatprep.subr.bf16.mxu1 %v9078_v25 }
 0xe9c   :  { %6867 = vmatpush1.bf16.msra.mxu0 %v9076_v62  ;;  %6899 = vmatpush1.bf16.msra.mxu1 %v9081_v58 }
 0xe9d   :  { %6869 = vmatprep.subr.bf16.mxu0 %v9085_v33  ;;  %6901 = vmatprep.subr.bf16.mxu1 %v9090_v16 }
 0xea0   :  { %6871 = vmatpush1.bf16.msra.mxu0 %v9087_v7  ;;  %6903 = vmatpush1.bf16.msra.mxu1 %v9093_v47 }
 0xea1   :  { %6873 = vmatprep.subr.bf16.mxu0 %v9095_v50  ;;  %6905 = vmatprep.subr.bf16.mxu1 %v9101_v61 }
 0xea4   :  { %6875 = vmatpush1.bf16.msra.mxu0 %v9099_v60  ;;  %6907 = vmatpush1.bf16.msra.mxu1 %v9105_v22 }
 0xea5   :  { %6877 = vmatprep.subr.bf16.mxu0 %v9107_v30  ;;  %6909 = vmatprep.subr.bf16.mxu1 %v9113_v37 }
 0xea8   :  { %6879 = vmatpush1.bf16.msra.mxu0 %v9115_v1  ;;  %6911 = vmatpush1.bf16.msra.mxu1 %v9118_v26  ;;  %v3693_v26 = vld [vmem:[#allocation14] sm:$0xff] }
 0xea9   :  { %6913 = vmatprep.subr.bf16.mxu0 %v6912_v53  ;;  %6945 = vmatprep.subr.bf16.mxu1 %v6944_v31  ;;  %v6914_v11 = vpack.c.bf16 %v3697_v57, %v3693_v26  ;;  %v6918_v53 = vpack.c.bf16 %v3705_v5, %v3701_v52  ;;  %v3709_v31 = vld [vmem:[#allocation14 + $0x80] sm:$0xff] }
 0xeaa   :  { %v3725_v57 = vld [vmem:[#allocation14 + $0x100] sm:$0xff] }
 0xeab   :  { %v3733_v5 = vld [vmem:[#allocation14 + $0x140] sm:$0xff] }
 0xf5e   :  { %v3425_v9 = vpop.f32.mrb[28].mxu0  ;;  %v3496_v8 = vpop.f32.mrb[30].mxu1 }
 0xf5f   :  { %v7566_v21 = vadd.f32 %v3425_v9, %v9171_v36  ;;  %v3427_v34 = vpop.f32.mrb[29].mxu0  ;;  %v3498_v55 = vpop.f32.mrb[31].mxu1  ;;  %v7582_v46 = vadd.f32 %v3496_v8, %v9178_v29  ;;  %v3713_v9 = vld [vmem:[#allocation14 + $0xa0] sm:$0xff]  ;;  %v6920_v8 = vpack.c.bf16 %v3714_v3, %v3710_v6  ;;  %v3739_v6 = vld [vmem:[#allocation14 + $0x170] sm:$0xff]  ;;  %v3742_v3 = vld [vmem:[#allocation14 + $0x188] sm:$0xff] }
 0xf60   :  { %v7567_v13 = vadd.f32 %v3427_v34, %v9174_v40  ;;  %v7583_v62 = vadd.f32 %v3498_v55, %v9183_v43  ;;  %v3711_v34 = vld [vmem:[#allocation14 + $0x90] sm:$0xff] }
 0xf61   :  { %v3505_v14 = vmul.f32 0.5, %v7566_v21  ;;  %v6952_v21 = vpack.c.bf16 %v3716_v35, %v3712_v19  ;;  %v3715_v55 = vld [vmem:[#allocation14 + $0xb0] sm:$0xff]  ;;  %v3746_v19 = vld [vmem:[#allocation14 + $0x1a8] sm:$0xff]  ;;  %v3744_v35 = vld [vmem:[#allocation14 + $0x198] sm:$0xff] }
 0xf62   :  { %v3509_v28 = vmul.f32 0.5, %v7567_v13  ;;  %v3514_v25 = vmul.f32 0.5, %v7583_v62  ;;  %v3718_v13 = vld [vmem:[#allocation14 + $0xc8] sm:$0xff]  ;;  %v6922_v62 = vpack.c.bf16 %v3713_v9, %v3709_v31  ;;  %v6966_v31 = vpack.c.bf16 %v3739_v6, %v3735_v18  ;;  %v3741_v9 = vld [vmem:[#allocation14 + $0x180] sm:$0xff]  ;;  %v3776_v18 = vld [vmem:[#allocation15 + $0x98] sm:$0xff] }
 0xf63   :  { %7882 = vtanh.f32 %v3505_v14  ;;  %v3722_v14 = vld [vmem:[#allocation14 + $0xe8] sm:$0xff] }
 0xf64   :  { %7884 = vtanh.f32 %v3509_v28  ;;  %v3720_v28 = vld [vmem:[#allocation14 + $0xd8] sm:$0xff] }
 0xf65   :  { %7886 = vtanh.f32 %v7582_v46  ;;  %v3724_v46 = vld [vmem:[#allocation14 + $0xf8] sm:$0xff] }
 0xf66   :  { %7888 = vtanh.f32 %v3514_v25  ;;  %v6954_v25 = vpack.c.bf16 %v3715_v55, %v3711_v34  ;;  %v3743_v55 = vld [vmem:[#allocation14 + $0x190] sm:$0xff] }
 0xf6d   :  { %v7883_v58 = vpop.eup %7882 }
 0xf6e   :  { %v7885_v33 = vpop.eup %7884  ;;  %v3507_v7 = vmul.f32 0.5, %v7883_v58  ;;  %v3717_v58 = vld [vmem:[#allocation14 + $0xc0] sm:$0xff] }
 0xf6f   :  { %v3511_v16 = vmul.f32 0.5, %v7885_v33  ;;  %v7887_v50 = vpop.eup %7886  ;;  %v3721_v33 = vld [vmem:[#allocation14 + $0xe0] sm:$0xff] }
 0xf70   :  { %v3508_v47 = vadd.f32 0.5, %v3507_v7  ;;  %v7889_v37 = vpop.eup %7888  ;;  %v6924_v7 = vpack.c.bf16 %v3722_v14, %v3718_v13  ;;  %v3747_v13 = vld [vmem:[#allocation14 + $0x1b0] sm:$0xff]  ;;  %v3750_v14 = vld [vmem:[#allocation14 + $0x1c8] sm:$0xff] }
 0xf71   :  { %v3512_v60 = vadd.f32 0.5, %v3511_v16  ;;  %v3516_v1 = vmul.f32 0.5, %v7889_v37  ;;  %v6956_v16 = vpack.c.bf16 %v3724_v46, %v3720_v28  ;;  %v3732_v37 = vld [vmem:[#allocation14 + $0x138] sm:$0xff]  ;;  %v3754_v28 = vld [vmem:[#allocation14 + $0x1e8] sm:$0xff] }
 0xf72   :  { %v3519_v61 = vmul.f32 %v7887_v50, %v3508_v47  ;;  %v3719_v47 = vld [vmem:[#allocation14 + $0xd0] sm:$0xff]  ;;  %v3752_v46 = vld [vmem:[#allocation14 + $0x1d8] sm:$0xff] }
 0xf73   :  { %v3518_v22 = vmul.f32 %v3512_v60, %v9416_v42  ;;  %v3517_v27 = vadd.f32 0.5, %v3516_v1  ;;  %v6916_v42 = vpack.c.bf16 %v3706_v51, %v3702_v45  ;;  %v3723_v50 = vld [vmem:[#allocation14 + $0xf0] sm:$0xff]  ;;  %v3726_v60 = vld [vmem:[#allocation14 + $0x108] sm:$0xff]  ;;  %v6926_v1 = vpack.c.bf16 %v3721_v33, %v3717_v58  ;;  %v3749_v33 = vld [vmem:[#allocation14 + $0x1c0] sm:$0xff] }
 0xf74   :  { %v6958_v26 = vpack.c.bf16 %v3723_v50, %v3719_v47  ;;  %v3727_v51 = vld [vmem:[#allocation14 + $0x110] sm:$0xff]  ;;  %v6970_v58 = vpack.c.bf16 %v3747_v13, %v3743_v55  ;;  %v3753_v47 = vld [vmem:[#allocation14 + $0x1e0] sm:$0xff]  ;;  %v3784_v55 = vld [vmem:[#allocation15 + $0xd8] sm:$0xff] }
 0xf75   :  { %v9460_v30 = vadd.f32 %v3519_v61, %v3518_v22  ;;  %v3730_v61 = vld [vmem:[#allocation14 + $0x128] sm:$0xff]  ;;  %v3728_v22 = vld [vmem:[#allocation14 + $0x118] sm:$0xff]  ;;  %v6962_v52 = vpack.c.bf16 %v3731_v48, %v3727_v51  ;;  %v3751_v50 = vld [vmem:[#allocation14 + $0x1d0] sm:$0xff] }
 0xf76   :  { %v6928_v24 = vpack.c.bf16 %v3730_v61, %v3726_v60  ;;  %v6960_v45 = vpack.c.bf16 %v3732_v37, %v3728_v22  ;;  %v3755_v60 = vld [vmem:[#allocation14 + $0x1f0] sm:$0xff]  ;;  %v6942_v61 = vpack.c.bf16 %v3753_v47, %v3749_v33  ;;  %v3761_v37 = vld [vmem:[#allocation15 + $0x20] sm:$0xff]  ;;  %v3768_v51 = vld [vmem:[#allocation15 + $0x58] sm:$0xff] }
 0xf77   :  { %7890 = vtanh.f32 %v9460_v30  ;;  %v6974_v22 = vpack.c.bf16 %v3755_v60, %v3751_v50  ;;  %v3787_v33 = vld [vmem:[#allocation15 + $0xf0] sm:$0xff]  ;;  %v3794_v47 = vld [vmem:[#allocation15 + $0x128] sm:$0xff]  ;;  %v3792_v50 = vld [vmem:[#allocation15 + $0x118] sm:$0xff] }
 0xf81   :  { %v7891_v49 = vpop.eup %7890 }
 0xf82   :  { %v9463_v39 = vmul.f32 %v7891_v49, %v3517_v27  ;;  %v3738_v27 = vld [vmem:[#allocation14 + $0x168] sm:$0xff]  ;;  %v3736_v49 = vld [vmem:[#allocation14 + $0x158] sm:$0xff] }
 0xf84   :  { %3589 = vmatmul.mubr.f32.vlgmr.msra.gmra.mrb[30].mxu0 %v9463_v39  ;;  %3660 = vmatmul.mubr.f32.vlgmr.msra.gmra.mrb[32].mxu1 %v9463_v39 }
 0xf85   :  { %6915 = vmatpush1.bf16.msra.mxu0 %v6914_v11  ;;  %6947 = vmatpush1.bf16.msra.mxu1 %v6946_v12  ;;  %v3740_v11 = vld [vmem:[#allocation14 + $0x178] sm:$0xff]  ;;  %v6930_v12 = vpack.c.bf16 %v3729_v38, %v3725_v57  ;;  %v3759_v57 = vld [vmem:[#allocation15 + $0x10] sm:$0xff] }
 0xf86   :  { %6917 = vmatprep.subr.bf16.mxu0 %v6916_v42  ;;  %6949 = vmatprep.subr.bf16.mxu1 %v6948_v23  ;;  %v3737_v42 = vld [vmem:[#allocation14 + $0x160] sm:$0xff]  ;;  %v6932_v23 = vpack.c.bf16 %v3738_v27, %v3734_v10  ;;  %v6964_v54 = vpack.c.bf16 %v3740_v11, %v3736_v49  ;;  %v3763_v38 = vld [vmem:[#allocation15 + $0x30] sm:$0xff]  ;;  %v3772_v49 = vld [vmem:[#allocation15 + $0x78] sm:$0xff] }
 0xf87   :  { %3915 = vmatprep.mubr.f32.mxu0 %v10064_v0  ;;  %4028 = vmatprep.mubr.f32.mxu1 %v10064_v0  ;;  %v3765_v10 = vld [vmem:[#allocation15 + $0x40] sm:$0xff] }
 0xf88   :  { %v3769_v27 = vld [vmem:[#allocation15 + $0x60] sm:$0xff] }
 0xf89   :  { %6919 = vmatpush1.bf16.msra.mxu0 %v6918_v53  ;;  %6951 = vmatpush1.bf16.msra.mxu1 %v6950_v4  ;;  %v3748_v53 = vld [vmem:[#allocation14 + $0x1b8] sm:$0xff]  ;;  %v6934_v4 = vpack.c.bf16 %v3737_v42, %v3733_v5  ;;  %v9511_v11 = vpack.c.bf16 %v3769_v27, %v3765_v10  ;;  %v3771_v5 = vld [vmem:[#allocation15 + $0x70] sm:$0xff] }
 0xf8a   :  { %6921 = vmatprep.subr.bf16.mxu0 %v6920_v8  ;;  %6953 = vmatprep.subr.bf16.mxu1 %v6952_v21  ;;  %v3745_v8 = vld [vmem:[#allocation14 + $0x1a0] sm:$0xff]  ;;  %v6936_v21 = vpack.c.bf16 %v3746_v19, %v3742_v3  ;;  %v6968_v34 = vpack.c.bf16 %v3748_v53, %v3744_v35  ;;  %v3780_v35 = vld [vmem:[#allocation15 + $0xb8] sm:$0xff] }
 0xf8b   :  { %v3773_v3 = vld [vmem:[#allocation15 + $0x80] sm:$0xff]  ;;  %v3800_v27 = vld [vmem:[#allocation15 + $0x158] sm:$0xff] }
 0xf8c   :  { %v3777_v19 = vld [vmem:[#allocation15 + $0xa0] sm:$0xff] }
 0xf8d   :  { %6923 = vmatpush1.bf16.msra.mxu0 %v6922_v62  ;;  %6955 = vmatpush1.bf16.msra.mxu1 %v6954_v25  ;;  %v3756_v62 = vld [vmem:[#allocation14 + $0x1f8] sm:$0xff]  ;;  %v6938_v25 = vpack.c.bf16 %v3745_v8, %v3741_v9  ;;  %v9523_v53 = vpack.c.bf16 %v3777_v19, %v3773_v3  ;;  %v3779_v9 = vld [vmem:[#allocation15 + $0xb0] sm:$0xff] }
 0xf8e   :  { %6925 = vmatprep.subr.bf16.mxu0 %v6924_v7  ;;  %6957 = vmatprep.subr.bf16.mxu1 %v6956_v16  ;;  %v6940_v7 = vpack.c.bf16 %v3754_v28, %v3750_v14  ;;  %v6972_v16 = vpack.c.bf16 %v3756_v62, %v3752_v46  ;;  %v3781_v14 = vld [vmem:[#allocation15 + $0xc0] sm:$0xff]  ;;  %v3788_v46 = vld [vmem:[#allocation15 + $0xf8] sm:$0xff] }
 0xf8f   :  { %v3785_v28 = vld [vmem:[#allocation15 + $0xe0] sm:$0xff] }
 0xf90   :  { %v9535_v62 = vpack.c.bf16 %v3785_v28, %v3781_v14 }
 0xf91   :  { %6927 = vmatpush1.bf16.msra.mxu0 %v6926_v1  ;;  %6959 = vmatpush1.bf16.msra.mxu1 %v6958_v26 }
 0xf92   :  { %6929 = vmatprep.subr.bf16.mxu0 %v6928_v24  ;;  %6961 = vmatprep.subr.bf16.mxu1 %v6960_v45  ;;  %v3766_v24 = vld [vmem:[#allocation15 + $0x48] sm:$0xff] }
 0xf93   :  { %v3770_v45 = vld [vmem:[#allocation15 + $0x68] sm:$0xff] }
 0xf94   :  { %v9509_v48 = vpack.c.bf16 %v3770_v45, %v3766_v24  ;;  %v3797_v24 = vld [vmem:[#allocation15 + $0x140] sm:$0xff] }
 0xf95   :  { %6931 = vmatpush1.bf16.msra.mxu0 %v6930_v12  ;;  %6963 = vmatpush1.bf16.msra.mxu1 %v6962_v52  ;;  %v9513_v12 = vpack.c.bf16 %v3772_v49, %v3768_v51  ;;  %v3767_v52 = vld [vmem:[#allocation15 + $0x50] sm:$0xff]  ;;  %v3801_v45 = vld [vmem:[#allocation15 + $0x160] sm:$0xff]  ;;  %v3804_v49 = vld [vmem:[#allocation15 + $0x178] sm:$0xff] }
 0xf96   :  { %6933 = vmatprep.subr.bf16.mxu0 %v6932_v23  ;;  %6965 = vmatprep.subr.bf16.mxu1 %v6964_v54  ;;  %v9516_v42 = vpack.c.bf16 %v3771_v5, %v3767_v52  ;;  %v3774_v23 = vld [vmem:[#allocation15 + $0x88] sm:$0xff]  ;;  %v9558_v10 = vpack.c.bf16 %v3801_v45, %v3797_v24  ;;  %v3799_v52 = vld [vmem:[#allocation15 + $0x150] sm:$0xff]  ;;  %v9561_v5 = vpack.c.bf16 %v3804_v49, %v3800_v27 }
 0xf97   :  { %v3778_v54 = vld [vmem:[#allocation15 + $0xa8] sm:$0xff] }
 0xf98   :  { %v9521_v6 = vpack.c.bf16 %v3778_v54, %v3774_v23  ;;  %v3803_v23 = vld [vmem:[#allocation15 + $0x170] sm:$0xff]  ;;  %v3806_v54 = vld [vmem:[#allocation15 + $0x188] sm:$0xff] }
 0xf99   :  { %6935 = vmatpush1.bf16.msra.mxu0 %v6934_v4  ;;  %6967 = vmatpush1.bf16.msra.mxu1 %v6966_v31  ;;  %v9525_v4 = vpack.c.bf16 %v3780_v35, %v3776_v18  ;;  %v3775_v31 = vld [vmem:[#allocation15 + $0x90] sm:$0xff]  ;;  %v3810_v18 = vld [vmem:[#allocation15 + $0x1a8] sm:$0xff]  ;;  %v9564_v3 = vpack.c.bf16 %v3803_v23, %v3799_v52  ;;  %v3805_v35 = vld [vmem:[#allocation15 + $0x180] sm:$0xff] }
 0xf9a   :  { %6937 = vmatprep.subr.bf16.mxu0 %v6936_v21  ;;  %6969 = vmatprep.subr.bf16.mxu1 %v6968_v34  ;;  %v9528_v8 = vpack.c.bf16 %v3779_v9, %v3775_v31  ;;  %v3782_v21 = vld [vmem:[#allocation15 + $0xc8] sm:$0xff]  ;;  %v9566_v19 = vpack.c.bf16 %v3810_v18, %v3806_v54  ;;  %v3809_v31 = vld [vmem:[#allocation15 + $0x1a0] sm:$0xff]  ;;  %v3808_v9 = vld [vmem:[#allocation15 + $0x198] sm:$0xff] }
 0xf9b   :  { %v3786_v34 = vld [vmem:[#allocation15 + $0xe8] sm:$0xff]  ;;  %v9570_v14 = vpack.c.bf16 %v3809_v31, %v3805_v35 }
 0xf9c   :  { %v9533_v13 = vpack.c.bf16 %v3786_v34, %v3782_v21  ;;  %v3812_v21 = vld [vmem:[#allocation15 + $0x1b8] sm:$0xff]  ;;  %v3807_v34 = vld [vmem:[#allocation15 + $0x190] sm:$0xff] }
 0xf9d   :  { %6939 = vmatpush1.bf16.msra.mxu0 %v6938_v25  ;;  %6971 = vmatpush1.bf16.msra.mxu1 %v6970_v58  ;;  %v9537_v25 = vpack.c.bf16 %v3788_v46, %v3784_v55  ;;  %v3783_v58 = vld [vmem:[#allocation15 + $0xd0] sm:$0xff]  ;;  %v9572_v28 = vpack.c.bf16 %v3812_v21, %v3808_v9  ;;  %v3814_v46 = vld [vmem:[#allocation15 + $0x1c8] sm:$0xff] }
 0xf9e   :  { %6941 = vmatprep.subr.bf16.mxu0 %v6940_v7  ;;  %6973 = vmatprep.subr.bf16.mxu1 %v6972_v16  ;;  %v9540_v7 = vpack.c.bf16 %v3787_v33, %v3783_v58  ;;  %v3790_v16 = vld [vmem:[#allocation15 + $0x108] sm:$0xff]  ;;  %v3811_v55 = vld [vmem:[#allocation15 + $0x1b0] sm:$0xff] }
 0xf9f   :  { %v9545_v60 = vpack.c.bf16 %v3794_v47, %v3790_v16  ;;  %v3818_v58 = vld [vmem:[#allocation15 + $0x1e8] sm:$0xff]  ;;  %v9576_v33 = vpack.c.bf16 %v3811_v55, %v3807_v34  ;;  %v3816_v47 = vld [vmem:[#allocation15 + $0x1d8] sm:$0xff] }
 0xfa0   :  { %v9578_v16 = vpack.c.bf16 %v3818_v58, %v3814_v46 }
 0xfa1   :  { %6943 = vmatpush1.bf16.msra.mxu0 %v6942_v61  ;;  %6975 = vmatpush1.bf16.msra.mxu1 %v6974_v22  ;;  %v3789_v61 = vld [vmem:[#allocation15 + $0x100] sm:$0xff] }
 0xfa2   :  { %v3793_v22 = vld [vmem:[#allocation15 + $0x120] sm:$0xff] }
 0xfa4   :  { %3916 = vmatmul.mubr.f32.vlgmr.msra.gmra.mrb[32].mxu0 %v9189_v63  ;;  %4029 = vmatmul.mubr.f32.vlgmr.msra.gmra.mrb[34].mxu1 %v9189_v63  ;;  %v3758_v63 = vld [vmem:[#allocation15 + $0x8] sm:$0xff] }
 0xfa5   :  { %3921 = vmatprep.mubr.f32.mxu0 %v10064_v0  ;;  %4034 = vmatprep.mubr.f32.mxu1 %v10064_v0 }
 0xfa8   :  { %3922 = vmatmul.mubr.f32.gmra.mrb[34].mxu0 %v9235_v32  ;;  %4035 = vmatmul.mubr.f32.gmra.mrb[36].mxu1 %v9235_v32  ;;  %v3762_v32 = vld [vmem:[#allocation15 + $0x28] sm:$0xff] }
 0xfa9   :  { %3927 = vmatprep.mubr.f32.mxu0 %v10064_v0  ;;  %4040 = vmatprep.mubr.f32.mxu1 %v10064_v0 }
 0xfac   :  { %3928 = vmatmul.mubr.f32.gmra.mrb[36].mxu0 %v9281_v20  ;;  %4041 = vmatmul.mubr.f32.gmra.mrb[38].mxu1 %v9281_v20  ;;  %v3760_v20 = vld [vmem:[#allocation15 + $0x18] sm:$0xff] }
 0xfad   :  { %3933 = vmatprep.mubr.f32.mxu0 %v10064_v0  ;;  %4046 = vmatprep.mubr.f32.mxu1 %v10064_v0 }
 0xfb0   :  { %3934 = vmatmul.mubr.f32.gmra.mrb[38].mxu0 %v9327_v56  ;;  %4047 = vmatmul.mubr.f32.gmra.mrb[40].mxu1 %v9327_v56  ;;  %v9497_v56 = vpack.c.bf16 %v3762_v32, %v3758_v63  ;;  %v3796_v63 = vld [vmem:[#allocation15 + $0x138] sm:$0xff]  ;;  %v9547_v32 = vpack.c.bf16 %v3793_v22, %v3789_v61  ;;  %v3813_v61 = vld [vmem:[#allocation15 + $0x1c0] sm:$0xff] }
 0xfb1   :  { %3939 = vmatprep.mubr.f32.mxu0 %v10064_v0  ;;  %4052 = vmatprep.mubr.f32.mxu1 %v10064_v0  ;;  %v3817_v22 = vld [vmem:[#allocation15 + $0x1e0] sm:$0xff] }
 0xfb2   :  { %6977 = vmatprep.subr.bf16.mxu0 %v9497_v56 }
 0xfb4   :  { %3940 = vmatmul.mubr.f32.gmra.mrb[40].mxu0 %v9373_v2  ;;  %4053 = vmatmul.mubr.f32.gmra.mrb[42].mxu1 %v9373_v2  ;;  %v3757_v2 = vld [vmem:[#allocation15] sm:$0xff] }
 0xfb5   :  { %3945 = vmatprep.mubr.f32.mxu0 %v10064_v0  ;;  %4058 = vmatprep.mubr.f32.mxu1 %v10064_v0  ;;  %v9499_v1 = vpack.c.bf16 %v3761_v37, %v3757_v2  ;;  %v3791_v2 = vld [vmem:[#allocation15 + $0x110] sm:$0xff] }
 0xfb6   :  { %v3795_v37 = vld [vmem:[#allocation15 + $0x130] sm:$0xff] }
 0xfb7   :  { %6979 = vmatpush1.bf16.msra.mxu0 %v9499_v1 }
 0xfb8   :  { %3946 = vmatmul.mubr.f32.gmra.mrb[42].mxu0 %v9419_v59  ;;  %4059 = vmatmul.mubr.f32.gmra.mrb[44].mxu1 %v9419_v59  ;;  %v3764_v59 = vld [vmem:[#allocation15 + $0x38] sm:$0xff] }
 0xfb9   :  { %3951 = vmatprep.mubr.f32.mxu0 %v10064_v0  ;;  %4064 = vmatprep.mubr.f32.mxu1 %v10064_v0  ;;  %v9501_v26 = vpack.c.bf16 %v3764_v59, %v3760_v20  ;;  %v9549_v20 = vpack.c.bf16 %v3796_v63, %v3792_v50  ;;  %v3798_v59 = vld [vmem:[#allocation15 + $0x148] sm:$0xff]  ;;  %v3820_v50 = vld [vmem:[#allocation15 + $0x1f8] sm:$0xff] }
 0xfba   :  { %6981 = vmatprep.subr.bf16.mxu0 %v9509_v48  ;;  %v9584_v63 = vpack.c.bf16 %v3820_v50, %v3816_v47 }
 0xfbb   :  { %7009 = vmatprep.subr.bf16.mxu1 %v9501_v26  ;;  %6983 = vmatpush1.bf16.msra.mxu0 %v9511_v11 }
 0xfbc   :  { %3952 = vmatmul.mubr.f32.gmra.mrb[44].mxu0 %v9463_v39  ;;  %4065 = vmatmul.mubr.f32.gmra.mrb[46].mxu1 %v9463_v39  ;;  %v9504_v39 = vpack.c.bf16 %v3763_v38, %v3759_v57  ;;  %v9552_v57 = vpack.c.bf16 %v3795_v37, %v3791_v2  ;;  %v3802_v38 = vld [vmem:[#allocation15 + $0x168] sm:$0xff]  ;;  %v3815_v2 = vld [vmem:[#allocation15 + $0x1d0] sm:$0xff]  ;;  %v9586_v37 = vpack.c.bf16 %v3817_v22, %v3813_v61 }
 0xfbd   :  { %3957 = vmatprep.mubr.f32.mxu0 %v10064_v0  ;;  %4070 = vmatprep.mubr.f32.mxu1 %v10064_v0  ;;  %v9556_v51 = vpack.c.bf16 %v3802_v38, %v3798_v59  ;;  %v3819_v59 = vld [vmem:[#allocation15 + $0x1f0] sm:$0xff] }
 0xfbe   :  { %7011 = vmatpush1.bf16.msra.mxu1 %v9504_v39  ;;  %6985 = vmatprep.subr.bf16.mxu0 %v9521_v6  ;;  %v9589_v38 = vpack.c.bf16 %v3819_v59, %v3815_v2 }
 0xfbf   :  { %7013 = vmatprep.subr.bf16.mxu1 %v9513_v12  ;;  %6987 = vmatpush1.bf16.msra.mxu0 %v9523_v53 }
 0xfc0   :  { %6989 = vmatprep.subr.bf16.mxu0 %v9533_v13 }
 0xfc2   :  { %7015 = vmatpush1.bf16.msra.mxu1 %v9516_v42 }
 0xfc3   :  { %7017 = vmatprep.subr.bf16.mxu1 %v9525_v4  ;;  %6991 = vmatpush1.bf16.msra.mxu0 %v9535_v62 }
 0xfc4   :  { %6993 = vmatprep.subr.bf16.mxu0 %v9545_v60 }
 0xfc6   :  { %7019 = vmatpush1.bf16.msra.mxu1 %v9528_v8 }
 0xfc7   :  { %7021 = vmatprep.subr.bf16.mxu1 %v9537_v25  ;;  %6995 = vmatpush1.bf16.msra.mxu0 %v9547_v32 }
 0xfc8   :  { %6997 = vmatprep.subr.bf16.mxu0 %v9556_v51 }
 0xfca   :  { %7023 = vmatpush1.bf16.msra.mxu1 %v9540_v7 }
 0xfcb   :  { %7025 = vmatprep.subr.bf16.mxu1 %v9549_v20  ;;  %6999 = vmatpush1.bf16.msra.mxu0 %v9558_v10 }
 0xfcc   :  { %7001 = vmatprep.subr.bf16.mxu0 %v9566_v19 }
 0xfce   :  { %7027 = vmatpush1.bf16.msra.mxu1 %v9552_v57 }
 0xfcf   :  { %7029 = vmatprep.subr.bf16.mxu1 %v9561_v5  ;;  %7003 = vmatpush1.bf16.msra.mxu0 %v9570_v14 }
 0xfd0   :  { %7005 = vmatprep.subr.bf16.mxu0 %v9578_v16 }
 0xfd2   :  { %7031 = vmatpush1.bf16.msra.mxu1 %v9564_v3 }
 0xfd3   :  { %7033 = vmatprep.subr.bf16.mxu1 %v9572_v28  ;;  %7007 = vmatpush1.bf16.msra.mxu0 %v9586_v37 }
 0xfd4   :  { %7041 = vmatprep.subr.bf16.mxu0 %v9497_v56 }
 0xfd6   :  { %7035 = vmatpush1.bf16.msra.mxu1 %v9576_v33 }
 0xfd7   :  { %7037 = vmatprep.subr.bf16.mxu1 %v9584_v63 }
 0xfda   :  { %7039 = vmatpush1.bf16.msra.mxu1 %v9589_v38 }
 0xfdb   :  { %7073 = vmatprep.subr.bf16.mxu1 %v9501_v26 }
0x1057   :  { %v3590_v24 = vpop.f32.mrb[30].mxu0  ;;  %v3661_v45 = vpop.f32.mrb[32].mxu1 }
0x1058   :  { %v7568_v27 = vadd.f32 %v3590_v24, %v9171_v36  ;;  %v3592_v49 = vpop.f32.mrb[31].mxu0  ;;  %v3663_v52 = vpop.f32.mrb[33].mxu1  ;;  %v7584_v35 = vadd.f32 %v3661_v45, %v9178_v29 }
0x1059   :  { %v7569_v23 = vadd.f32 %v3592_v49, %v9174_v40  ;;  %v7585_v31 = vadd.f32 %v3663_v52, %v9183_v43 }
0x105a   :  { %v3670_v54 = vmul.f32 0.5, %v7568_v27 }
0x105b   :  { %v3674_v18 = vmul.f32 0.5, %v7569_v23  ;;  %v3679_v9 = vmul.f32 0.5, %v7585_v31 }
0x105c   :  { %7892 = vtanh.f32 %v3670_v54 }
0x105d   :  { %7894 = vtanh.f32 %v3674_v18 }
0x105e   :  { %7896 = vtanh.f32 %v7584_v35 }
0x105f   :  { %7898 = vtanh.f32 %v3679_v9 }
0x1066   :  { %v7893_v21 = vpop.eup %7892 }
0x1067   :  { %v7895_v34 = vpop.eup %7894  ;;  %v3672_v55 = vmul.f32 0.5, %v7893_v21 }
0x1068   :  { %v3676_v46 = vmul.f32 0.5, %v7895_v34  ;;  %v7897_v58 = vpop.eup %7896 }
0x1069   :  { %v3673_v36 = vadd.f32 0.5, %v3672_v55  ;;  %v7899_v29 = vpop.eup %7898 }
0x106a   :  { %v3677_v47 = vadd.f32 0.5, %v3676_v46  ;;  %v3681_v22 = vmul.f32 0.5, %v7899_v29 }
0x106b   :  { %v3684_v50 = vmul.f32 %v7897_v58, %v3673_v36 }
0x106c   :  { %v3683_v40 = vmul.f32 %v3677_v47, %v9460_v30  ;;  %v3682_v2 = vadd.f32 0.5, %v3681_v22  ;;  %v3821_v30 = vld [vmem:[%s10050_s9] sm:$0xf] }
0x106d   :  { %v9642_v24 = vrot.slane %v3821_v30, %v8688_v15  ;;  %v9645_v45 = vrot.slane %v3821_v30, %v8691_v17  ;;  %v9649_v23 = vrot.slane %v3821_v30, %v8702_v41  ;;  %v9654_v21 = vrot.slane %v3821_v30, %v8705_v44 }
0x106e   :  { %v3685_v61 = vadd.f32 %v3684_v50, %v3683_v40 }
0x1070   :  { %7900 = vtanh.f32 %v3685_v61  ;;  %3692 = vst [vmem:[#allocation19 + $0x8] sm:$0xff] %v3685_v61 }
0x107a   :  { %v7901_v59 = vpop.eup %7900 }
0x107b   :  { %v3687_v43 = vmul.f32 %v7901_v59, %v3682_v2 }
0x107d   :  { %3958 = vmatmul.mubr.f32.gmra.mrb[46].mxu0 %v3687_v43  ;;  %3690 = vst [vmem:[#allocation18 + $0x8] sm:$0xff] %v3687_v43  ;;  %4071 = vmatmul.mubr.f32.gmra.mrb[48].mxu1 %v3687_v43 }
0x107e   :  { %4141 = vmatprep.mubr.f32.mxu0 %v10064_v0  ;;  %4212 = vmatprep.mubr.f32.mxu1 %v10064_v0 }
0x1081   :  { %4142 = vmatmul.mubr.f32.vlgmr.msra.gmra.mrb[32].mxu0 %v10064_v0  ;;  %4213 = vmatmul.mubr.f32.vlgmr.msra.gmra.mrb[34].mxu1 %v10064_v0 }
0x1082   :  { %7043 = vmatpush1.bf16.msra.mxu0 %v9499_v1  ;;  %7075 = vmatpush1.bf16.msra.mxu1 %v9504_v39 }
0x1083   :  { %7045 = vmatprep.subr.bf16.mxu0 %v9509_v48  ;;  %7077 = vmatprep.subr.bf16.mxu1 %v9513_v12 }
0x1084   :  { %4306 = vmatprep.mubr.f32.mxu0 %v10064_v0  ;;  %4377 = vmatprep.mubr.f32.mxu1 %v10064_v0 }
0x1086   :  { %7047 = vmatpush1.bf16.msra.mxu0 %v9511_v11  ;;  %7079 = vmatpush1.bf16.msra.mxu1 %v9516_v42 }
0x1087   :  { %7049 = vmatprep.subr.bf16.mxu0 %v9521_v6  ;;  %7081 = vmatprep.subr.bf16.mxu1 %v9525_v4 }
0x108a   :  { %7051 = vmatpush1.bf16.msra.mxu0 %v9523_v53  ;;  %7083 = vmatpush1.bf16.msra.mxu1 %v9528_v8 }
0x108b   :  { %7053 = vmatprep.subr.bf16.mxu0 %v9533_v13  ;;  %7085 = vmatprep.subr.bf16.mxu1 %v9537_v25 }
0x108e   :  { %7055 = vmatpush1.bf16.msra.mxu0 %v9535_v62  ;;  %7087 = vmatpush1.bf16.msra.mxu1 %v9540_v7 }
0x108f   :  { %7057 = vmatprep.subr.bf16.mxu0 %v9545_v60  ;;  %7089 = vmatprep.subr.bf16.mxu1 %v9549_v20 }
0x1092   :  { %7059 = vmatpush1.bf16.msra.mxu0 %v9547_v32  ;;  %7091 = vmatpush1.bf16.msra.mxu1 %v9552_v57 }
0x1093   :  { %7061 = vmatprep.subr.bf16.mxu0 %v9556_v51  ;;  %7093 = vmatprep.subr.bf16.mxu1 %v9561_v5 }
0x1096   :  { %7063 = vmatpush1.bf16.msra.mxu0 %v9558_v10  ;;  %7095 = vmatpush1.bf16.msra.mxu1 %v9564_v3 }
0x1097   :  { %7065 = vmatprep.subr.bf16.mxu0 %v9566_v19  ;;  %7097 = vmatprep.subr.bf16.mxu1 %v9572_v28 }
0x109a   :  { %7067 = vmatpush1.bf16.msra.mxu0 %v9570_v14  ;;  %7099 = vmatpush1.bf16.msra.mxu1 %v9576_v33 }
0x109b   :  { %7069 = vmatprep.subr.bf16.mxu0 %v9578_v16  ;;  %7101 = vmatprep.subr.bf16.mxu1 %v9584_v63 }
0x109e   :  { %7071 = vmatpush1.bf16.msra.mxu0 %v9586_v37  ;;  %7103 = vmatpush1.bf16.msra.mxu1 %v9589_v38 }
0x109f   :  { %7105 = vmatprep.subr.bf16.mxu0 %v9497_v56  ;;  %7137 = vmatprep.subr.bf16.mxu1 %v9501_v26 }
0x1154   :  { %v4143_v27 = vpop.f32.mrb[32].mxu0  ;;  %v4214_v49 = vpop.f32.mrb[34].mxu1 }
0x1155   :  { %v7586_v52 = vadd.f32 %v4143_v27, %v9642_v24  ;;  %v4145_v54 = vpop.f32.mrb[33].mxu0  ;;  %v4216_v18 = vpop.f32.mrb[35].mxu1  ;;  %v7602_v15 = vadd.f32 %v4214_v49, %v9649_v23 }
0x1156   :  { %v7587_v35 = vadd.f32 %v4145_v54, %v9645_v45  ;;  %v7603_v17 = vadd.f32 %v4216_v18, %v9654_v21 }
0x1157   :  { %v4223_v31 = vmul.f32 0.5, %v7586_v52 }
0x1158   :  { %v4227_v9 = vmul.f32 0.5, %v7587_v35  ;;  %v4232_v34 = vmul.f32 0.5, %v7603_v17 }
0x1159   :  { %7902 = vtanh.f32 %v4223_v31 }
0x115a   :  { %7904 = vtanh.f32 %v4227_v9 }
0x115b   :  { %7906 = vtanh.f32 %v7602_v15 }
0x115c   :  { %7908 = vtanh.f32 %v4232_v34 }
0x1163   :  { %v7903_v55 = vpop.eup %7902 }
0x1164   :  { %v7905_v41 = vpop.eup %7904  ;;  %v4225_v46 = vmul.f32 0.5, %v7903_v55 }
0x1165   :  { %v4229_v36 = vmul.f32 0.5, %v7905_v41  ;;  %v7907_v47 = vpop.eup %7906 }
0x1166   :  { %v4226_v58 = vadd.f32 0.5, %v4225_v46  ;;  %v7909_v44 = vpop.eup %7908 }
0x1167   :  { %v4230_v50 = vadd.f32 0.5, %v4229_v36  ;;  %v4234_v22 = vmul.f32 0.5, %v7909_v44 }
0x1168   :  { %v4237_v40 = vmul.f32 %v7907_v47, %v4226_v58 }
0x1169   :  { %v4236_v61 = vmul.f32 0.0, %v4230_v50  ;;  %v4235_v2 = vadd.f32 0.5, %v4234_v22 }
0x116b   :  { %v9657_v29 = vadd.f32 %v4237_v40, %v4236_v61 }
0x116d   :  { %7910 = vtanh.f32 %v9657_v29 }
0x1177   :  { %v7911_v59 = vpop.eup %7910 }
0x1178   :  { %v9660_v43 = vmul.f32 %v7911_v59, %v4235_v2 }
0x117a   :  { %4307 = vmatmul.mubr.f32.vlgmr.msra.gmra.mrb[34].mxu0 %v9660_v43  ;;  %4378 = vmatmul.mubr.f32.vlgmr.msra.gmra.mrb[36].mxu1 %v9660_v43 }
0x117b   :  { %7107 = vmatpush1.bf16.msra.mxu0 %v9499_v1  ;;  %7139 = vmatpush1.bf16.msra.mxu1 %v9504_v39 }
0x117c   :  { %7109 = vmatprep.subr.bf16.mxu0 %v9509_v48  ;;  %7141 = vmatprep.subr.bf16.mxu1 %v9513_v12 }
0x117d   :  { %4471 = vmatprep.mubr.f32.mxu0 %v10064_v0  ;;  %4542 = vmatprep.mubr.f32.mxu1 %v10064_v0 }
0x117f   :  { %7111 = vmatpush1.bf16.msra.mxu0 %v9511_v11  ;;  %7143 = vmatpush1.bf16.msra.mxu1 %v9516_v42 }
0x1180   :  { %7113 = vmatprep.subr.bf16.mxu0 %v9521_v6  ;;  %7145 = vmatprep.subr.bf16.mxu1 %v9525_v4 }
0x1183   :  { %7115 = vmatpush1.bf16.msra.mxu0 %v9523_v53  ;;  %7147 = vmatpush1.bf16.msra.mxu1 %v9528_v8 }
0x1184   :  { %7117 = vmatprep.subr.bf16.mxu0 %v9533_v13  ;;  %7149 = vmatprep.subr.bf16.mxu1 %v9537_v25 }
0x1187   :  { %7119 = vmatpush1.bf16.msra.mxu0 %v9535_v62  ;;  %7151 = vmatpush1.bf16.msra.mxu1 %v9540_v7 }
0x1188   :  { %7121 = vmatprep.subr.bf16.mxu0 %v9545_v60  ;;  %7153 = vmatprep.subr.bf16.mxu1 %v9549_v20 }
0x118b   :  { %7123 = vmatpush1.bf16.msra.mxu0 %v9547_v32  ;;  %7155 = vmatpush1.bf16.msra.mxu1 %v9552_v57 }
0x118c   :  { %7125 = vmatprep.subr.bf16.mxu0 %v9556_v51  ;;  %7157 = vmatprep.subr.bf16.mxu1 %v9561_v5 }
0x118f   :  { %7127 = vmatpush1.bf16.msra.mxu0 %v9558_v10  ;;  %7159 = vmatpush1.bf16.msra.mxu1 %v9564_v3 }
0x1190   :  { %7129 = vmatprep.subr.bf16.mxu0 %v9566_v19  ;;  %7161 = vmatprep.subr.bf16.mxu1 %v9572_v28 }
0x1193   :  { %7131 = vmatpush1.bf16.msra.mxu0 %v9570_v14  ;;  %7163 = vmatpush1.bf16.msra.mxu1 %v9576_v33 }
0x1194   :  { %7133 = vmatprep.subr.bf16.mxu0 %v9578_v16  ;;  %7165 = vmatprep.subr.bf16.mxu1 %v9584_v63 }
0x1197   :  { %7135 = vmatpush1.bf16.msra.mxu0 %v9586_v37  ;;  %7167 = vmatpush1.bf16.msra.mxu1 %v9589_v38 }
0x1198   :  { %7169 = vmatprep.subr.bf16.mxu0 %v9497_v56  ;;  %7201 = vmatprep.subr.bf16.mxu1 %v9501_v26 }
0x124d   :  { %v4308_v30 = vpop.f32.mrb[34].mxu0  ;;  %v4379_v27 = vpop.f32.mrb[36].mxu1 }
0x124e   :  { %v7588_v49 = vadd.f32 %v4308_v30, %v9642_v24  ;;  %v4310_v52 = vpop.f32.mrb[35].mxu0  ;;  %v4381_v54 = vpop.f32.mrb[37].mxu1  ;;  %v7604_v9 = vadd.f32 %v4379_v27, %v9649_v23 }
0x124f   :  { %v7589_v18 = vadd.f32 %v4310_v52, %v9645_v45  ;;  %v7605_v15 = vadd.f32 %v4381_v54, %v9654_v21 }
0x1250   :  { %v4388_v35 = vmul.f32 0.5, %v7588_v49 }
0x1251   :  { %v4392_v31 = vmul.f32 0.5, %v7589_v18  ;;  %v4397_v17 = vmul.f32 0.5, %v7605_v15 }
0x1252   :  { %7912 = vtanh.f32 %v4388_v35 }
0x1253   :  { %7914 = vtanh.f32 %v4392_v31 }
0x1254   :  { %7916 = vtanh.f32 %v7604_v9 }
0x1255   :  { %7918 = vtanh.f32 %v4397_v17 }
0x125c   :  { %v7913_v34 = vpop.eup %7912 }
0x125d   :  { %v7915_v55 = vpop.eup %7914  ;;  %v4390_v41 = vmul.f32 0.5, %v7913_v34 }
0x125e   :  { %v4394_v46 = vmul.f32 0.5, %v7915_v55  ;;  %v7917_v58 = vpop.eup %7916 }
0x125f   :  { %v4391_v36 = vadd.f32 0.5, %v4390_v41  ;;  %v7919_v44 = vpop.eup %7918 }
0x1260   :  { %v4395_v47 = vadd.f32 0.5, %v4394_v46  ;;  %v4399_v22 = vmul.f32 0.5, %v7919_v44 }
0x1261   :  { %v4402_v50 = vmul.f32 %v7917_v58, %v4391_v36 }
0x1262   :  { %v4401_v40 = vmul.f32 %v4395_v47, %v9657_v29  ;;  %v4400_v2 = vadd.f32 0.5, %v4399_v22 }
0x1264   :  { %v9703_v61 = vadd.f32 %v4402_v50, %v4401_v40 }
0x1266   :  { %7920 = vtanh.f32 %v9703_v61 }
0x1270   :  { %v7921_v59 = vpop.eup %7920 }
0x1271   :  { %v9706_v30 = vmul.f32 %v7921_v59, %v4400_v2 }
0x1273   :  { %4472 = vmatmul.mubr.f32.vlgmr.msra.gmra.mrb[36].mxu0 %v9706_v30  ;;  %4543 = vmatmul.mubr.f32.vlgmr.msra.gmra.mrb[38].mxu1 %v9706_v30 }
0x1274   :  { %7171 = vmatpush1.bf16.msra.mxu0 %v9499_v1  ;;  %7203 = vmatpush1.bf16.msra.mxu1 %v9504_v39 }
0x1275   :  { %7173 = vmatprep.subr.bf16.mxu0 %v9509_v48  ;;  %7205 = vmatprep.subr.bf16.mxu1 %v9513_v12 }
0x1276   :  { %4636 = vmatprep.mubr.f32.mxu0 %v10064_v0  ;;  %4707 = vmatprep.mubr.f32.mxu1 %v10064_v0 }
0x1278   :  { %7175 = vmatpush1.bf16.msra.mxu0 %v9511_v11  ;;  %7207 = vmatpush1.bf16.msra.mxu1 %v9516_v42 }
0x1279   :  { %7177 = vmatprep.subr.bf16.mxu0 %v9521_v6  ;;  %7209 = vmatprep.subr.bf16.mxu1 %v9525_v4 }
0x127c   :  { %7179 = vmatpush1.bf16.msra.mxu0 %v9523_v53  ;;  %7211 = vmatpush1.bf16.msra.mxu1 %v9528_v8 }
0x127d   :  { %7181 = vmatprep.subr.bf16.mxu0 %v9533_v13  ;;  %7213 = vmatprep.subr.bf16.mxu1 %v9537_v25 }
0x1280   :  { %7183 = vmatpush1.bf16.msra.mxu0 %v9535_v62  ;;  %7215 = vmatpush1.bf16.msra.mxu1 %v9540_v7 }
0x1281   :  { %7185 = vmatprep.subr.bf16.mxu0 %v9545_v60  ;;  %7217 = vmatprep.subr.bf16.mxu1 %v9549_v20 }
0x1284   :  { %7187 = vmatpush1.bf16.msra.mxu0 %v9547_v32  ;;  %7219 = vmatpush1.bf16.msra.mxu1 %v9552_v57 }
0x1285   :  { %7189 = vmatprep.subr.bf16.mxu0 %v9556_v51  ;;  %7221 = vmatprep.subr.bf16.mxu1 %v9561_v5 }
0x1288   :  { %7191 = vmatpush1.bf16.msra.mxu0 %v9558_v10  ;;  %7223 = vmatpush1.bf16.msra.mxu1 %v9564_v3 }
0x1289   :  { %7193 = vmatprep.subr.bf16.mxu0 %v9566_v19  ;;  %7225 = vmatprep.subr.bf16.mxu1 %v9572_v28 }
0x128c   :  { %7195 = vmatpush1.bf16.msra.mxu0 %v9570_v14  ;;  %7227 = vmatpush1.bf16.msra.mxu1 %v9576_v33 }
0x128d   :  { %7197 = vmatprep.subr.bf16.mxu0 %v9578_v16  ;;  %7229 = vmatprep.subr.bf16.mxu1 %v9584_v63 }
0x1290   :  { %7199 = vmatpush1.bf16.msra.mxu0 %v9586_v37  ;;  %7231 = vmatpush1.bf16.msra.mxu1 %v9589_v38 }
0x1291   :  { %7233 = vmatprep.subr.bf16.mxu0 %v9497_v56  ;;  %7265 = vmatprep.subr.bf16.mxu1 %v9501_v26 }
0x1346   :  { %v4473_v29 = vpop.f32.mrb[36].mxu0  ;;  %v4544_v27 = vpop.f32.mrb[38].mxu1 }
0x1347   :  { %v7590_v49 = vadd.f32 %v4473_v29, %v9642_v24  ;;  %v4475_v52 = vpop.f32.mrb[37].mxu0  ;;  %v4546_v54 = vpop.f32.mrb[39].mxu1  ;;  %v7606_v9 = vadd.f32 %v4544_v27, %v9649_v23 }
0x1348   :  { %v7591_v18 = vadd.f32 %v4475_v52, %v9645_v45  ;;  %v7607_v15 = vadd.f32 %v4546_v54, %v9654_v21 }
0x1349   :  { %v4553_v35 = vmul.f32 0.5, %v7590_v49 }
0x134a   :  { %v4557_v31 = vmul.f32 0.5, %v7591_v18  ;;  %v4562_v17 = vmul.f32 0.5, %v7607_v15 }
0x134b   :  { %7922 = vtanh.f32 %v4553_v35 }
0x134c   :  { %7924 = vtanh.f32 %v4557_v31 }
0x134d   :  { %7926 = vtanh.f32 %v7606_v9 }
0x134e   :  { %7928 = vtanh.f32 %v4562_v17 }
0x1355   :  { %v7923_v34 = vpop.eup %7922 }
0x1356   :  { %v7925_v55 = vpop.eup %7924  ;;  %v4555_v41 = vmul.f32 0.5, %v7923_v34 }
0x1357   :  { %v4559_v46 = vmul.f32 0.5, %v7925_v55  ;;  %v7927_v58 = vpop.eup %7926 }
0x1358   :  { %v4556_v36 = vadd.f32 0.5, %v4555_v41  ;;  %v7929_v22 = vpop.eup %7928 }
0x1359   :  { %v4560_v47 = vadd.f32 0.5, %v4559_v46  ;;  %v4564_v2 = vmul.f32 0.5, %v7929_v22 }
0x135a   :  { %v4567_v50 = vmul.f32 %v7927_v58, %v4556_v36 }
0x135b   :  { %v4566_v40 = vmul.f32 %v4560_v47, %v9703_v61  ;;  %v4565_v59 = vadd.f32 0.5, %v4564_v2 }
0x135d   :  { %v9749_v44 = vadd.f32 %v4567_v50, %v4566_v40 }
0x135f   :  { %7930 = vtanh.f32 %v9749_v44 }
0x1369   :  { %v7931_v29 = vpop.eup %7930 }
0x136a   :  { %v9752_v27 = vmul.f32 %v7931_v29, %v4565_v59 }
0x136c   :  { %4637 = vmatmul.mubr.f32.vlgmr.msra.gmra.mrb[38].mxu0 %v9752_v27  ;;  %4708 = vmatmul.mubr.f32.vlgmr.msra.gmra.mrb[40].mxu1 %v9752_v27 }
0x136d   :  { %7235 = vmatpush1.bf16.msra.mxu0 %v9499_v1  ;;  %7267 = vmatpush1.bf16.msra.mxu1 %v9504_v39 }
0x136e   :  { %7237 = vmatprep.subr.bf16.mxu0 %v9509_v48  ;;  %7269 = vmatprep.subr.bf16.mxu1 %v9513_v12 }
0x136f   :  { %4801 = vmatprep.mubr.f32.mxu0 %v10064_v0  ;;  %4872 = vmatprep.mubr.f32.mxu1 %v10064_v0 }
0x1371   :  { %7239 = vmatpush1.bf16.msra.mxu0 %v9511_v11  ;;  %7271 = vmatpush1.bf16.msra.mxu1 %v9516_v42 }
0x1372   :  { %7241 = vmatprep.subr.bf16.mxu0 %v9521_v6  ;;  %7273 = vmatprep.subr.bf16.mxu1 %v9525_v4 }
0x1375   :  { %7243 = vmatpush1.bf16.msra.mxu0 %v9523_v53  ;;  %7275 = vmatpush1.bf16.msra.mxu1 %v9528_v8 }
0x1376   :  { %7245 = vmatprep.subr.bf16.mxu0 %v9533_v13  ;;  %7277 = vmatprep.subr.bf16.mxu1 %v9537_v25 }
0x1379   :  { %7247 = vmatpush1.bf16.msra.mxu0 %v9535_v62  ;;  %7279 = vmatpush1.bf16.msra.mxu1 %v9540_v7 }
0x137a   :  { %7249 = vmatprep.subr.bf16.mxu0 %v9545_v60  ;;  %7281 = vmatprep.subr.bf16.mxu1 %v9549_v20 }
0x137d   :  { %7251 = vmatpush1.bf16.msra.mxu0 %v9547_v32  ;;  %7283 = vmatpush1.bf16.msra.mxu1 %v9552_v57 }
0x137e   :  { %7253 = vmatprep.subr.bf16.mxu0 %v9556_v51  ;;  %7285 = vmatprep.subr.bf16.mxu1 %v9561_v5 }
0x1381   :  { %7255 = vmatpush1.bf16.msra.mxu0 %v9558_v10  ;;  %7287 = vmatpush1.bf16.msra.mxu1 %v9564_v3 }
0x1382   :  { %7257 = vmatprep.subr.bf16.mxu0 %v9566_v19  ;;  %7289 = vmatprep.subr.bf16.mxu1 %v9572_v28 }
0x1385   :  { %7259 = vmatpush1.bf16.msra.mxu0 %v9570_v14  ;;  %7291 = vmatpush1.bf16.msra.mxu1 %v9576_v33 }
0x1386   :  { %7261 = vmatprep.subr.bf16.mxu0 %v9578_v16  ;;  %7293 = vmatprep.subr.bf16.mxu1 %v9584_v63 }
0x1389   :  { %7263 = vmatpush1.bf16.msra.mxu0 %v9586_v37  ;;  %7295 = vmatpush1.bf16.msra.mxu1 %v9589_v38 }
0x138a   :  { %7297 = vmatprep.subr.bf16.mxu0 %v9497_v56  ;;  %7329 = vmatprep.subr.bf16.mxu1 %v9501_v26 }
0x143f   :  { %v4638_v61 = vpop.f32.mrb[38].mxu0  ;;  %v4709_v49 = vpop.f32.mrb[40].mxu1 }
0x1440   :  { %v7592_v52 = vadd.f32 %v4638_v61, %v9642_v24  ;;  %v4640_v54 = vpop.f32.mrb[39].mxu0  ;;  %v4711_v18 = vpop.f32.mrb[41].mxu1  ;;  %v7608_v15 = vadd.f32 %v4709_v49, %v9649_v23 }
0x1441   :  { %v7593_v35 = vadd.f32 %v4640_v54, %v9645_v45  ;;  %v7609_v17 = vadd.f32 %v4711_v18, %v9654_v21 }
0x1442   :  { %v4718_v31 = vmul.f32 0.5, %v7592_v52 }
0x1443   :  { %v4722_v9 = vmul.f32 0.5, %v7593_v35  ;;  %v4727_v34 = vmul.f32 0.5, %v7609_v17 }
0x1444   :  { %7932 = vtanh.f32 %v4718_v31 }
0x1445   :  { %7934 = vtanh.f32 %v4722_v9 }
0x1446   :  { %7936 = vtanh.f32 %v7608_v15 }
0x1447   :  { %7938 = vtanh.f32 %v4727_v34 }
0x144e   :  { %v7933_v55 = vpop.eup %7932 }
0x144f   :  { %v7935_v41 = vpop.eup %7934  ;;  %v4720_v46 = vmul.f32 0.5, %v7933_v55 }
0x1450   :  { %v4724_v36 = vmul.f32 0.5, %v7935_v41  ;;  %v7937_v47 = vpop.eup %7936 }
0x1451   :  { %v4721_v58 = vadd.f32 0.5, %v4720_v46  ;;  %v7939_v59 = vpop.eup %7938 }
0x1452   :  { %v4725_v50 = vadd.f32 0.5, %v4724_v36  ;;  %v4729_v29 = vmul.f32 0.5, %v7939_v59 }
0x1453   :  { %v4732_v40 = vmul.f32 %v7937_v47, %v4721_v58 }
0x1454   :  { %v4731_v22 = vmul.f32 %v4725_v50, %v9749_v44  ;;  %v4730_v61 = vadd.f32 0.5, %v4729_v29 }
0x1456   :  { %v9795_v2 = vadd.f32 %v4732_v40, %v4731_v22 }
0x1458   :  { %7940 = vtanh.f32 %v9795_v2 }
0x1462   :  { %v7941_v49 = vpop.eup %7940 }
0x1463   :  { %v9798_v52 = vmul.f32 %v7941_v49, %v4730_v61 }
0x1465   :  { %4802 = vmatmul.mubr.f32.vlgmr.msra.gmra.mrb[40].mxu0 %v9798_v52  ;;  %4873 = vmatmul.mubr.f32.vlgmr.msra.gmra.mrb[42].mxu1 %v9798_v52 }
0x1466   :  { %7299 = vmatpush1.bf16.msra.mxu0 %v9499_v1  ;;  %7331 = vmatpush1.bf16.msra.mxu1 %v9504_v39 }
0x1467   :  { %7301 = vmatprep.subr.bf16.mxu0 %v9509_v48  ;;  %7333 = vmatprep.subr.bf16.mxu1 %v9513_v12 }
0x1468   :  { %4966 = vmatprep.mubr.f32.mxu0 %v10064_v0  ;;  %5037 = vmatprep.mubr.f32.mxu1 %v10064_v0 }
0x146a   :  { %7303 = vmatpush1.bf16.msra.mxu0 %v9511_v11  ;;  %7335 = vmatpush1.bf16.msra.mxu1 %v9516_v42 }
0x146b   :  { %7305 = vmatprep.subr.bf16.mxu0 %v9521_v6  ;;  %7337 = vmatprep.subr.bf16.mxu1 %v9525_v4 }
0x146e   :  { %7307 = vmatpush1.bf16.msra.mxu0 %v9523_v53  ;;  %7339 = vmatpush1.bf16.msra.mxu1 %v9528_v8 }
0x146f   :  { %7309 = vmatprep.subr.bf16.mxu0 %v9533_v13  ;;  %7341 = vmatprep.subr.bf16.mxu1 %v9537_v25 }
0x1472   :  { %7311 = vmatpush1.bf16.msra.mxu0 %v9535_v62  ;;  %7343 = vmatpush1.bf16.msra.mxu1 %v9540_v7 }
0x1473   :  { %7313 = vmatprep.subr.bf16.mxu0 %v9545_v60  ;;  %7345 = vmatprep.subr.bf16.mxu1 %v9549_v20 }
0x1476   :  { %7315 = vmatpush1.bf16.msra.mxu0 %v9547_v32  ;;  %7347 = vmatpush1.bf16.msra.mxu1 %v9552_v57 }
0x1477   :  { %7317 = vmatprep.subr.bf16.mxu0 %v9556_v51  ;;  %7349 = vmatprep.subr.bf16.mxu1 %v9561_v5 }
0x147a   :  { %7319 = vmatpush1.bf16.msra.mxu0 %v9558_v10  ;;  %7351 = vmatpush1.bf16.msra.mxu1 %v9564_v3 }
0x147b   :  { %7321 = vmatprep.subr.bf16.mxu0 %v9566_v19  ;;  %7353 = vmatprep.subr.bf16.mxu1 %v9572_v28 }
0x147e   :  { %7323 = vmatpush1.bf16.msra.mxu0 %v9570_v14  ;;  %7355 = vmatpush1.bf16.msra.mxu1 %v9576_v33 }
0x147f   :  { %7325 = vmatprep.subr.bf16.mxu0 %v9578_v16  ;;  %7357 = vmatprep.subr.bf16.mxu1 %v9584_v63 }
0x1482   :  { %7327 = vmatpush1.bf16.msra.mxu0 %v9586_v37  ;;  %7359 = vmatpush1.bf16.msra.mxu1 %v9589_v38 }
0x1483   :  { %7361 = vmatprep.subr.bf16.mxu0 %v9497_v56  ;;  %7393 = vmatprep.subr.bf16.mxu1 %v9501_v26 }
0x1538   :  { %v4803_v44 = vpop.f32.mrb[40].mxu0  ;;  %v4874_v54 = vpop.f32.mrb[42].mxu1 }
0x1539   :  { %v7594_v18 = vadd.f32 %v4803_v44, %v9642_v24  ;;  %v4805_v35 = vpop.f32.mrb[41].mxu0  ;;  %v4876_v31 = vpop.f32.mrb[43].mxu1  ;;  %v7610_v34 = vadd.f32 %v4874_v54, %v9649_v23 }
0x153a   :  { %v7595_v9 = vadd.f32 %v4805_v35, %v9645_v45  ;;  %v7611_v55 = vadd.f32 %v4876_v31, %v9654_v21 }
0x153b   :  { %v4883_v15 = vmul.f32 0.5, %v7594_v18 }
0x153c   :  { %v4887_v17 = vmul.f32 0.5, %v7595_v9  ;;  %v4892_v41 = vmul.f32 0.5, %v7611_v55 }
0x153d   :  { %7942 = vtanh.f32 %v4883_v15 }
0x153e   :  { %7944 = vtanh.f32 %v4887_v17 }
0x153f   :  { %7946 = vtanh.f32 %v7610_v34 }
0x1540   :  { %7948 = vtanh.f32 %v4892_v41 }
0x1547   :  { %v7943_v46 = vpop.eup %7942 }
0x1548   :  { %v7945_v36 = vpop.eup %7944  ;;  %v4885_v58 = vmul.f32 0.5, %v7943_v46 }
0x1549   :  { %v4889_v47 = vmul.f32 0.5, %v7945_v36  ;;  %v7947_v40 = vpop.eup %7946 }
0x154a   :  { %v4886_v50 = vadd.f32 0.5, %v4885_v58  ;;  %v7949_v49 = vpop.eup %7948 }
0x154b   :  { %v4890_v22 = vadd.f32 0.5, %v4889_v47  ;;  %v4894_v44 = vmul.f32 0.5, %v7949_v49 }
0x154c   :  { %v4897_v59 = vmul.f32 %v7947_v40, %v4886_v50 }
0x154d   :  { %v4896_v29 = vmul.f32 %v4890_v22, %v9795_v2  ;;  %v4895_v54 = vadd.f32 0.5, %v4894_v44 }
0x154f   :  { %v9841_v61 = vadd.f32 %v4897_v59, %v4896_v29 }
0x1551   :  { %7950 = vtanh.f32 %v9841_v61 }
0x155b   :  { %v7951_v18 = vpop.eup %7950 }
0x155c   :  { %v9844_v35 = vmul.f32 %v7951_v18, %v4895_v54 }
0x155e   :  { %4967 = vmatmul.mubr.f32.vlgmr.msra.gmra.mrb[42].mxu0 %v9844_v35  ;;  %5038 = vmatmul.mubr.f32.vlgmr.msra.gmra.mrb[44].mxu1 %v9844_v35 }
0x155f   :  { %7363 = vmatpush1.bf16.msra.mxu0 %v9499_v1  ;;  %7395 = vmatpush1.bf16.msra.mxu1 %v9504_v39 }
0x1560   :  { %7365 = vmatprep.subr.bf16.mxu0 %v9509_v48  ;;  %7397 = vmatprep.subr.bf16.mxu1 %v9513_v12 }
0x1561   :  { %5131 = vmatprep.mubr.f32.mxu0 %v10064_v0  ;;  %5202 = vmatprep.mubr.f32.mxu1 %v10064_v0 }
0x1563   :  { %7367 = vmatpush1.bf16.msra.mxu0 %v9511_v11  ;;  %7399 = vmatpush1.bf16.msra.mxu1 %v9516_v42 }
0x1564   :  { %7369 = vmatprep.subr.bf16.mxu0 %v9521_v6  ;;  %7401 = vmatprep.subr.bf16.mxu1 %v9525_v4 }
0x1567   :  { %7371 = vmatpush1.bf16.msra.mxu0 %v9523_v53  ;;  %7403 = vmatpush1.bf16.msra.mxu1 %v9528_v8 }
0x1568   :  { %7373 = vmatprep.subr.bf16.mxu0 %v9533_v13  ;;  %7405 = vmatprep.subr.bf16.mxu1 %v9537_v25 }
0x156b   :  { %7375 = vmatpush1.bf16.msra.mxu0 %v9535_v62  ;;  %7407 = vmatpush1.bf16.msra.mxu1 %v9540_v7 }
0x156c   :  { %7377 = vmatprep.subr.bf16.mxu0 %v9545_v60  ;;  %7409 = vmatprep.subr.bf16.mxu1 %v9549_v20 }
0x156f   :  { %7379 = vmatpush1.bf16.msra.mxu0 %v9547_v32  ;;  %7411 = vmatpush1.bf16.msra.mxu1 %v9552_v57 }
0x1570   :  { %7381 = vmatprep.subr.bf16.mxu0 %v9556_v51  ;;  %7413 = vmatprep.subr.bf16.mxu1 %v9561_v5 }
0x1573   :  { %7383 = vmatpush1.bf16.msra.mxu0 %v9558_v10  ;;  %7415 = vmatpush1.bf16.msra.mxu1 %v9564_v3 }
0x1574   :  { %7385 = vmatprep.subr.bf16.mxu0 %v9566_v19  ;;  %7417 = vmatprep.subr.bf16.mxu1 %v9572_v28 }
0x1577   :  { %7387 = vmatpush1.bf16.msra.mxu0 %v9570_v14  ;;  %7419 = vmatpush1.bf16.msra.mxu1 %v9576_v33 }
0x1578   :  { %7389 = vmatprep.subr.bf16.mxu0 %v9578_v16  ;;  %7421 = vmatprep.subr.bf16.mxu1 %v9584_v63 }
0x157b   :  { %7391 = vmatpush1.bf16.msra.mxu0 %v9586_v37  ;;  %7423 = vmatpush1.bf16.msra.mxu1 %v9589_v38 }
0x157c   :  { %7425 = vmatprep.subr.bf16.mxu0 %v9497_v56  ;;  %7457 = vmatprep.subr.bf16.mxu1 %v9501_v26 }
0x1631   :  { %v4968_v2 = vpop.f32.mrb[42].mxu0  ;;  %v5039_v31 = vpop.f32.mrb[44].mxu1 }
0x1632   :  { %v7596_v9 = vadd.f32 %v4968_v2, %v9642_v24  ;;  %v4970_v15 = vpop.f32.mrb[43].mxu0  ;;  %v5041_v17 = vpop.f32.mrb[45].mxu1  ;;  %v7612_v46 = vadd.f32 %v5039_v31, %v9649_v23 }
0x1633   :  { %v7597_v34 = vadd.f32 %v4970_v15, %v9645_v45  ;;  %v7613_v36 = vadd.f32 %v5041_v17, %v9654_v21  ;;  %v5413_v15 = vld [vmem:[#allocation17 + $0x20] sm:$0xff]  ;;  %v5414_v17 = vld [vmem:[#allocation17 + $0x28] sm:$0xff] }
0x1634   :  { %v5048_v55 = vmul.f32 0.5, %v7596_v9 }
0x1635   :  { %v5052_v41 = vmul.f32 0.5, %v7597_v34  ;;  %v5057_v56 = vmul.f32 0.5, %v7613_v36  ;;  %v7496_v34 = vpack.c.bf16 %v5414_v17, %v5413_v15  ;;  %v5417_v36 = vld [vmem:[#allocation17 + $0x40] sm:$0xff] }
0x1636   :  { %7952 = vtanh.f32 %v5048_v55  ;;  %v5415_v55 = vld [vmem:[#allocation17 + $0x30] sm:$0xff] }
0x1637   :  { %7954 = vtanh.f32 %v5052_v41  ;;  %v5416_v41 = vld [vmem:[#allocation17 + $0x38] sm:$0xff] }
0x1638   :  { %7956 = vtanh.f32 %v7612_v46  ;;  %v7500_v46 = vpack.c.bf16 %v5416_v41, %v5415_v55 }
0x1639   :  { %7958 = vtanh.f32 %v5057_v56  ;;  %v5418_v56 = vld [vmem:[#allocation17 + $0x48] sm:$0xff] }
0x1640   :  { %v7953_v58 = vpop.eup %7952 }
0x1641   :  { %v7955_v26 = vpop.eup %7954  ;;  %v5050_v47 = vmul.f32 0.5, %v7953_v58  ;;  %v7504_v58 = vpack.c.bf16 %v5418_v56, %v5417_v36 }
0x1642   :  { %v5054_v50 = vmul.f32 0.5, %v7955_v26  ;;  %v7957_v22 = vpop.eup %7956  ;;  %v5419_v26 = vld [vmem:[#allocation17 + $0x50] sm:$0xff] }
0x1643   :  { %v5051_v40 = vadd.f32 0.5, %v5050_v47  ;;  %v7959_v54 = vpop.eup %7958  ;;  %v5420_v47 = vld [vmem:[#allocation17 + $0x58] sm:$0xff] }
0x1644   :  { %v5055_v59 = vadd.f32 0.5, %v5054_v50  ;;  %v5059_v18 = vmul.f32 0.5, %v7959_v54  ;;  %v7508_v50 = vpack.c.bf16 %v5420_v47, %v5419_v26 }
0x1645   :  { %v5062_v29 = vmul.f32 %v7957_v22, %v5051_v40  ;;  %v5421_v40 = vld [vmem:[#allocation17 + $0x60] sm:$0xff]  ;;  %v5422_v22 = vld [vmem:[#allocation17 + $0x68] sm:$0xff] }
0x1646   :  { %v5061_v49 = vmul.f32 %v5055_v59, %v9841_v61  ;;  %v5060_v2 = vadd.f32 0.5, %v5059_v18  ;;  %v5423_v59 = vld [vmem:[#allocation17 + $0x70] sm:$0xff] }
0x1648   :  { %v9887_v44 = vadd.f32 %v5062_v29, %v5061_v49  ;;  %v5424_v29 = vld [vmem:[#allocation17 + $0x78] sm:$0xff] }
0x1649   :  { %v7516_v49 = vpack.c.bf16 %v5424_v29, %v5423_v59 }
0x164a   :  { %7960 = vtanh.f32 %v9887_v44 }
0x1654   :  { %v7961_v31 = vpop.eup %7960 }
0x1655   :  { %v9890_v9 = vmul.f32 %v7961_v31, %v5060_v2 }
0x1657   :  { %5132 = vmatmul.mubr.f32.vlgmr.msra.gmra.mrb[44].mxu0 %v9890_v9  ;;  %5203 = vmatmul.mubr.f32.vlgmr.msra.gmra.mrb[46].mxu1 %v9890_v9 }
0x1658   :  { %7427 = vmatpush1.bf16.msra.mxu0 %v9499_v1  ;;  %7459 = vmatpush1.bf16.msra.mxu1 %v9504_v39  ;;  %v5410_v1 = vld [vmem:[#allocation17 + $0x8] sm:$0xff] }
0x1659   :  { %7429 = vmatprep.subr.bf16.mxu0 %v9509_v48  ;;  %7461 = vmatprep.subr.bf16.mxu1 %v9513_v12 }
0x165a   :  { %5296 = vmatprep.mubr.f32.mxu0 %v10064_v0  ;;  %5367 = vmatprep.mubr.f32.mxu1 %v10064_v0  ;;  %v5409_v0 = vld [vmem:[#allocation17] sm:$0xff] }
0x165b   :  { %v7488_v39 = vpack.c.bf16 %v5410_v1, %v5409_v0 }
0x165c   :  { %7431 = vmatpush1.bf16.msra.mxu0 %v9511_v11  ;;  %7463 = vmatpush1.bf16.msra.mxu1 %v9516_v42 }
0x165d   :  { %7433 = vmatprep.subr.bf16.mxu0 %v9521_v6  ;;  %7465 = vmatprep.subr.bf16.mxu1 %v9525_v4 }
0x1660   :  { %7435 = vmatpush1.bf16.msra.mxu0 %v9523_v53  ;;  %7467 = vmatpush1.bf16.msra.mxu1 %v9528_v8 }
0x1661   :  { %7437 = vmatprep.subr.bf16.mxu0 %v9533_v13  ;;  %7469 = vmatprep.subr.bf16.mxu1 %v9537_v25 }
0x1664   :  { %7439 = vmatpush1.bf16.msra.mxu0 %v9535_v62  ;;  %7471 = vmatpush1.bf16.msra.mxu1 %v9540_v7 }
0x1665   :  { %7441 = vmatprep.subr.bf16.mxu0 %v9545_v60  ;;  %7473 = vmatprep.subr.bf16.mxu1 %v9549_v20 }
0x1668   :  { %7443 = vmatpush1.bf16.msra.mxu0 %v9547_v32  ;;  %7475 = vmatpush1.bf16.msra.mxu1 %v9552_v57 }
0x1669   :  { %7445 = vmatprep.subr.bf16.mxu0 %v9556_v51  ;;  %7477 = vmatprep.subr.bf16.mxu1 %v9561_v5 }
0x166c   :  { %7447 = vmatpush1.bf16.msra.mxu0 %v9558_v10  ;;  %7479 = vmatpush1.bf16.msra.mxu1 %v9564_v3 }
0x166d   :  { %7449 = vmatprep.subr.bf16.mxu0 %v9566_v19  ;;  %7481 = vmatprep.subr.bf16.mxu1 %v9572_v28 }
0x1670   :  { %7451 = vmatpush1.bf16.msra.mxu0 %v9570_v14  ;;  %7483 = vmatpush1.bf16.msra.mxu1 %v9576_v33  ;;  %v5411_v33 = vld [vmem:[#allocation17 + $0x10] sm:$0xff] }
0x1671   :  { %7453 = vmatprep.subr.bf16.mxu0 %v9578_v16  ;;  %7485 = vmatprep.subr.bf16.mxu1 %v9584_v63  ;;  %v5412_v16 = vld [vmem:[#allocation17 + $0x18] sm:$0xff] }
0x1672   :  { %v7492_v61 = vpack.c.bf16 %v5412_v16, %v5411_v33  ;;  %v10065_v33 = vld [vmem:[#allocation28_spill] sm:$0xff] }
0x1674   :  { %7455 = vmatpush1.bf16.msra.mxu0 %v9586_v37  ;;  %7487 = vmatpush1.bf16.msra.mxu1 %v9589_v38 }
0x1675   :  { %7489 = vmatprep.subr.bf16.mxu0 %v7488_v39 }
0x172a   :  { %v5133_v48 = vpop.f32.mrb[44].mxu0  ;;  %v5204_v11 = vpop.f32.mrb[46].mxu1 }
0x172b   :  { %v7598_v12 = vadd.f32 %v5133_v48, %v9642_v24  ;;  %v5135_v42 = vpop.f32.mrb[45].mxu0  ;;  %v5206_v6 = vpop.f32.mrb[47].mxu1  ;;  %v7614_v13 = vadd.f32 %v5204_v11, %v9649_v23 }
0x172c   :  { %v7599_v53 = vadd.f32 %v5135_v42, %v9645_v45  ;;  %v7615_v62 = vadd.f32 %v5206_v6, %v9654_v21 }
0x172d   :  { %v5213_v4 = vmul.f32 0.5, %v7598_v12 }
0x172e   :  { %v5217_v8 = vmul.f32 0.5, %v7599_v53  ;;  %v5222_v25 = vmul.f32 0.5, %v7615_v62  ;;  %v5739_v62 = vld [vmem:[%s10052_s11] ss:$0 sm:$0xff]  ;;  %s8254_s11 = smov [#allocation18]  }
0x172f   :  { %7962 = vtanh.f32 %v5213_v4  ;;  %s5689_s30 = sshll.u32 %s8254_s11, 4  ;;  %s5690_s30 = int_to_ptr.vmem [resolvable:$true] %s5689_s30 }
0x1730   :  { %7964 = vtanh.f32 %v5217_v8  ;;  %s8180_s29 = scalar_lea.vmem %s5690_s30, 384  ;;  %p8185_p3 = scmp.lt.s32.totalorder %s5690_s30, %s5690_s30 }
0x1731   :  { %7966 = vtanh.f32 %v7614_v13  ;;  %p8181_p2 = scmp.ne.s32.totalorder %s5690_s30, %s8180_s29  ;;  %p8186_p4 = scmp.lt.s32.totalorder %s8180_s29, %s8180_s29 }
0x1732   :  { %7968 = vtanh.f32 %v5222_v25 }
0x1733   :  { %p8187_p5 = por %p8186_p4, %p8185_p3 }
0x1735   :  { %p8188_p6 = pnand %p8187_p5, %p8181_p2 }
0x1739   :  { %v7963_v7 = vpop.eup %7962 }
0x173a   :  { %v7965_v60 = vpop.eup %7964  ;;  %v5215_v32 = vmul.f32 0.5, %v7963_v7 }
0x173b   :  { %v5219_v20 = vmul.f32 0.5, %v7965_v60  ;;  %v7967_v51 = vpop.eup %7966 }
0x173c   :  { %v5216_v57 = vadd.f32 0.5, %v5215_v32  ;;  %v7969_v14 = vpop.eup %7968 }
0x173d   :  { %v5220_v10 = vadd.f32 0.5, %v5219_v20  ;;  %v5224_v28 = vmul.f32 0.5, %v7969_v14 }
0x173e   :  { %v5227_v5 = vmul.f32 %v7967_v51, %v5216_v57 }
0x173f   :  { %v5226_v3 = vmul.f32 %v5220_v10, %v9887_v44  ;;  %v5225_v63 = vadd.f32 0.5, %v5224_v28 }
0x1741   :  { %v9931_v19 = vadd.f32 %v5227_v5, %v5226_v3 }
0x1743   :  { %7970 = vtanh.f32 %v9931_v19 }
0x174d   :  { %v7971_v37 = vpop.eup %7970 }
0x174e   :  { %v5230_v38 = vmul.f32 %v7971_v37, %v5225_v63 }
0x1750   :  { %5297 = vmatmul.mubr.f32.vlgmr.msra.gmra.mrb[46].mxu0 %v5230_v38  ;;  %5368 = vmatmul.mubr.f32.vlgmr.msra.gmra.mrb[48].mxu1 %v5230_v38 }
0x1751   :  { %7491 = vmatpush3.bf16.msra.mxu0 %v7488_v39  ;;  %5796 = vmatprep.mubr.f32.mxu0 %v9660_v43  ;;  %v7512_v43 = vpack.c.bf16 %v5422_v22, %v5421_v40 }
0x1752   :  { %7493 = vmatprep.subr.bf16.mxu0 %v7492_v61 }
0x1755   :  { %7495 = vmatpush3.bf16.msra.mxu0 %v7492_v61 }
0x1756   :  { %7497 = vmatprep.subr.bf16.mxu0 %v7496_v34 }
0x1759   :  { %7499 = vmatpush3.bf16.msra.mxu0 %v7496_v34 }
0x175a   :  { %7501 = vmatprep.subr.bf16.mxu0 %v7500_v46 }
0x175d   :  { %7503 = vmatpush3.bf16.msra.mxu0 %v7500_v46 }
0x175e   :  { %7505 = vmatprep.subr.bf16.mxu0 %v7504_v58 }
0x1761   :  { %7507 = vmatpush3.bf16.msra.mxu0 %v7504_v58 }
0x1762   :  { %7509 = vmatprep.subr.bf16.mxu0 %v7508_v50 }
0x1765   :  { %7511 = vmatpush3.bf16.msra.mxu0 %v7508_v50 }
0x1766   :  { %7513 = vmatprep.subr.bf16.mxu0 %v7512_v43 }
0x1769   :  { %7515 = vmatpush3.bf16.msra.mxu0 %v7512_v43 }
0x176a   :  { %7517 = vmatprep.subr.bf16.mxu0 %v7516_v49 }
0x176d   :  { %7519 = vmatpush3.bf16.msra.mxu0 %v7516_v49 }
0x1770   :  { %5797 = vmatmul.mubr.f32.vlgmr.msra.gmra.mrb[48].mxu0 %v9706_v30 }
0x1771   :  { %5799 = vmatprep.mubr.f32.mxu0 %v9752_v27 }
0x1774   :  { %5800 = vmatmul.mubr.f32.gmra.mrb[50].mxu0 %v9798_v52 }
0x1775   :  { %5802 = vmatprep.mubr.f32.mxu0 %v9844_v35 }
0x1778   :  { %5803 = vmatmul.mubr.f32.gmra.mrb[52].mxu0 %v9890_v9 }
0x1779   :  { %5805 = vmatprep.mubr.f32.mxu0 %v5230_v38 }
0x1823   :  { %v5298_v44 = vpop.f32.mrb[46].mxu0  ;;  %v5369_v54 = vpop.f32.mrb[48].mxu1 }
0x1824   :  { %v7600_v18 = vadd.f32 %v5298_v44, %v9642_v24  ;;  %v5300_v2 = vpop.f32.mrb[47].mxu0  ;;  %v5371_v31 = vpop.f32.mrb[49].mxu1  ;;  %v7616_v30 = vadd.f32 %v5369_v54, %v9649_v23 }
0x1825   :  { %v7601_v0 = vadd.f32 %v5300_v2, %v9645_v45  ;;  %v7617_v27 = vadd.f32 %v5371_v31, %v9654_v21 }
0x1826   :  { %v5378_v1 = vmul.f32 0.5, %v7600_v18 }
0x1827   :  { %v5382_v39 = vmul.f32 0.5, %v7601_v0  ;;  %v5387_v52 = vmul.f32 0.5, %v7617_v27 }
0x1828   :  { %7972 = vtanh.f32 %v5378_v1 }
0x1829   :  { %7974 = vtanh.f32 %v5382_v39 }
0x182a   :  { %7976 = vtanh.f32 %v7616_v30 }
0x182b   :  { %7978 = vtanh.f32 %v5387_v52 }
0x1832   :  { %v7973_v35 = vpop.eup %7972 }
0x1833   :  { %v7975_v9 = vpop.eup %7974  ;;  %v5380_v48 = vmul.f32 0.5, %v7973_v35 }
0x1834   :  { %v5384_v11 = vmul.f32 0.5, %v7975_v9  ;;  %v7977_v12 = vpop.eup %7976 }
0x1835   :  { %v5381_v24 = vadd.f32 0.5, %v5380_v48  ;;  %v7979_v23 = vpop.eup %7978 }
0x1836   :  { %v5385_v42 = vadd.f32 0.5, %v5384_v11  ;;  %v5389_v4 = vmul.f32 0.5, %v7979_v23 }
0x1837   :  { %v5392_v6 = vmul.f32 %v7977_v12, %v5381_v24 }
0x1838   :  { %v5391_v45 = vmul.f32 %v5385_v42, %v9931_v19  ;;  %v5390_v21 = vadd.f32 0.5, %v5389_v4 }
0x183a   :  { %v5393_v53 = vadd.f32 %v5392_v6, %v5391_v45 }
0x183c   :  { %7980 = vtanh.f32 %v5393_v53  ;;  %5400 = vst [vmem:[#allocation19 + $0x10] sm:$0xff] %v5393_v53 }
0x1843   :  { %v5798_v8 = vpop.f32.mrb[48].mxu0 }
0x1844   :  { %v5498_v13 = vpop.f32.mrb[49].mxu0  ;;  %v5504_v32 = vadd.f32 %v5798_v8, %v5739_v62 }
0x1845   :  { %v5499_v51 = vadd.f32 %v5739_v62, %v5498_v13 }
0x1846   :  { %v7981_v25 = vpop.eup %7980 }
0x1847   :  { %v5801_v7 = vpop.f32.mrb[50].mxu0  ;;  %v5395_v60 = vmul.f32 %v7981_v25, %v5390_v21 }
0x1848   :  { %v5514_v20 = vadd.f32 %v5801_v7, %v5739_v62  ;;  %v5508_v57 = vpop.f32.mrb[51].mxu0 }
0x1849   :  { %v5509_v10 = vadd.f32 %v5739_v62, %v5508_v57  ;;  %5806 = vmatmul.mubr.f32.gmra.mrb[54].mxu0 %v5395_v60  ;;  %5398 = vst [vmem:[#allocation18 + $0x10] sm:$0xff] %v5395_v60 }
0x184a   :  { %v5553_v5 = vcombine.low %v5504_v32, %v5514_v20  ;;  %v5554_v3 = vcombine.high %v5504_v32, %v5514_v20 }
0x184b   :  { %v5537_v19 = vcombine.low %v5499_v51, %v5509_v10  ;;  %v5538_v14 = vcombine.high %v5499_v51, %v5509_v10  ;;  %v5804_v28 = vpop.f32.mrb[52].mxu0 }
0x184c   :  { %v5561_v16 = vrot.slane %v5553_v5, %v10065_v33  ;;  %v9950_v63 = vrot.slane %v5554_v3, %v10065_v33  ;;  %v5518_v37 = vpop.f32.mrb[53].mxu0 }
0x184d   :  { %v5545_v38 = vrot.slane %v5537_v19, %v10065_v33  ;;  %v9954_v61 = vrot.slane %v5538_v14, %v10065_v33 }
0x184f   :  { %v5601_v15 = vcombine.low %v5545_v38, %v5561_v16  ;;  %v5602_v17 = vcombine.high %v5545_v38, %v5561_v16  ;;  %v5617_v34 = vcombine.low %v9954_v61, %v9950_v63  ;;  %v5618_v55 = vcombine.high %v9954_v61, %v9950_v63 }
0x1850   :  { %8191 = shalt.err (!%p8188_p6)
}
0x1851   :  { %s8192_s4 = scalar_lea.hbm %s10054_s13, 384 }
0x1852   :  { %p8193_p7 = scmp.ne.s32.totalorder %s10054_s13, %s8192_s4  ;;  %p8196_p8 = scmp.lt.u32.totalorder %s8192_s4, %s10054_s13 }
0x1854   :  { %p8198_p9 = pnand %p8196_p8, %p8193_p7 }
0x1856   :  { %8201 = shalt.err (!%p8198_p9)
}
0x1857   :  { %5695 = dma.vmem_to_hbm [thread:$0]  %s5690_s30, 384, %s10054_s13, [#allocation5], %s8245_s8, %s8245_s8, %s8246_s22  }
0x1858   :  { %s8202_s18 = scalar_lea.vmem %s9960_s27, 384  ;;  %p8207_p11 = scmp.lt.s32.totalorder %s9960_s27, %s9960_s27 }
0x1859   :  { %p8203_p10 = scmp.ne.s32.totalorder %s9960_s27, %s8202_s18  ;;  %p8208_p12 = scmp.lt.s32.totalorder %s8202_s18, %s8202_s18 }
0x185b   :  { %p8209_p13 = por %p8208_p12, %p8207_p11 }
0x185d   :  { %p8210_p0 = pnand %p8209_p13, %p8203_p10 }
0x185f   :  { %8213 = shalt.err (!%p8210_p0)
}
0x1860   :  { %s8214_s0 = scalar_lea.hbm %s10055_s14, 384 }
0x1861   :  { %p8215_p1 = scmp.ne.s32.totalorder %s10055_s14, %s8214_s0  ;;  %p8218_p2 = scmp.lt.u32.totalorder %s8214_s0, %s10055_s14 }
0x1863   :  { %p8220_p3 = pnand %p8218_p2, %p8215_p1 }
0x1865   :  { %8223 = shalt.err (!%p8220_p3)
}
0x1866   :  { %5707 = dma.vmem_to_hbm [thread:$0]  %s9960_s27, 384, %s10055_s14, [#allocation20], %s8245_s8, %s8245_s8, %s8246_s22   ;;  %v5524_v46 = vadd.f32 %v5804_v28, %v5739_v62  ;;  %v5519_v58 = vadd.f32 %v5739_v62, %v5518_v37  ;;  %v10066_v31 = vld [vmem:[#allocation29_spill] sm:$0xff]  ;;  %vm5673_vm1 = vcmask 64512  }
0x1867   :  { %v5609_v0 = vrot.slane %v5601_v15, %v10066_v31  ;;  %v5616_v1 = vrot.slane %v5602_v17, %v10066_v31  ;;  %v5625_v35 = vrot.slane %v5617_v34, %v10066_v31  ;;  %v5632_v9 = vrot.slane %v5618_v55, %v10066_v31 }
0x191c   :  { %v5807_v41 = vpop.f32.mrb[54].mxu0 }
0x191d   :  { %v5534_v36 = vadd.f32 %v5807_v41, %v5739_v62  ;;  %v5528_v56 = vpop.f32.mrb[55].mxu0 }
0x191e   :  { %v5529_v26 = vadd.f32 %v5739_v62, %v5528_v56 }
0x191f   :  { %v5585_v47 = vcombine.low %v5524_v46, %v5534_v36  ;;  %v5586_v50 = vcombine.high %v5524_v46, %v5534_v36 }
0x1920   :  { %v5569_v40 = vcombine.low %v5519_v58, %v5529_v26  ;;  %v5570_v22 = vcombine.high %v5519_v58, %v5529_v26 }
0x1921   :  { %v5593_v43 = vrot.slane %v5585_v47, %v10065_v33  ;;  %v5600_v59 = vrot.slane %v5586_v50, %v10065_v33 }
0x1922   :  { %v5577_v29 = vrot.slane %v5569_v40, %v10065_v33  ;;  %v5584_v49 = vrot.slane %v5570_v22, %v10065_v33 }
0x1924   :  { %v5633_v44 = vcombine.low %v5577_v29, %v5593_v43  ;;  %v5634_v54 = vcombine.high %v5577_v29, %v5593_v43  ;;  %v5649_v18 = vcombine.low %v5584_v49, %v5600_v59  ;;  %v5650_v2 = vcombine.high %v5584_v49, %v5600_v59 }
0x1926   :  { %v5641_v39 = vrot.slane %v5633_v44, %v10066_v31  ;;  %v5648_v30 = vrot.slane %v5634_v54, %v10066_v31  ;;  %v5657_v27 = vrot.slane %v5649_v18, %v10066_v31  ;;  %v5664_v52 = vrot.slane %v5650_v2, %v10066_v31 }
0x1928   :  { %v5665_v48 = vcombine.low %v5609_v0, %v5641_v39  ;;  %v5666_v11 = vcombine.high %v5609_v0, %v5641_v39  ;;  %v5667_v24 = vcombine.low %v5616_v1, %v5648_v30  ;;  %v5668_v12 = vcombine.high %v5616_v1, %v5648_v30 }
0x1929   :  { %v5669_v42 = vcombine.low %v5625_v35, %v5657_v27  ;;  %v5670_v6 = vcombine.high %v5625_v35, %v5657_v27  ;;  %v5671_v45 = vcombine.low %v5632_v9, %v5664_v52  ;;  %v5672_v53 = vcombine.high %v5632_v9, %v5664_v52 }
0x192a   :  { %5674 = vst.msk [vmem:[%s10053_s12] sm:$0xff] %vm5673_vm1, %v5665_v48  ;;  %5675 = vst.msk [vmem:[%s10053_s12 + $0x8] sm:$0xff] %vm5673_vm1, %v5666_v11 }
0x192b   :  { %5676 = vst.msk [vmem:[%s10053_s12 + $0x10] sm:$0xff] %vm5673_vm1, %v5667_v24  ;;  %5677 = vst.msk [vmem:[%s10053_s12 + $0x18] sm:$0xff] %vm5673_vm1, %v5668_v12 }
0x192c   :  { %5678 = vst.msk [vmem:[%s10053_s12 + $0x20] sm:$0xff] %vm5673_vm1, %v5669_v42  ;;  %5679 = vst.msk [vmem:[%s10053_s12 + $0x28] sm:$0xff] %vm5673_vm1, %v5670_v6 }
0x192d   :  { %5680 = vst.msk [vmem:[%s10053_s12 + $0x30] sm:$0xff] %vm5673_vm1, %v5671_v45  ;;  %5681 = vst.msk [vmem:[%s10053_s12 + $0x38] sm:$0xff] %vm5673_vm1, %v5672_v53 }
0x192e   :  { %8234 = dma.done.wait [#allocation5], 384  }
0x192f   :  { %8235 = vsyncadd [#allocation5], 4294966912 }
0x1930   :  { %8236 = dma.done.wait [#allocation20], 384  }
0x1931   :  { %8237 = vsyncadd [#allocation20], 4294966912 }
0x1932   :  { %5716 = vsyncpa [#allocation4], 1 }
0x1933   :  { %5717 = vsyncpa [#allocation7], 1 }
0x1934   :  { %5718 = vsyncpa [#allocation10], 1 }
0x1935   :  { %5719 = vsyncpa [#allocation13], 1 }
0x1936   :  { %5720 = vsyncpa [#allocation16], 1 }
0x1937   :  { %5721 = vsyncpa [#allocation5], 1 }
0x1938   :  { %5722 = vsyncpa [#allocation20], 1 }

</bundles_post_ra>
